<compile_context>
chip_gen: v6e
topology: v6e:2x2x1
jax: 0.10.0
libtpu: 0.0.40
codegen_flags: <defaults>
</compile_context>

<pallas_src>
import functools

import jax
import jax.numpy as jnp
from jax.experimental import pallas as pl
from jax.experimental.pallas import tpu as pltpu


def _round_up(x, m):
    return ((x + m - 1) // m) * m


def _pick_block_batch(b):
    """Largest batch tile that fits scoped VMEM on all of v5e/v6e/v7x.

    B <= 512: single grid step (block == full row extent, legal for BlockSpec).
    B  > 512: 512-row tiles -> multi-step 'parallel' grid (pipelining +
              megacore/2-TC sharding); 512*784*4*2 out buffers + ~1 MB weights
              stay comfortably under v5e's 16 MiB default scoped VMEM.
    """
    if b <= 512:
        return b
    return 512


def decoder_kernel(z_ref, w1_ref, b1_ref, w2_ref, b2_ref, out_ref):
    # fc1 (bf16 operands, f32 accumulation) + bias + tanh in f32
    z = z_ref[...].astype(jnp.bfloat16)
    h = jnp.dot(z, w1_ref[...], preferred_element_type=jnp.float32) + b1_ref[...]
    h = jnp.tanh(h)
    # fc2 (bf16 operands, f32 accumulation) + bias + sigmoid in f32
    logits = (
        jnp.dot(h.astype(jnp.bfloat16), w2_ref[...],
                preferred_element_type=jnp.float32)
        + b2_ref[...]
    )
    out_ref[...] = jax.nn.sigmoid(logits).astype(out_ref.dtype)


def prepare_params(w1, b1, w2, b2):
    """One-time parameter prep: pad hidden dim 500 -> 512 and cast to bf16.

    Runs ONCE (at init / checkpoint load), NOT per forward call.
    w1: (L, H) f32, b1: (1, H) f32, w2: (H, D) f32, b2: (1, D) f32.
    Returns (w1_p, b1_p, w2_p, b2_p) with hidden dim padded to a multiple of 128.
    Padded w1 columns / b1 lanes give tanh(0)=0 and padded w2 rows are zero, so
    padding contributes exactly 0 to the output.
    """
    L, H = w1.shape
    Hw, D = w2.shape
    assert Hw == H
    Hp = _round_up(H, 128)  # 500 -> 512
    w1_p = jnp.pad(w1, ((0, 0), (0, Hp - H))).astype(jnp.bfloat16)
    b1_p = jnp.pad(b1.reshape(1, H), ((0, 0), (0, Hp - H))).astype(jnp.float32)
    w2_p = jnp.pad(w2, ((0, Hp - H), (0, 0))).astype(jnp.bfloat16)
    b2_p = b2.reshape(1, D).astype(jnp.float32)
    return w1_p, b1_p, w2_p, b2_p


@functools.partial(jax.jit, static_argnames=("block_batch",))
def decoder_forward(z, w1_p, b1_p, w2_p, b2_p, *, block_batch=None):
    """VAE Decoder forward: sigmoid(tanh(z @ w1 + b1) @ w2 + b2).

    z:    (B, L)  f32
    w1_p: (L, Hp) bf16   b1_p: (1, Hp) f32   (pre-padded via prepare_params)
    w2_p: (Hp, D) bf16   b2_p: (1, D)  f32
    Returns (B, D) f32.
    """
    B, L = z.shape
    Lw, Hp = w1_p.shape
    Hpw, D = w2_p.shape
    assert Lw == L and Hpw == Hp

    if block_batch is None:
        block_batch = _pick_block_batch(B)
    grid = (pl.cdiv(B, block_batch),)

    # Advisory cost hint for XLA scheduling around this custom call.
    flops = 2 * B * (L * Hp + Hp * D)
    transcendentals = B * (Hp + D)
    bytes_accessed = (
        w1_p.size * 2 + w2_p.size * 2          # bf16 weights
        + b1_p.size * 4 + b2_p.size * 4        # f32 biases
        + B * L * 4 + B * D * 4                # z in, p out (f32)
    )

    return pl.pallas_call(
        decoder_kernel,
        out_shape=jax.ShapeDtypeStruct((B, D), jnp.float32),
        grid_spec=pltpu.PrefetchScalarGridSpec(
            num_scalar_prefetch=0,
            grid=grid,
            in_specs=[
                pl.BlockSpec((block_batch, L), lambda i: (i, 0)),  # z tile
                pl.BlockSpec((L, Hp), lambda i: (0, 0)),           # fc1 weight (bf16)
                pl.BlockSpec((1, Hp), lambda i: (0, 0)),           # fc1 bias (f32)
                pl.BlockSpec((Hp, D), lambda i: (0, 0)),           # fc2 weight (bf16)
                pl.BlockSpec((1, D), lambda i: (0, 0)),            # fc2 bias (f32)
            ],
            # Last dim = 784 equals the full array dim -> legal, true-shape write
            # (no padded output, no post-kernel slice / extra HBM pass).
            out_specs=pl.BlockSpec((block_batch, D), lambda i: (i, 0)),
        ),
        compiler_params=pltpu.CompilerParams(
            dimension_semantics=("parallel",),
        ),
        cost_estimate=pl.CostEstimate(
            flops=flops,
            transcendentals=transcendentals,
            bytes_accessed=bytes_accessed,
        ),
    )(z, w1_p, b1_p, w2_p, b2_p)


def init_params(key, latent_dimension, hidden_units, data_dimension):
    """Deterministic synthetic parameters (PyTorch Linear-like uniform init)."""
    del hidden_units  # the PyTorch module hardcodes 500 for fc1's output
    hidden = 500
    k1, k2, k3, k4 = jax.random.split(key, 4)
    bound1 = 1.0 / jnp.sqrt(latent_dimension)
    bound2 = 1.0 / jnp.sqrt(hidden)
    # Stored as (in, out): transposed relative to PyTorch's (out, in).
    w1 = jax.random.uniform(k1, (latent_dimension, hidden),
                            jnp.float32, -bound1, bound1)
    b1 = jax.random.uniform(k2, (1, hidden), jnp.float32, -bound1, bound1)
    w2 = jax.random.uniform(k3, (hidden, data_dimension),
                            jnp.float32, -bound2, bound2)
    b2 = jax.random.uniform(k4, (1, data_dimension), jnp.float32, -bound2, bound2)
    return w1, b1, w2, b2


if __name__ == "__main__":
    latent_dimension = 8
    hidden_units = 500      # unused by the module; fc1 hardcodes 500
    data_dimension = 784
    batch = 256             # B <= 512 -> single grid step, full-MXU M

    key = jax.random.PRNGKey(0)
    kz, kp = jax.random.split(key)
    z = jax.random.normal(kz, (batch, latent_dimension), jnp.float32)
    w1, b1, w2, b2 = init_params(kp, latent_dimension, hidden_units, data_dimension)

    # One-time padding + bf16 cast (hoisted out of the per-call path).
    w1_p, b1_p, w2_p, b2_p = prepare_params(w1, b1, w2, b2)
    w1_p, b1_p, w2_p, b2_p = jax.block_until_ready((w1_p, b1_p, w2_p, b2_p))

    p = decoder_forward(z, w1_p, b1_p, w2_p, b2_p)
    p = jax.block_until_ready(p)
    assert p.shape == (batch, data_dimension)

    # Mixed-precision reference that mirrors the kernel's numerics
    # (bf16 operands, f32 accumulation, f32 bias/activations).
    h_ref = jnp.tanh(
        jnp.dot(z.astype(jnp.bfloat16), w1.astype(jnp.bfloat16),
                preferred_element_type=jnp.float32) + b1)
    logits_ref = jnp.dot(h_ref.astype(jnp.bfloat16), w2.astype(jnp.bfloat16),
                         preferred_element_type=jnp.float32) + b2
    ref_mixed = jax.nn.sigmoid(logits_ref)
    assert jnp.max(jnp.abs(p - ref_mixed)) < 2e-4

    # Loose sanity check against the pure-f32 PyTorch semantics
    # (difference only from bf16 weight/activation rounding).
    ref_f32 = jax.nn.sigmoid(jnp.tanh(z @ w1 + b1) @ w2 + b2)
    assert jnp.max(jnp.abs(p - ref_f32)) < 5e-2

    print("KERNEL_OK")
</pallas_src>

<mosaic_0001>
module attributes {stable_mosaic.version = 11 : i64} {
  func.func @decoder_kernel(%arg0: i32, %arg1: memref<256x8xf32, #tpu.memory_space<vmem>>, %arg2: memref<8x512xbf16, #tpu.memory_space<vmem>>, %arg3: memref<1x512xf32, #tpu.memory_space<vmem>>, %arg4: memref<512x784xbf16, #tpu.memory_space<vmem>>, %arg5: memref<1x784xf32, #tpu.memory_space<vmem>>, %arg6: memref<256x784xf32, #tpu.memory_space<vmem>>) attributes {dimension_semantics = [#tpu.dimension_semantics<parallel>], iteration_bounds = array<i64: 1>, scalar_prefetch = 0 : i64, scratch_operands = 0 : i64, tpu.core_type = #tpu.core_type<tc>, window_params = [{transform_indices = @transform_0, window_bounds = array<i64: 256, 8>}, {pipeline_mode = #tpu.pipeline_mode<synchronous>, transform_indices = @transform_1, window_bounds = array<i64: 8, 512>}, {pipeline_mode = #tpu.pipeline_mode<synchronous>, transform_indices = @transform_2, window_bounds = array<i64: 1, 512>}, {pipeline_mode = #tpu.pipeline_mode<synchronous>, transform_indices = @transform_3, window_bounds = array<i64: 512, 784>}, {pipeline_mode = #tpu.pipeline_mode<synchronous>, transform_indices = @transform_4, window_bounds = array<i64: 1, 784>}, {transform_indices = @transform_5, window_bounds = array<i64: 256, 784>}]} {
    %c0 = arith.constant 0 : index
    %c0_0 = arith.constant 0 : index
    %0 = vector.load %arg1[%c0, %c0_0] : memref<256x8xf32, #tpu.memory_space<vmem>>, vector<256x8xf32>
    %1 = arith.truncf %0 : vector<256x8xf32> to vector<256x8xbf16>
    %c0_1 = arith.constant 0 : index
    %c0_2 = arith.constant 0 : index
    %2 = vector.load %arg2[%c0_1, %c0_2] : memref<8x512xbf16, #tpu.memory_space<vmem>>, vector<8x512xbf16>
    %cst = arith.constant dense<0.000000e+00> : vector<256x512xf32>
    %3 = tpu.matmul %1, %2, %cst {dimension_numbers = #tpu.dot_dimension_numbers<[1], [0], [0], [1], [0, 0, 1, 1], [], []>} : vector<256x8xbf16>, vector<8x512xbf16>, vector<256x512xf32> -> vector<256x512xf32>
    %c0_3 = arith.constant 0 : index
    %c0_4 = arith.constant 0 : index
    %4 = vector.load %arg3[%c0_3, %c0_4] : memref<1x512xf32, #tpu.memory_space<vmem>>, vector<1x512xf32>
    %5 = vector.broadcast %4 : vector<1x512xf32> to vector<256x512xf32>
    %6 = arith.addf %3, %5 : vector<256x512xf32>
    %7 = math.tanh %6 : vector<256x512xf32>
    %8 = arith.truncf %7 : vector<256x512xf32> to vector<256x512xbf16>
    %c0_5 = arith.constant 0 : index
    %c0_6 = arith.constant 0 : index
    %9 = vector.load %arg4[%c0_5, %c0_6] : memref<512x784xbf16, #tpu.memory_space<vmem>>, vector<512x784xbf16>
    %cst_7 = arith.constant dense<0.000000e+00> : vector<256x784xf32>
    %10 = tpu.matmul %8, %9, %cst_7 {dimension_numbers = #tpu.dot_dimension_numbers<[1], [0], [0], [1], [0, 0, 1, 1], [], []>} : vector<256x512xbf16>, vector<512x784xbf16>, vector<256x784xf32> -> vector<256x784xf32>
    %c0_8 = arith.constant 0 : index
    %c0_9 = arith.constant 0 : index
    %11 = vector.load %arg5[%c0_8, %c0_9] : memref<1x784xf32, #tpu.memory_space<vmem>>, vector<1x784xf32>
    %12 = vector.broadcast %11 : vector<1x784xf32> to vector<256x784xf32>
    %13 = arith.addf %10, %12 : vector<256x784xf32>
    %14 = arith.negf %13 : vector<256x784xf32>
    %15 = math.exp %14 : vector<256x784xf32>
    %cst_10 = arith.constant 1.000000e+00 : f32
    %16 = vector.broadcast %cst_10 : f32 to vector<256x784xf32>
    %17 = arith.addf %16, %15 : vector<256x784xf32>
    %18 = arith.divf %16, %17 : vector<256x784xf32>
    %c0_11 = arith.constant 0 : index
    %c0_12 = arith.constant 0 : index
    %19 = vector.load %arg6[%c0_11, %c0_12] : memref<256x784xf32, #tpu.memory_space<vmem>>, vector<256x784xf32>
    tpu.vector_store %arg6[%c0_11, %c0_12], %18 {strides = array<i32>} : memref<256x784xf32, #tpu.memory_space<vmem>>, vector<256x784xf32>,
    return
  }
  func.func @transform_0(%arg0: i32) -> (i32, i32) {
    %c0_i32 = arith.constant 0 : i32
    %c0_i32_0 = arith.constant 0 : i32
    return %arg0, %c0_i32 : i32, i32
  }
  func.func @transform_1(%arg0: i32) -> (i32, i32) {
    %c0_i32 = arith.constant 0 : i32
    %c0_i32_0 = arith.constant 0 : i32
    %c0_i32_1 = arith.constant 0 : i32
    return %c0_i32, %c0_i32_0 : i32, i32
  }
  func.func @transform_2(%arg0: i32) -> (i32, i32) {
    %c0_i32 = arith.constant 0 : i32
    %c0_i32_0 = arith.constant 0 : i32
    %c0_i32_1 = arith.constant 0 : i32
    return %c0_i32, %c0_i32_0 : i32, i32
  }
  func.func @transform_3(%arg0: i32) -> (i32, i32) {
    %c0_i32 = arith.constant 0 : i32
    %c0_i32_0 = arith.constant 0 : i32
    %c0_i32_1 = arith.constant 0 : i32
    return %c0_i32, %c0_i32_0 : i32, i32
  }
  func.func @transform_4(%arg0: i32) -> (i32, i32) {
    %c0_i32 = arith.constant 0 : i32
    %c0_i32_0 = arith.constant 0 : i32
    %c0_i32_1 = arith.constant 0 : i32
    return %c0_i32, %c0_i32_0 : i32, i32
  }
  func.func @transform_5(%arg0: i32) -> (i32, i32) {
    %c0_i32 = arith.constant 0 : i32
    %c0_i32_0 = arith.constant 0 : i32
    return %arg0, %c0_i32 : i32, i32
  }
}

</mosaic_0001>

<bundles_post_ra>
// kernel: decoder_forward.1
= control target key start
LH: loop header
LB: loop body
LE: loop exit
PB: predicated region body
PF: predicated region fallthrough
CT: control target
= control target key end

     0   :  { %vm152_vm0 = vcmask 1043456   ;;  %v7431_v2 = vmov 0   ;;  %vm103_vm1 = vcmask 64512   ;;  %vm5018_vm2 = vcmask 130048   ;;  %s9802_s1 = inlined_call_operand.vmem [shape: bf16[8,512], index: 1, kind: input, shape index: {}]   ;;  %s9803_s0 = inlined_call_operand.vmem [shape: f32[256,8], index: 0, kind: input, shape index: {}]   ;;  %s9804_s3 = inlined_call_operand.vmem [shape: bf16[512,784], index: 3, kind: input, shape index: {}]   ;;  %s9805_s2 = inlined_call_operand.vmem [shape: f32[1,512], index: 2, kind: input, shape index: {}]   ;;  %s9806_s4 = inlined_call_operand.vmem [shape: f32[1,784], index: 4, kind: input, shape index: {}]   ;;  %s9807_s5 = inlined_call_operand.vmem [shape: f32[256,784], index: 5, kind: output, shape index: {}]  }
   0x1   :  { %v69_v0 = vld [vmem:[%s9802_s1] sm:$0xff]  ;;  %v70_v1 = vld [vmem:[%s9802_s1 + $0x8] sm:$0xff]  ;;  %197 = vmatprep.mubr.bf16.mxu0 %v7431_v2  ;;  %390 = vmatprep.mubr.bf16.mxu1 %v7431_v2  ;;  %v23_v12 = vld [vmem:[%s9803_s0 + $0x10] sm:$0xff] }
   0x2   :  { %v21_v3 = vld [vmem:[%s9803_s0] sm:$0xff]  ;;  %v5242_v4 = vcombine.high %v69_v0, %v69_v0  ;;  %v5244_v5 = vcombine.high %v70_v1, %v70_v1  ;;  %v5241_v6 = vcombine.low %v69_v0, %v69_v0  ;;  %v5243_v7 = vcombine.low %v70_v1, %v70_v1  ;;  %v22_v8 = vld [vmem:[%s9803_s0 + $0x8] sm:$0xff]  ;;  %v24_v13 = vld [vmem:[%s9803_s0 + $0x18] sm:$0xff] }
   0x3   :  { %v53_v11 = vpack.c.bf16 %v22_v8, %v21_v3  ;;  %v5956_v14 = vld [vmem:[%s9804_s3 + $0x188] ss:$28 sps:$4 sm:$0xff]   ;;  %v54_v17 = vpack.c.bf16 %v24_v13, %v23_v12  ;;  %v5964_v19 = vld [vmem:[%s9804_s3 + $0x154] ss:$28 sps:$4 sm:$0xff]   ;;  %v5970_v25 = vld [vmem:[%s9804_s3 + $0x11c] ss:$28 sps:$4 sm:$0xff]  }
   0x4   :  { %5245 = vmatprep.subr.msk.bf16.mxu0 %vm152_vm0, %v5242_v4  ;;  %5262 = vmatprep.subr.msk.bf16.mxu1 %vm152_vm0, %v5244_v5  ;;  %v154_v9 = vsel %vm152_vm0, %v5241_v6, 0  ;;  %v160_v10 = vsel %vm152_vm0, %v5243_v7, 0  ;;  %v5958_v15 = vld [vmem:[%s9804_s3 + $0x18c] ss:$28 sps:$4 sm:$0xff]   ;;  %v5967_v22 = vld [vmem:[%s9804_s3 + $0x4d4] ss:$28 sps:$4 sm:$0xff]  }
   0x5   :  { %180 = vmatpush1.bf16.msra.mxu0 %v154_v9  ;;  %373 = vmatpush1.bf16.msra.mxu1 %v160_v10  ;;  %v5959_v16 = vld [vmem:[%s9804_s3 + $0x508] ss:$28 sps:$4 sm:$0xff]   ;;  %v5962_v20 = vld [vmem:[%s9804_s3 + $0x150] ss:$28 sps:$4 sm:$0xff]   ;;  %v5973_v26 = vld [vmem:[%s9804_s3 + $0x49c] ss:$28 sps:$4 sm:$0xff]  }
   0x6   :  { %2188 = vmatprep.subr.bf16.mxu0 %v5958_v15  ;;  %v5961_v18 = vld [vmem:[%s9804_s3 + $0x50c] ss:$28 sps:$4 sm:$0xff]   ;;  %v25_v23 = vld [vmem:[%s9803_s0 + $0x20] sm:$0xff]  ;;  %v5968_v27 = vld [vmem:[%s9804_s3 + $0x118] ss:$28 sps:$4 sm:$0xff]  }
   0x7   :  { %2381 = vmatprep.subr.bf16.mxu1 %v5961_v18  ;;  %v5965_v21 = vld [vmem:[%s9804_s3 + $0x4d0] ss:$28 sps:$4 sm:$0xff]   ;;  %v5971_v28 = vld [vmem:[%s9804_s3 + $0x498] ss:$28 sps:$4 sm:$0xff]   ;;  %v5974_v30 = vld [vmem:[%s9804_s3 + $0xe0] ss:$28 sps:$4 sm:$0xff]  }
   0x8   :  { %5246 = vmatmul.mubr.msk.bf16.vlgmr.msra.gmra.mxu0 %vm103_vm1, %v53_v11  ;;  %5263 = vmatmul.mubr.msk.bf16.vlgmr.msra.gmra.mxu1 %vm103_vm1, %v53_v11  ;;  %v26_v24 = vld [vmem:[%s9803_s0 + $0x28] sm:$0xff]  ;;  %v5976_v31 = vld [vmem:[%s9804_s3 + $0xe4] ss:$28 sps:$4 sm:$0xff]   ;;  %v27_v33 = vld [vmem:[%s9803_s0 + $0x30] sm:$0xff] }
   0x9   :  { %207 = vmatprep.mubr.bf16.mxu0 %v7431_v2  ;;  %400 = vmatprep.mubr.bf16.mxu1 %v7431_v2  ;;  %v55_v29 = vpack.c.bf16 %v26_v24, %v25_v23  ;;  %v5979_v32 = vld [vmem:[%s9804_s3 + $0x464] ss:$28 sps:$4 sm:$0xff]   ;;  %v5982_v35 = vld [vmem:[%s9804_s3 + $0xac] ss:$28 sps:$4 sm:$0xff]   ;;  %v28_v36 = vld [vmem:[%s9803_s0 + $0x38] sm:$0xff] }
   0xa   :  { %2189 = vmatpush1.bf16.msra.mxu0 %v5956_v14  ;;  %2382 = vmatpush1.bf16.msra.mxu1 %v5959_v16  ;;  %v5977_v34 = vld [vmem:[%s9804_s3 + $0x460] ss:$28 sps:$4 sm:$0xff]   ;;  %v5985_v37 = vld [vmem:[%s9804_s3 + $0x42c] ss:$28 sps:$4 sm:$0xff]   ;;  %v56_v40 = vpack.c.bf16 %v28_v36, %v27_v33  ;;  %v5988_v42 = vld [vmem:[%s9804_s3 + $0x74] ss:$28 sps:$4 sm:$0xff]  }
   0xb   :  { %2190 = vmatprep.subr.bf16.mxu0 %v5964_v19  ;;  %2383 = vmatprep.subr.bf16.mxu1 %v5967_v22  ;;  %v5980_v38 = vld [vmem:[%s9804_s3 + $0xa8] ss:$28 sps:$4 sm:$0xff]   ;;  %v5986_v41 = vld [vmem:[%s9804_s3 + $0x70] ss:$28 sps:$4 sm:$0xff]   ;;  %v5994_v45 = vld [vmem:[%s9804_s3 + $0x3c] ss:$28 sps:$4 sm:$0xff]  }
   0xc   :  { %v5983_v39 = vld [vmem:[%s9804_s3 + $0x428] ss:$28 sps:$4 sm:$0xff]   ;;  %v5989_v43 = vld [vmem:[%s9804_s3 + $0x3f0] ss:$28 sps:$4 sm:$0xff]   ;;  %v5997_v46 = vld [vmem:[%s9804_s3 + $0x3bc] ss:$28 sps:$4 sm:$0xff]  }
   0xd   :  { %v5991_v44 = vld [vmem:[%s9804_s3 + $0x3f4] ss:$28 sps:$4 sm:$0xff]   ;;  %v29_v47 = vld [vmem:[%s9803_s0 + $0x40] sm:$0xff]  ;;  %v30_v48 = vld [vmem:[%s9803_s0 + $0x48] sm:$0xff] }
   0xe   :  { %2191 = vmatpush1.bf16.msra.mxu0 %v5962_v20  ;;  %2384 = vmatpush1.bf16.msra.mxu1 %v5965_v21  ;;  %v5992_v49 = vld [vmem:[%s9804_s3 + $0x38] ss:$28 sps:$4 sm:$0xff]   ;;  %v57_v51 = vpack.c.bf16 %v30_v48, %v29_v47  ;;  %v5998_v52 = vld [vmem:[%s9804_s3] ss:$28 sps:$4 sm:$0xff]   ;;  %v6006_v56 = vld [vmem:[%s9804_s3 + $0x34c] ss:$28 sps:$4 sm:$0xff]  }
   0xf   :  { %2192 = vmatprep.subr.bf16.mxu0 %v5970_v25  ;;  %2385 = vmatprep.subr.bf16.mxu1 %v5973_v26  ;;  %v5995_v50 = vld [vmem:[%s9804_s3 + $0x3b8] ss:$28 sps:$4 sm:$0xff]   ;;  %v6000_v53 = vld [vmem:[%s9804_s3 + $0x4] ss:$28 sps:$4 sm:$0xff]   ;;  %v6009_v57 = vld [vmem:[%s9804_s3 + $0x6cc] ss:$28 sps:$4 sm:$0xff]  }
  0x10   :  { %5247 = vmatmul.mubr.msk.bf16.gmra.mxu0 %vm103_vm1, %v54_v17  ;;  %5264 = vmatmul.mubr.msk.bf16.gmra.mxu1 %vm103_vm1, %v54_v17  ;;  %v6001_v54 = vld [vmem:[%s9804_s3 + $0x380] ss:$28 sps:$4 sm:$0xff]   ;;  %v31_v58 = vld [vmem:[%s9803_s0 + $0x50] sm:$0xff]  ;;  %v6004_v60 = vld [vmem:[%s9804_s3 + $0x348] ss:$28 sps:$4 sm:$0xff]  }
  0x11   :  { %217 = vmatprep.mubr.bf16.mxu0 %v7431_v2  ;;  %410 = vmatprep.mubr.bf16.mxu1 %v7431_v2  ;;  %v6003_v55 = vld [vmem:[%s9804_s3 + $0x384] ss:$28 sps:$4 sm:$0xff]   ;;  %v32_v59 = vld [vmem:[%s9803_s0 + $0x58] sm:$0xff]  ;;  %v6010_v63 = vld [vmem:[%s9804_s3 + $0x310] ss:$28 sps:$4 sm:$0xff]  }
  0x12   :  { %2193 = vmatpush1.bf16.msra.mxu0 %v5968_v27  ;;  %2386 = vmatpush1.bf16.msra.mxu1 %v5971_v28  ;;  %v6007_v61 = vld [vmem:[%s9804_s3 + $0x6c8] ss:$28 sps:$4 sm:$0xff]   ;;  %v58_v62 = vpack.c.bf16 %v32_v59, %v31_v58  ;;  %v6012_v0 = vld [vmem:[%s9804_s3 + $0x314] ss:$28 sps:$4 sm:$0xff]   ;;  %v6018_v4 = vld [vmem:[%s9804_s3 + $0x2dc] ss:$28 sps:$4 sm:$0xff]  }
  0x13   :  { %2194 = vmatprep.subr.bf16.mxu0 %v5976_v31  ;;  %2387 = vmatprep.subr.bf16.mxu1 %v5979_v32  ;;  %v6013_v1 = vld [vmem:[%s9804_s3 + $0x690] ss:$28 sps:$4 sm:$0xff]   ;;  %v33_v5 = vld [vmem:[%s9803_s0 + $0x60] sm:$0xff]  ;;  %v6021_v7 = vld [vmem:[%s9804_s3 + $0x65c] ss:$28 sps:$4 sm:$0xff]  }
  0x14   :  { %v6015_v3 = vld [vmem:[%s9804_s3 + $0x694] ss:$28 sps:$4 sm:$0xff]   ;;  %v34_v6 = vld [vmem:[%s9803_s0 + $0x68] sm:$0xff]  ;;  %v6024_v11 = vld [vmem:[%s9804_s3 + $0x2a4] ss:$28 sps:$4 sm:$0xff]  }
  0x15   :  { %v6016_v8 = vld [vmem:[%s9804_s3 + $0x2d8] ss:$28 sps:$4 sm:$0xff]   ;;  %v59_v10 = vpack.c.bf16 %v34_v6, %v33_v5  ;;  %v6027_v12 = vld [vmem:[%s9804_s3 + $0x624] ss:$28 sps:$4 sm:$0xff]   ;;  %v6030_v15 = vld [vmem:[%s9804_s3 + $0x26c] ss:$28 sps:$4 sm:$0xff]  }
  0x16   :  { %2195 = vmatpush1.bf16.msra.mxu0 %v5974_v30  ;;  %2388 = vmatpush1.bf16.msra.mxu1 %v5977_v34  ;;  %v6019_v9 = vld [vmem:[%s9804_s3 + $0x658] ss:$28 sps:$4 sm:$0xff]   ;;  %v6022_v13 = vld [vmem:[%s9804_s3 + $0x2a0] ss:$28 sps:$4 sm:$0xff]   ;;  %v6033_v16 = vld [vmem:[%s9804_s3 + $0x5ec] ss:$28 sps:$4 sm:$0xff]  }
  0x17   :  { %2196 = vmatprep.subr.bf16.mxu0 %v5982_v35  ;;  %2389 = vmatprep.subr.bf16.mxu1 %v5985_v37  ;;  %v6025_v14 = vld [vmem:[%s9804_s3 + $0x620] ss:$28 sps:$4 sm:$0xff]   ;;  %v35_v17 = vld [vmem:[%s9803_s0 + $0x70] sm:$0xff]  ;;  %v6028_v19 = vld [vmem:[%s9804_s3 + $0x268] ss:$28 sps:$4 sm:$0xff]  }
  0x18   :  { %5248 = vmatmul.mubr.msk.bf16.gmra.mxu0 %vm103_vm1, %v55_v29  ;;  %5265 = vmatmul.mubr.msk.bf16.gmra.mxu1 %vm103_vm1, %v55_v29  ;;  %v36_v18 = vld [vmem:[%s9803_s0 + $0x78] sm:$0xff]  ;;  %v6031_v20 = vld [vmem:[%s9804_s3 + $0x5e8] ss:$28 sps:$4 sm:$0xff]   ;;  %v39_v25 = vld [vmem:[%s9803_s0 + $0x90] sm:$0xff] }
  0x19   :  { %227 = vmatprep.mubr.bf16.mxu0 %v7431_v2  ;;  %420 = vmatprep.mubr.bf16.mxu1 %v7431_v2  ;;  %v60_v21 = vpack.c.bf16 %v36_v18, %v35_v17  ;;  %v37_v22 = vld [vmem:[%s9803_s0 + $0x80] sm:$0xff]  ;;  %v38_v23 = vld [vmem:[%s9803_s0 + $0x88] sm:$0xff]  ;;  %v40_v26 = vld [vmem:[%s9803_s0 + $0x98] sm:$0xff] }
  0x1a   :  { %2197 = vmatpush1.bf16.msra.mxu0 %v5980_v38  ;;  %2390 = vmatpush1.bf16.msra.mxu1 %v5983_v39  ;;  %v61_v24 = vpack.c.bf16 %v38_v23, %v37_v22  ;;  %v62_v27 = vpack.c.bf16 %v40_v26, %v39_v25  ;;  %v6034_v28 = vld [vmem:[%s9804_s3 + $0x230] ss:$28 sps:$4 sm:$0xff]   ;;  %v41_v32 = vld [vmem:[%s9803_s0 + $0xa0] sm:$0xff]  ;;  %v6040_v35 = vld [vmem:[%s9804_s3 + $0x1f8] ss:$28 sps:$4 sm:$0xff]  }
  0x1b   :  { %2198 = vmatprep.subr.bf16.mxu0 %v5988_v42  ;;  %2391 = vmatprep.subr.bf16.mxu1 %v5991_v44  ;;  %v6036_v29 = vld [vmem:[%s9804_s3 + $0x234] ss:$28 sps:$4 sm:$0xff]   ;;  %v42_v33 = vld [vmem:[%s9803_s0 + $0xa8] sm:$0xff]  ;;  %v6042_v36 = vld [vmem:[%s9804_s3 + $0x1fc] ss:$28 sps:$4 sm:$0xff]  }
  0x1c   :  { %v6037_v30 = vld [vmem:[%s9804_s3 + $0x5b0] ss:$28 sps:$4 sm:$0xff]   ;;  %v63_v34 = vpack.c.bf16 %v42_v33, %v41_v32  ;;  %v6043_v37 = vld [vmem:[%s9804_s3 + $0x578] ss:$28 sps:$4 sm:$0xff]   ;;  %v6046_v42 = vld [vmem:[%s9804_s3 + $0x1c0] ss:$28 sps:$4 sm:$0xff]  }
  0x1d   :  { %v6039_v31 = vld [vmem:[%s9804_s3 + $0x5b4] ss:$28 sps:$4 sm:$0xff]   ;;  %v6045_v38 = vld [vmem:[%s9804_s3 + $0x57c] ss:$28 sps:$4 sm:$0xff]   ;;  %v6051_v44 = vld [vmem:[%s9804_s3 + $0x544] ss:$28 sps:$4 sm:$0xff]  }
  0x1e   :  { %2199 = vmatpush1.bf16.msra.mxu0 %v5986_v41  ;;  %2392 = vmatpush1.bf16.msra.mxu1 %v5989_v43  ;;  %v43_v39 = vld [vmem:[%s9803_s0 + $0xb0] sm:$0xff]  ;;  %v6048_v43 = vld [vmem:[%s9804_s3 + $0x1c4] ss:$28 sps:$4 sm:$0xff]   ;;  %v46_v47 = vld [vmem:[%s9803_s0 + $0xc8] sm:$0xff] }
  0x1f   :  { %2200 = vmatprep.subr.bf16.mxu0 %v5994_v45  ;;  %2393 = vmatprep.subr.bf16.mxu1 %v5997_v46  ;;  %v6049_v45 = vld [vmem:[%s9804_s3 + $0x540] ss:$28 sps:$4 sm:$0xff]  }
  0x20   :  { %5249 = vmatmul.mubr.msk.bf16.gmra.mxu0 %vm103_vm1, %v56_v40  ;;  %5266 = vmatmul.mubr.msk.bf16.gmra.mxu1 %vm103_vm1, %v56_v40  ;;  %v44_v40 = vld [vmem:[%s9803_s0 + $0xb8] sm:$0xff]  ;;  %v45_v46 = vld [vmem:[%s9803_s0 + $0xc0] sm:$0xff] }
  0x21   :  { %237 = vmatprep.mubr.bf16.mxu0 %v7431_v2  ;;  %430 = vmatprep.mubr.bf16.mxu1 %v7431_v2  ;;  %v64_v41 = vpack.c.bf16 %v44_v40, %v43_v39  ;;  %v65_v48 = vpack.c.bf16 %v46_v47, %v45_v46  ;;  %v52_v58 = vld [vmem:[%s9803_s0 + $0xf8] sm:$0xff] }
  0x22   :  { %2201 = vmatpush1.bf16.msra.mxu0 %v5992_v49  ;;  %2394 = vmatpush1.bf16.msra.mxu1 %v5995_v50  ;;  %v6054_v49 = vld [vmem:[%s9804_s3 + $0x194] ss:$28 sps:$4 sm:$0xff]  }
  0x23   :  { %2202 = vmatprep.subr.bf16.mxu0 %v6000_v53  ;;  %2395 = vmatprep.subr.bf16.mxu1 %v6003_v55  ;;  %v6057_v50 = vld [vmem:[%s9804_s3 + $0x514] ss:$28 sps:$4 sm:$0xff]   ;;  %v50_v55 = vld [vmem:[%s9803_s0 + $0xe8] sm:$0xff] }
  0x26   :  { %2203 = vmatpush1.bf16.msra.mxu0 %v5998_v52  ;;  %2396 = vmatpush1.bf16.msra.mxu1 %v6001_v54  ;;  %v48_v52 = vld [vmem:[%s9803_s0 + $0xd8] sm:$0xff]  ;;  %v49_v54 = vld [vmem:[%s9803_s0 + $0xe0] sm:$0xff] }
  0x27   :  { %2204 = vmatprep.subr.bf16.mxu0 %v6006_v56  ;;  %2397 = vmatprep.subr.bf16.mxu1 %v6009_v57  ;;  %v67_v56 = vpack.c.bf16 %v50_v55, %v49_v54  ;;  %v51_v57 = vld [vmem:[%s9803_s0 + $0xf0] sm:$0xff] }
  0x28   :  { %5250 = vmatmul.mubr.msk.bf16.gmra.mxu0 %vm103_vm1, %v57_v51  ;;  %5267 = vmatmul.mubr.msk.bf16.gmra.mxu1 %vm103_vm1, %v57_v51  ;;  %v47_v51 = vld [vmem:[%s9803_s0 + $0xd0] sm:$0xff]  ;;  %v68_v59 = vpack.c.bf16 %v52_v58, %v51_v57 }
  0x29   :  { %247 = vmatprep.mubr.bf16.mxu0 %v7431_v2  ;;  %440 = vmatprep.mubr.bf16.mxu1 %v7431_v2  ;;  %v66_v53 = vpack.c.bf16 %v48_v52, %v47_v51 }
  0x2a   :  { %2205 = vmatpush2.bf16.msra.mxu0 %v6004_v60  ;;  %2398 = vmatpush2.bf16.msra.mxu1 %v6007_v61  ;;  %v73_v60 = vlaneseq }
  0x2b   :  { %2206 = vmatprep.subr.bf16.mxu0 %v6012_v0  ;;  %2399 = vmatprep.subr.bf16.mxu1 %v6015_v3 }
  0x2c   :  { %v7826_v61 = vshrl.u32 %v73_v60, 7 }
  0x2e   :  { %2207 = vmatpush2.bf16.msra.mxu0 %v6010_v63  ;;  %2400 = vmatpush2.bf16.msra.mxu1 %v6013_v1  ;;  %9865 = vst [vmem:[#allocation2_spill] sm:$0xff] %v7826_v61  ;;  %v71_v63 = vld [vmem:[%s9805_s2] sm:$0xf]  ;;  %v9810_v0 = vsub.s32 1, %v7826_v61  ;;  %v9808_v1 = vsub.s32 3, %v7826_v61  ;;  %v9809_v3 = vsub.s32 2, %v7826_v61 }
  0x2f   :  { %2208 = vmatprep.subr.bf16.mxu0 %v6018_v4  ;;  %2401 = vmatprep.subr.bf16.mxu1 %v6021_v7 }
  0x30   :  { %5251 = vmatmul.mubr.msk.bf16.gmra.mxu0 %vm103_vm1, %v58_v62  ;;  %5268 = vmatmul.mubr.msk.bf16.gmra.mxu1 %vm103_vm1, %v58_v62  ;;  %v9811_v62 = vsub.s32 0, %v7826_v61  ;;  %v7841_v4 = vrot.slane %v71_v63, %v9810_v0  ;;  %v7845_v5 = vrot.slane %v71_v63, %v9808_v1 }
  0x31   :  { %257 = vmatprep.mubr.bf16.mxu0 %v7431_v2  ;;  %450 = vmatprep.mubr.bf16.mxu1 %v7431_v2 }
  0x32   :  { %2209 = vmatpush2.bf16.msra.mxu0 %v6016_v8  ;;  %2402 = vmatpush2.bf16.msra.mxu1 %v6019_v9 }
  0x33   :  { %2210 = vmatprep.subr.bf16.mxu0 %v6024_v11  ;;  %2403 = vmatprep.subr.bf16.mxu1 %v6027_v12  ;;  %v7850_v11 = vrot.slane %v71_v63, %v9809_v3 }
  0x36   :  { %2211 = vmatpush2.bf16.msra.mxu0 %v6022_v13  ;;  %2404 = vmatpush2.bf16.msra.mxu1 %v6025_v14 }
  0x37   :  { %2212 = vmatprep.subr.bf16.mxu0 %v6030_v15  ;;  %2405 = vmatprep.subr.bf16.mxu1 %v6033_v16 }
  0x38   :  { %5252 = vmatmul.mubr.msk.bf16.gmra.mxu0 %vm103_vm1, %v59_v10  ;;  %5269 = vmatmul.mubr.msk.bf16.gmra.mxu1 %vm103_vm1, %v59_v10 }
  0x39   :  { %267 = vmatprep.mubr.bf16.mxu0 %v7431_v2  ;;  %460 = vmatprep.mubr.bf16.mxu1 %v7431_v2 }
  0x3a   :  { %2213 = vmatpush2.bf16.msra.mxu0 %v6028_v19  ;;  %2406 = vmatpush2.bf16.msra.mxu1 %v6031_v20 }
  0x3b   :  { %2214 = vmatprep.subr.bf16.mxu0 %v6036_v29  ;;  %2407 = vmatprep.subr.bf16.mxu1 %v6039_v31 }
  0x3e   :  { %2215 = vmatpush2.bf16.msra.mxu0 %v6034_v28  ;;  %2408 = vmatpush2.bf16.msra.mxu1 %v6037_v30 }
  0x3f   :  { %2216 = vmatprep.subr.bf16.mxu0 %v6042_v36  ;;  %2409 = vmatprep.subr.bf16.mxu1 %v6045_v38 }
  0x40   :  { %5253 = vmatmul.mubr.msk.bf16.gmra.mxu0 %vm103_vm1, %v60_v21  ;;  %5270 = vmatmul.mubr.msk.bf16.gmra.mxu1 %vm103_vm1, %v60_v21 }
  0x41   :  { %277 = vmatprep.mubr.bf16.mxu0 %v7431_v2  ;;  %470 = vmatprep.mubr.bf16.mxu1 %v7431_v2 }
  0x42   :  { %2217 = vmatpush2.bf16.msra.mxu0 %v6040_v35  ;;  %2410 = vmatpush2.bf16.msra.mxu1 %v6043_v37 }
  0x43   :  { %2218 = vmatprep.subr.bf16.mxu0 %v6048_v43  ;;  %2411 = vmatprep.subr.bf16.mxu1 %v6051_v44 }
  0x46   :  { %2219 = vmatpush2.bf16.msra.mxu0 %v6046_v42  ;;  %2412 = vmatpush2.bf16.msra.mxu1 %v6049_v45 }
  0x47   :  { %2574 = vmatprep.subr.bf16.mxu0 %v6054_v49  ;;  %2767 = vmatprep.subr.bf16.mxu1 %v6057_v50 }
  0x48   :  { %5254 = vmatmul.mubr.msk.bf16.gmra.mxu0 %vm103_vm1, %v61_v24  ;;  %5271 = vmatmul.mubr.msk.bf16.gmra.mxu1 %vm103_vm1, %v61_v24 }
  0x49   :  { %287 = vmatprep.mubr.bf16.mxu0 %v7431_v2  ;;  %480 = vmatprep.mubr.bf16.mxu1 %v7431_v2 }
  0x50   :  { %5255 = vmatmul.mubr.msk.bf16.gmra.mxu0 %vm103_vm1, %v62_v27  ;;  %5272 = vmatmul.mubr.msk.bf16.gmra.mxu1 %vm103_vm1, %v62_v27 }
  0x51   :  { %297 = vmatprep.mubr.bf16.mxu0 %v7431_v2  ;;  %490 = vmatprep.mubr.bf16.mxu1 %v7431_v2 }
  0x58   :  { %5256 = vmatmul.mubr.msk.bf16.gmra.mxu0 %vm103_vm1, %v63_v34  ;;  %5273 = vmatmul.mubr.msk.bf16.gmra.mxu1 %vm103_vm1, %v63_v34 }
  0x59   :  { %307 = vmatprep.mubr.bf16.mxu0 %v7431_v2  ;;  %500 = vmatprep.mubr.bf16.mxu1 %v7431_v2 }
  0x60   :  { %5257 = vmatmul.mubr.msk.bf16.gmra.mxu0 %vm103_vm1, %v64_v41  ;;  %5274 = vmatmul.mubr.msk.bf16.gmra.mxu1 %vm103_vm1, %v64_v41 }
  0x61   :  { %317 = vmatprep.mubr.bf16.mxu0 %v7431_v2  ;;  %510 = vmatprep.mubr.bf16.mxu1 %v7431_v2 }
  0x68   :  { %5258 = vmatmul.mubr.msk.bf16.gmra.mxu0 %vm103_vm1, %v65_v48  ;;  %5275 = vmatmul.mubr.msk.bf16.gmra.mxu1 %vm103_vm1, %v65_v48 }
  0x69   :  { %327 = vmatprep.mubr.bf16.mxu0 %v7431_v2  ;;  %520 = vmatprep.mubr.bf16.mxu1 %v7431_v2 }
  0x70   :  { %5259 = vmatmul.mubr.msk.bf16.gmra.mxu0 %vm103_vm1, %v66_v53  ;;  %5276 = vmatmul.mubr.msk.bf16.gmra.mxu1 %vm103_vm1, %v66_v53 }
  0x71   :  { %337 = vmatprep.mubr.bf16.mxu0 %v7431_v2  ;;  %530 = vmatprep.mubr.bf16.mxu1 %v7431_v2 }
  0x78   :  { %5260 = vmatmul.mubr.msk.bf16.gmra.mxu0 %vm103_vm1, %v67_v56  ;;  %5277 = vmatmul.mubr.msk.bf16.gmra.mxu1 %vm103_vm1, %v67_v56 }
  0x79   :  { %347 = vmatprep.mubr.bf16.mxu0 %v7431_v2  ;;  %540 = vmatprep.mubr.bf16.mxu1 %v7431_v2  ;;  %v7836_v2 = vrot.slane %v71_v63, %v9811_v62 }
  0x80   :  { %5261 = vmatmul.mubr.msk.bf16.gmra.mxu0 %vm103_vm1, %v68_v59  ;;  %5278 = vmatmul.mubr.msk.bf16.gmra.mxu1 %vm103_vm1, %v68_v59 }
  0xc8   :  { %v199_v6 = vpop.f32.mrf.mxu0  ;;  %v392_v7 = vpop.f32.mrf.mxu1 }
  0xc9   :  { %v200_v8 = vadd.f32 %v199_v6, %v7836_v2  ;;  %v393_v20 = vadd.f32 %v392_v7, %v7850_v11  ;;  %v6052_v7 = vld [vmem:[%s9804_s3 + $0x190] ss:$28 sps:$4 sm:$0xff]  }
  0xca   :  { %v201_v9 = vpop.f32.mrf.mxu0  ;;  %v394_v10 = vpop.f32.mrf.mxu1 }
  0xcb   :  { %v202_v12 = vadd.f32 %v201_v9, %v7841_v4  ;;  %v395_v13 = vadd.f32 %v394_v10, %v7845_v5  ;;  %6276 = vtanh.f32 %v200_v8 }
  0xcc   :  { %v203_v14 = vpop.f32.mrf.mxu0  ;;  %v396_v15 = vpop.f32.mrf.mxu1 }
  0xcd   :  { %6278 = vtanh.f32 %v202_v12  ;;  %v204_v16 = vadd.f32 %v203_v14, %v7836_v2  ;;  %v397_v17 = vadd.f32 %v396_v15, %v7850_v11  ;;  %v6055_v14 = vld [vmem:[%s9804_s3 + $0x510] ss:$28 sps:$4 sm:$0xff]   ;;  %v6060_v15 = vld [vmem:[%s9804_s3 + $0x15c] ss:$28 sps:$4 sm:$0xff]  }
  0xce   :  { %6280 = vtanh.f32 %v395_v13  ;;  %v205_v18 = vpop.f32.mrf.mxu0  ;;  %v398_v19 = vpop.f32.mrf.mxu1 }
  0xcf   :  { %6282 = vtanh.f32 %v204_v16  ;;  %v206_v21 = vadd.f32 %v205_v18, %v7841_v4  ;;  %v399_v22 = vadd.f32 %v398_v19, %v7845_v5  ;;  %v6063_v19 = vld [vmem:[%s9804_s3 + $0x4dc] ss:$28 sps:$4 sm:$0xff]  }
  0xd0   :  { %6284 = vtanh.f32 %v397_v17  ;;  %v209_v23 = vpop.f32.mrf.mxu0  ;;  %v402_v24 = vpop.f32.mrf.mxu1 }
  0xd1   :  { %6286 = vtanh.f32 %v206_v21  ;;  %v210_v25 = vadd.f32 %v209_v23, %v7836_v2  ;;  %v403_v36 = vadd.f32 %v402_v24, %v7850_v11 }
  0xd2   :  { %6288 = vtanh.f32 %v399_v22  ;;  %v211_v26 = vpop.f32.mrf.mxu0  ;;  %v404_v27 = vpop.f32.mrf.mxu1 }
  0xd3   :  { %6290 = vtanh.f32 %v393_v20  ;;  %v212_v28 = vadd.f32 %v211_v26, %v7841_v4  ;;  %v405_v29 = vadd.f32 %v404_v27, %v7845_v5  ;;  %v6058_v26 = vld [vmem:[%s9804_s3 + $0x158] ss:$28 sps:$4 sm:$0xff]  }
  0xd4   :  { %6292 = vtanh.f32 %v210_v25  ;;  %v213_v30 = vpop.f32.mrf.mxu0  ;;  %v406_v31 = vpop.f32.mrf.mxu1 }
  0xd5   :  { %6294 = vtanh.f32 %v212_v28  ;;  %v214_v32 = vadd.f32 %v213_v30, %v7836_v2  ;;  %v407_v33 = vadd.f32 %v406_v31, %v7850_v11  ;;  %v6061_v30 = vld [vmem:[%s9804_s3 + $0x4d8] ss:$28 sps:$4 sm:$0xff]   ;;  %v6066_v31 = vld [vmem:[%s9804_s3 + $0x124] ss:$28 sps:$4 sm:$0xff]  }
  0xd6   :  { %6296 = vtanh.f32 %v405_v29  ;;  %v215_v34 = vpop.f32.mrf.mxu0  ;;  %v408_v35 = vpop.f32.mrf.mxu1 }
  0xd7   :  { %6298 = vtanh.f32 %v214_v32  ;;  %v216_v37 = vadd.f32 %v215_v34, %v7841_v4  ;;  %v409_v38 = vadd.f32 %v408_v35, %v7845_v5  ;;  %v6069_v35 = vld [vmem:[%s9804_s3 + $0x4a4] ss:$28 sps:$4 sm:$0xff]  }
  0xd8   :  { %6300 = vtanh.f32 %v407_v33  ;;  %v219_v39 = vpop.f32.mrf.mxu0  ;;  %v412_v40 = vpop.f32.mrf.mxu1 }
  0xd9   :  { %v6277_v41 = vpop.eup %6276  ;;  %6302 = vtanh.f32 %v216_v37  ;;  %v220_v42 = vadd.f32 %v219_v39, %v7836_v2  ;;  %v413_v56 = vadd.f32 %v412_v40, %v7850_v11 }
  0xda   :  { %v6279_v43 = vpop.eup %6278  ;;  %6304 = vtanh.f32 %v409_v38  ;;  %v221_v44 = vpop.f32.mrf.mxu0 }
  0xdb   :  { %v414_v45 = vpop.f32.mrf.mxu1  ;;  %v6281_v46 = vpop.eup %6280  ;;  %6306 = vtanh.f32 %v403_v36  ;;  %v222_v47 = vadd.f32 %v221_v44, %v7841_v4  ;;  %v6064_v44 = vld [vmem:[%s9804_s3 + $0x120] ss:$28 sps:$4 sm:$0xff]  }
  0xdc   :  { %v415_v48 = vadd.f32 %v414_v45, %v7845_v5  ;;  %v6283_v49 = vpop.eup %6282  ;;  %6308 = vtanh.f32 %v220_v42  ;;  %v223_v50 = vpop.f32.mrf.mxu0 }
  0xdd   :  { %v416_v51 = vpop.f32.mrf.mxu1  ;;  %v6285_v52 = vpop.eup %6284  ;;  %6310 = vtanh.f32 %v222_v47  ;;  %v224_v53 = vadd.f32 %v223_v50, %v7836_v2  ;;  %v7882_v13 = vpack.c.bf16 %v6283_v49, %v6277_v41  ;;  %v6067_v50 = vld [vmem:[%s9804_s3 + $0x4a0] ss:$28 sps:$4 sm:$0xff]  }
  0xde   :  { %v417_v54 = vadd.f32 %v416_v51, %v7850_v11  ;;  %v6287_v55 = vpop.eup %6286  ;;  %6312 = vtanh.f32 %v415_v48  ;;  %v225_v57 = vpop.f32.mrf.mxu0  ;;  %v6072_v51 = vld [vmem:[%s9804_s3 + $0xec] ss:$28 sps:$4 sm:$0xff]  }
  0xdf   :  { %v418_v58 = vpop.f32.mrf.mxu1  ;;  %v6289_v59 = vpop.eup %6288  ;;  %6314 = vtanh.f32 %v224_v53  ;;  %v226_v60 = vadd.f32 %v225_v57, %v7841_v4  ;;  %v7875_v6 = vpack.c.bf16 %v6287_v55, %v6279_v43  ;;  %v6075_v55 = vld [vmem:[%s9804_s3 + $0x46c] ss:$28 sps:$4 sm:$0xff]  }
  0xe0   :  { %v419_v63 = vadd.f32 %v418_v58, %v7845_v5  ;;  %v6291_v8 = vpop.eup %6290  ;;  %6316 = vtanh.f32 %v417_v54  ;;  %v229_v9 = vpop.f32.mrf.mxu0  ;;  %v7880_v12 = vpack.c.bf16 %v6289_v59, %v6281_v46 }
  0xe1   :  { %v422_v10 = vpop.f32.mrf.mxu1  ;;  %v6293_v16 = vpop.eup %6292  ;;  %6318 = vtanh.f32 %v226_v60  ;;  %v230_v17 = vadd.f32 %v229_v9, %v7836_v2  ;;  %2220 = vmatprep.mubr.bf16.mxu0 %v7875_v6  ;;  %v7892_v18 = vpack.c.bf16 %v6285_v52, %v6291_v8 }
  0xe2   :  { %v6295_v20 = vpop.eup %6294  ;;  %6320 = vtanh.f32 %v419_v63  ;;  %2413 = vmatprep.mubr.bf16.mxu1 %v7880_v12  ;;  %v231_v21 = vpop.f32.mrf.mxu0  ;;  %2221 = vmatmul.mubr.bf16.vlgmr.msra.gmra.mxu0 %v7882_v13  ;;  %v423_v37 = vadd.f32 %v422_v10, %v7850_v11 }
  0xe3   :  { %v424_v22 = vpop.f32.mrf.mxu1  ;;  %v6297_v23 = vpop.eup %6296  ;;  %6322 = vtanh.f32 %v413_v56  ;;  %v232_v24 = vadd.f32 %v231_v21, %v7841_v4  ;;  %2414 = vmatmul.mubr.bf16.vlgmr.msra.gmra.mxu1 %v7892_v18  ;;  %2575 = vmatpush1.bf16.msra.mxu0 %v6052_v7  ;;  %v6070_v7 = vld [vmem:[%s9804_s3 + $0xe8] ss:$28 sps:$4 sm:$0xff]  }
  0xe4   :  { %v425_v25 = vadd.f32 %v424_v22, %v7845_v5  ;;  %v6299_v27 = vpop.eup %6298  ;;  %6324 = vtanh.f32 %v230_v17  ;;  %v233_v28 = vpop.f32.mrf.mxu0  ;;  %2768 = vmatpush1.bf16.msra.mxu1 %v6055_v14  ;;  %2576 = vmatprep.subr.bf16.mxu0 %v6060_v15  ;;  %v6073_v14 = vld [vmem:[%s9804_s3 + $0x468] ss:$28 sps:$4 sm:$0xff]   ;;  %v6078_v15 = vld [vmem:[%s9804_s3 + $0xb4] ss:$28 sps:$4 sm:$0xff]  }
  0xe5   :  { %v426_v29 = vpop.f32.mrf.mxu1  ;;  %v6301_v32 = vpop.eup %6300  ;;  %6326 = vtanh.f32 %v232_v24  ;;  %v234_v33 = vadd.f32 %v233_v28, %v7836_v2  ;;  %2769 = vmatprep.subr.bf16.mxu1 %v6063_v19  ;;  %v7926_v49 = vpack.c.bf16 %v6299_v27, %v6293_v16 }
  0xe6   :  { %v427_v34 = vadd.f32 %v426_v29, %v7850_v11  ;;  %v6303_v36 = vpop.eup %6302  ;;  %6328 = vtanh.f32 %v425_v25  ;;  %v235_v38 = vpop.f32.mrf.mxu0  ;;  %v6076_v29 = vld [vmem:[%s9804_s3 + $0xb0] ss:$28 sps:$4 sm:$0xff]  }
  0xe7   :  { %v428_v39 = vpop.f32.mrf.mxu1  ;;  %v6305_v40 = vpop.eup %6304  ;;  %6330 = vtanh.f32 %v234_v33  ;;  %v236_v41 = vadd.f32 %v235_v38, %v7841_v4  ;;  %v7919_v43 = vpack.c.bf16 %v6303_v36, %v6295_v20  ;;  %2577 = vmatpush1.bf16.msra.mxu0 %v6058_v26  ;;  %v6081_v20 = vld [vmem:[%s9804_s3 + $0x434] ss:$28 sps:$4 sm:$0xff]   ;;  %v6084_v36 = vld [vmem:[%s9804_s3 + $0x7c] ss:$28 sps:$4 sm:$0xff]  }
  0xe8   :  { %v429_v42 = vadd.f32 %v428_v39, %v7845_v5  ;;  %v6307_v45 = vpop.eup %6306  ;;  %6332 = vtanh.f32 %v427_v34  ;;  %v239_v46 = vpop.f32.mrf.mxu0  ;;  %v7924_v48 = vpack.c.bf16 %v6305_v40, %v6297_v23  ;;  %2770 = vmatpush1.bf16.msra.mxu1 %v6061_v30  ;;  %2578 = vmatprep.subr.bf16.mxu0 %v6066_v31  ;;  %v6087_v40 = vld [vmem:[%s9804_s3 + $0x3fc] ss:$28 sps:$4 sm:$0xff]  }
  0xe9   :  { %v432_v47 = vpop.f32.mrf.mxu1  ;;  %v6309_v52 = vpop.eup %6308  ;;  %6334 = vtanh.f32 %v236_v41  ;;  %v240_v53 = vadd.f32 %v239_v46, %v7836_v2  ;;  %2230 = vmatprep.mubr.bf16.mxu0 %v7919_v43  ;;  %v7936_v54 = vpack.c.bf16 %v6301_v32, %v6307_v45  ;;  %2771 = vmatprep.subr.bf16.mxu1 %v6069_v35  ;;  %v6079_v35 = vld [vmem:[%s9804_s3 + $0x430] ss:$28 sps:$4 sm:$0xff]  }
  0xea   :  { %9866 = vst [vmem:[#allocation3_spill] sm:$0xff] %v7924_v48  ;;  %v6311_v56 = vpop.eup %6310  ;;  %6336 = vtanh.f32 %v429_v42  ;;  %2423 = vmatprep.mubr.bf16.mxu1 %v7924_v48  ;;  %v241_v57 = vpop.f32.mrf.mxu0  ;;  %2231 = vmatmul.mubr.bf16.gmra.mxu0 %v7926_v49  ;;  %v433_v22 = vadd.f32 %v432_v47, %v7850_v11 }
  0xeb   :  { %v434_v58 = vpop.f32.mrf.mxu1  ;;  %v6313_v59 = vpop.eup %6312  ;;  %6338 = vtanh.f32 %v423_v37  ;;  %v242_v60 = vadd.f32 %v241_v57, %v7841_v4  ;;  %2424 = vmatmul.mubr.bf16.gmra.mxu1 %v7936_v54  ;;  %2579 = vmatpush1.bf16.msra.mxu0 %v6064_v44 }
  0xec   :  { %v435_v63 = vadd.f32 %v434_v58, %v7845_v5  ;;  %v6315_v8 = vpop.eup %6314  ;;  %6340 = vtanh.f32 %v240_v53  ;;  %v243_v9 = vpop.f32.mrf.mxu0  ;;  %2772 = vmatpush1.bf16.msra.mxu1 %v6067_v50  ;;  %2580 = vmatprep.subr.bf16.mxu0 %v6072_v51  ;;  %v6082_v50 = vld [vmem:[%s9804_s3 + $0x78] ss:$28 sps:$4 sm:$0xff]  }
  0xed   :  { %v436_v10 = vpop.f32.mrf.mxu1  ;;  %v6317_v16 = vpop.eup %6316  ;;  %6342 = vtanh.f32 %v242_v60  ;;  %v244_v17 = vadd.f32 %v243_v9, %v7836_v2  ;;  %2773 = vmatprep.subr.bf16.mxu1 %v6075_v55  ;;  %v7970_v34 = vpack.c.bf16 %v6315_v8, %v6309_v52  ;;  %v6085_v55 = vld [vmem:[%s9804_s3 + $0x3f8] ss:$28 sps:$4 sm:$0xff]   ;;  %v6093_v60 = vld [vmem:[%s9804_s3 + $0x3c4] ss:$28 sps:$4 sm:$0xff]  }
  0xee   :  { %v437_v19 = vadd.f32 %v436_v10, %v7850_v11  ;;  %v6319_v21 = vpop.eup %6318  ;;  %6344 = vtanh.f32 %v435_v63  ;;  %v245_v23 = vpop.f32.mrf.mxu0 }
  0xef   :  { %v438_v24 = vpop.f32.mrf.mxu1  ;;  %v6321_v25 = vpop.eup %6320  ;;  %6346 = vtanh.f32 %v244_v17  ;;  %v246_v26 = vadd.f32 %v245_v23, %v7841_v4  ;;  %v7963_v28 = vpack.c.bf16 %v6319_v21, %v6311_v56  ;;  %2581 = vmatpush1.bf16.msra.mxu0 %v6070_v7  ;;  %v6090_v56 = vld [vmem:[%s9804_s3 + $0x44] ss:$28 sps:$4 sm:$0xff]  }
  0xf0   :  { %v439_v27 = vadd.f32 %v438_v24, %v7845_v5  ;;  %v6323_v30 = vpop.eup %6322  ;;  %6348 = vtanh.f32 %v437_v19  ;;  %v249_v31 = vpop.f32.mrf.mxu0  ;;  %v7968_v33 = vpack.c.bf16 %v6321_v25, %v6313_v59  ;;  %2774 = vmatpush1.bf16.msra.mxu1 %v6073_v14  ;;  %2582 = vmatprep.subr.bf16.mxu0 %v6078_v15  ;;  %v6088_v17 = vld [vmem:[%s9804_s3 + $0x40] ss:$28 sps:$4 sm:$0xff]   ;;  %v6096_v25 = vld [vmem:[%s9804_s3 + $0xc] ss:$28 sps:$4 sm:$0xff]  }
  0xf1   :  { %v442_v32 = vpop.f32.mrf.mxu1  ;;  %v6325_v37 = vpop.eup %6324  ;;  %6350 = vtanh.f32 %v246_v26  ;;  %v250_v38 = vadd.f32 %v249_v31, %v7836_v2  ;;  %2240 = vmatprep.mubr.bf16.mxu0 %v7963_v28  ;;  %v7980_v39 = vpack.c.bf16 %v6317_v16, %v6323_v30  ;;  %2775 = vmatprep.subr.bf16.mxu1 %v6081_v20  ;;  %v6091_v24 = vld [vmem:[%s9804_s3 + $0x3c0] ss:$28 sps:$4 sm:$0xff]   ;;  %v6099_v30 = vld [vmem:[%s9804_s3 + $0x38c] ss:$28 sps:$4 sm:$0xff]  }
  0xf2   :  { %v6327_v41 = vpop.eup %6326  ;;  %6352 = vtanh.f32 %v439_v27  ;;  %2433 = vmatprep.mubr.bf16.mxu1 %v7968_v33  ;;  %v251_v42 = vpop.f32.mrf.mxu0  ;;  %2241 = vmatmul.mubr.bf16.gmra.mxu0 %v7970_v34  ;;  %v443_v7 = vadd.f32 %v442_v32, %v7850_v11 }
  0xf3   :  { %v444_v44 = vpop.f32.mrf.mxu1  ;;  %v6329_v45 = vpop.eup %6328  ;;  %6354 = vtanh.f32 %v433_v22  ;;  %v252_v46 = vadd.f32 %v251_v42, %v7841_v4  ;;  %2434 = vmatmul.mubr.bf16.gmra.mxu1 %v7980_v39  ;;  %2583 = vmatpush1.bf16.msra.mxu0 %v6076_v29 }
  0xf4   :  { %v445_v47 = vadd.f32 %v444_v44, %v7845_v5  ;;  %v6331_v51 = vpop.eup %6330  ;;  %6356 = vtanh.f32 %v250_v38  ;;  %v253_v52 = vpop.f32.mrf.mxu0  ;;  %2776 = vmatpush1.bf16.msra.mxu1 %v6079_v35  ;;  %2584 = vmatprep.subr.bf16.mxu0 %v6084_v36 }
  0xf5   :  { %v446_v53 = vpop.f32.mrf.mxu1  ;;  %v6333_v57 = vpop.eup %6332  ;;  %6358 = vtanh.f32 %v252_v46  ;;  %v254_v58 = vadd.f32 %v253_v52, %v7836_v2  ;;  %2777 = vmatprep.subr.bf16.mxu1 %v6087_v40  ;;  %v8014_v23 = vpack.c.bf16 %v6331_v51, %v6325_v37  ;;  %v6094_v40 = vld [vmem:[%s9804_s3 + $0x8] ss:$28 sps:$4 sm:$0xff]   ;;  %v6102_v46 = vld [vmem:[%s9804_s3 + $0x354] ss:$28 sps:$4 sm:$0xff]  }
  0xf6   :  { %v447_v59 = vadd.f32 %v446_v53, %v7850_v11  ;;  %v6335_v63 = vpop.eup %6334  ;;  %6360 = vtanh.f32 %v445_v47  ;;  %v255_v8 = vpop.f32.mrf.mxu0  ;;  %v6105_v52 = vld [vmem:[%s9804_s3 + $0x6d4] ss:$28 sps:$4 sm:$0xff]  }
  0xf7   :  { %v448_v9 = vpop.f32.mrf.mxu1  ;;  %v6337_v10 = vpop.eup %6336  ;;  %6362 = vtanh.f32 %v254_v58  ;;  %v256_v14 = vadd.f32 %v255_v8, %v7841_v4  ;;  %v8007_v16 = vpack.c.bf16 %v6335_v63, %v6327_v41  ;;  %2585 = vmatpush1.bf16.msra.mxu0 %v6082_v50 }
  0xf8   :  { %v449_v15 = vadd.f32 %v448_v9, %v7845_v5  ;;  %v6339_v19 = vpop.eup %6338  ;;  %6364 = vtanh.f32 %v447_v59  ;;  %v259_v20 = vpop.f32.mrf.mxu0  ;;  %v8012_v22 = vpack.c.bf16 %v6337_v10, %v6329_v45  ;;  %2778 = vmatpush1.bf16.msra.mxu1 %v6085_v55  ;;  %2586 = vmatprep.subr.bf16.mxu0 %v6090_v56  ;;  %v6097_v45 = vld [vmem:[%s9804_s3 + $0x388] ss:$28 sps:$4 sm:$0xff]  }
  0xf9   :  { %v452_v21 = vpop.f32.mrf.mxu1  ;;  %v6341_v26 = vpop.eup %6340  ;;  %6366 = vtanh.f32 %v256_v14  ;;  %v260_v27 = vadd.f32 %v259_v20, %v7836_v2  ;;  %2250 = vmatprep.mubr.bf16.mxu0 %v8007_v16  ;;  %v8024_v29 = vpack.c.bf16 %v6333_v57, %v6339_v19  ;;  %2779 = vmatprep.subr.bf16.mxu1 %v6093_v60  ;;  %v6108_v19 = vld [vmem:[%s9804_s3 + $0x31c] ss:$28 sps:$4 sm:$0xff]  }
  0xfa   :  { %v6343_v31 = vpop.eup %6342  ;;  %6368 = vtanh.f32 %v449_v15  ;;  %2443 = vmatprep.mubr.bf16.mxu1 %v8012_v22  ;;  %v261_v32 = vpop.f32.mrf.mxu0  ;;  %2251 = vmatmul.mubr.bf16.gmra.mxu0 %v8014_v23  ;;  %v453_v55 = vadd.f32 %v452_v21, %v7850_v11 }
  0xfb   :  { %v454_v35 = vpop.f32.mrf.mxu1  ;;  %v6345_v36 = vpop.eup %6344  ;;  %6370 = vtanh.f32 %v443_v7  ;;  %v262_v37 = vadd.f32 %v261_v32, %v7841_v4  ;;  %2444 = vmatmul.mubr.bf16.gmra.mxu1 %v8024_v29  ;;  %2587 = vmatpush1.bf16.msra.mxu0 %v6088_v17  ;;  %v6100_v7 = vld [vmem:[%s9804_s3 + $0x350] ss:$28 sps:$4 sm:$0xff]  }
  0xfc   :  { %v455_v38 = vadd.f32 %v454_v35, %v7845_v5  ;;  %v6347_v41 = vpop.eup %6346  ;;  %6372 = vtanh.f32 %v260_v27  ;;  %v263_v42 = vpop.f32.mrf.mxu0  ;;  %2780 = vmatpush1.bf16.msra.mxu1 %v6091_v24  ;;  %2588 = vmatprep.subr.bf16.mxu0 %v6096_v25  ;;  %v6103_v17 = vld [vmem:[%s9804_s3 + $0x6d0] ss:$28 sps:$4 sm:$0xff]   ;;  %v6111_v25 = vld [vmem:[%s9804_s3 + $0x69c] ss:$28 sps:$4 sm:$0xff]  }
  0xfd   :  { %v456_v44 = vpop.f32.mrf.mxu1  ;;  %v6349_v47 = vpop.eup %6348  ;;  %6374 = vtanh.f32 %v262_v37  ;;  %v264_v50 = vadd.f32 %v263_v42, %v7836_v2  ;;  %2781 = vmatprep.subr.bf16.mxu1 %v6099_v30  ;;  %v8058_v15 = vpack.c.bf16 %v6347_v41, %v6341_v26  ;;  %v6109_v41 = vld [vmem:[%s9804_s3 + $0x698] ss:$28 sps:$4 sm:$0xff]   ;;  %v6114_v42 = vld [vmem:[%s9804_s3 + $0x2e4] ss:$28 sps:$4 sm:$0xff]  }
  0xfe   :  { %v457_v51 = vadd.f32 %v456_v44, %v7850_v11  ;;  %v6351_v53 = vpop.eup %6350  ;;  %6376 = vtanh.f32 %v455_v38  ;;  %v265_v56 = vpop.f32.mrf.mxu0 }
  0xff   :  { %v458_v57 = vpop.f32.mrf.mxu1  ;;  %v6353_v58 = vpop.eup %6352  ;;  %6378 = vtanh.f32 %v264_v50  ;;  %v266_v59 = vadd.f32 %v265_v56, %v7841_v4  ;;  %v8051_v63 = vpack.c.bf16 %v6351_v53, %v6343_v31  ;;  %2589 = vmatpush1.bf16.msra.mxu0 %v6094_v40 }
 0x100   :  { %v459_v60 = vadd.f32 %v458_v57, %v7845_v5  ;;  %v6355_v8 = vpop.eup %6354  ;;  %6380 = vtanh.f32 %v457_v51  ;;  %v269_v9 = vpop.f32.mrf.mxu0  ;;  %v8056_v14 = vpack.c.bf16 %v6353_v58, %v6345_v36  ;;  %2782 = vmatpush1.bf16.msra.mxu1 %v6097_v45  ;;  %2590 = vmatprep.subr.bf16.mxu0 %v6102_v46  ;;  %v6106_v36 = vld [vmem:[%s9804_s3 + $0x318] ss:$28 sps:$4 sm:$0xff]  }
 0x101   :  { %v462_v10 = vpop.f32.mrf.mxu1  ;;  %v6357_v20 = vpop.eup %6356  ;;  %6382 = vtanh.f32 %v266_v59  ;;  %v270_v21 = vadd.f32 %v269_v9, %v7836_v2  ;;  %2260 = vmatprep.mubr.bf16.mxu0 %v8051_v63  ;;  %v8068_v24 = vpack.c.bf16 %v6349_v47, %v6355_v8  ;;  %2783 = vmatprep.subr.bf16.mxu1 %v6105_v52  ;;  %v6117_v47 = vld [vmem:[%s9804_s3 + $0x664] ss:$28 sps:$4 sm:$0xff]  }
 0x102   :  { %v6359_v26 = vpop.eup %6358  ;;  %6384 = vtanh.f32 %v459_v60  ;;  %2453 = vmatprep.mubr.bf16.mxu1 %v8056_v14  ;;  %v271_v27 = vpop.f32.mrf.mxu0  ;;  %2261 = vmatmul.mubr.bf16.gmra.mxu0 %v8058_v15  ;;  %v463_v51 = vadd.f32 %v462_v10, %v7850_v11  ;;  %v6112_v59 = vld [vmem:[%s9804_s3 + $0x2e0] ss:$28 sps:$4 sm:$0xff]  }
 0x103   :  { %v464_v30 = vpop.f32.mrf.mxu1  ;;  %v6361_v31 = vpop.eup %6360  ;;  %6386 = vtanh.f32 %v453_v55  ;;  %v272_v32 = vadd.f32 %v271_v27, %v7841_v4  ;;  %2454 = vmatmul.mubr.bf16.gmra.mxu1 %v8068_v24  ;;  %2591 = vmatpush2.bf16.msra.mxu0 %v6100_v7 }
 0x104   :  { %v465_v35 = vadd.f32 %v464_v30, %v7845_v5  ;;  %v6363_v37 = vpop.eup %6362  ;;  %6388 = vtanh.f32 %v270_v21  ;;  %v273_v38 = vpop.f32.mrf.mxu0  ;;  %2784 = vmatpush2.bf16.msra.mxu1 %v6103_v17  ;;  %2592 = vmatprep.subr.bf16.mxu0 %v6108_v19  ;;  %v6115_v17 = vld [vmem:[%s9804_s3 + $0x660] ss:$28 sps:$4 sm:$0xff]   ;;  %v6120_v19 = vld [vmem:[%s9804_s3 + $0x2ac] ss:$28 sps:$4 sm:$0xff]  }
 0x105   :  { %v466_v40 = vpop.f32.mrf.mxu1  ;;  %v6365_v44 = vpop.eup %6364  ;;  %6390 = vtanh.f32 %v272_v32  ;;  %v274_v45 = vadd.f32 %v273_v38, %v7836_v2  ;;  %2785 = vmatprep.subr.bf16.mxu1 %v6111_v25  ;;  %v8102_v10 = vpack.c.bf16 %v6363_v37, %v6357_v20  ;;  %v6123_v20 = vld [vmem:[%s9804_s3 + $0x62c] ss:$28 sps:$4 sm:$0xff]  }
 0x106   :  { %v467_v46 = vadd.f32 %v466_v40, %v7850_v11  ;;  %v6367_v50 = vpop.eup %6366  ;;  %6392 = vtanh.f32 %v465_v35  ;;  %v275_v52 = vpop.f32.mrf.mxu0  ;;  %v6118_v37 = vld [vmem:[%s9804_s3 + $0x2a8] ss:$28 sps:$4 sm:$0xff]  }
 0x107   :  { %v468_v53 = vpop.f32.mrf.mxu1  ;;  %v6369_v55 = vpop.eup %6368  ;;  %6394 = vtanh.f32 %v274_v45  ;;  %v276_v56 = vadd.f32 %v275_v52, %v7841_v4  ;;  %v8095_v58 = vpack.c.bf16 %v6367_v50, %v6359_v26  ;;  %2593 = vmatpush2.bf16.msra.mxu0 %v6106_v36  ;;  %v6129_v50 = vld [vmem:[%s9804_s3 + $0x5f4] ss:$28 sps:$4 sm:$0xff]  }
 0x108   :  { %v469_v57 = vadd.f32 %v468_v53, %v7845_v5  ;;  %v6371_v60 = vpop.eup %6370  ;;  %6396 = vtanh.f32 %v467_v46  ;;  %v279_v7 = vpop.f32.mrf.mxu0  ;;  %v8100_v9 = vpack.c.bf16 %v6369_v55, %v6361_v31  ;;  %2786 = vmatpush2.bf16.msra.mxu1 %v6109_v41  ;;  %2594 = vmatprep.subr.bf16.mxu0 %v6114_v42  ;;  %v6121_v42 = vld [vmem:[%s9804_s3 + $0x628] ss:$28 sps:$4 sm:$0xff]  }
 0x109   :  { %v472_v8 = vpop.f32.mrf.mxu1  ;;  %v6373_v21 = vpop.eup %6372  ;;  %6398 = vtanh.f32 %v276_v56  ;;  %v280_v25 = vadd.f32 %v279_v7, %v7836_v2  ;;  %2270 = vmatprep.mubr.bf16.mxu0 %v8095_v58  ;;  %v8112_v26 = vpack.c.bf16 %v6365_v44, %v6371_v60  ;;  %2787 = vmatprep.subr.bf16.mxu1 %v6117_v47  ;;  %v6126_v44 = vld [vmem:[%s9804_s3 + $0x274] ss:$28 sps:$4 sm:$0xff]  }
 0x10a   :  { %v6375_v27 = vpop.eup %6374  ;;  %6400 = vtanh.f32 %v469_v57  ;;  %2463 = vmatprep.mubr.bf16.mxu1 %v8100_v9  ;;  %v281_v30 = vpop.f32.mrf.mxu0  ;;  %2271 = vmatmul.mubr.bf16.gmra.mxu0 %v8102_v10  ;;  %v473_v52 = vadd.f32 %v472_v8, %v7850_v11  ;;  %v6124_v7 = vld [vmem:[%s9804_s3 + $0x270] ss:$28 sps:$4 sm:$0xff]  }
 0x10b   :  { %v474_v31 = vpop.f32.mrf.mxu1  ;;  %v6377_v32 = vpop.eup %6376  ;;  %6402 = vtanh.f32 %v463_v51  ;;  %v282_v35 = vadd.f32 %v281_v30, %v7841_v4  ;;  %2464 = vmatmul.mubr.bf16.gmra.mxu1 %v8112_v26  ;;  %2595 = vmatpush2.bf16.msra.mxu0 %v6112_v59  ;;  %v6132_v30 = vld [vmem:[%s9804_s3 + $0x23c] ss:$28 sps:$4 sm:$0xff]  }
 0x10c   :  { %v475_v36 = vadd.f32 %v474_v31, %v7845_v5  ;;  %v6379_v38 = vpop.eup %6378  ;;  %6404 = vtanh.f32 %v280_v25  ;;  %v283_v40 = vpop.f32.mrf.mxu0  ;;  %2788 = vmatpush2.bf16.msra.mxu1 %v6115_v17  ;;  %2596 = vmatprep.subr.bf16.mxu0 %v6120_v19 }
 0x10d   :  { %v476_v41 = vpop.f32.mrf.mxu1  ;;  %v6381_v45 = vpop.eup %6380  ;;  %6406 = vtanh.f32 %v282_v35  ;;  %v284_v46 = vadd.f32 %v283_v40, %v7836_v2  ;;  %2789 = vmatprep.subr.bf16.mxu1 %v6123_v20  ;;  %v8146_v20 = vpack.c.bf16 %v6379_v38, %v6373_v21  ;;  %v6135_v21 = vld [vmem:[%s9804_s3 + $0x5bc] ss:$28 sps:$4 sm:$0xff]  }
 0x10e   :  { %v477_v47 = vadd.f32 %v476_v41, %v7850_v11  ;;  %v6383_v51 = vpop.eup %6382  ;;  %6408 = vtanh.f32 %v475_v36  ;;  %v285_v53 = vpop.f32.mrf.mxu0 }
 0x10f   :  { %v478_v55 = vpop.f32.mrf.mxu1  ;;  %v6385_v56 = vpop.eup %6384  ;;  %6410 = vtanh.f32 %v284_v46  ;;  %v286_v57 = vadd.f32 %v285_v53, %v7841_v4  ;;  %v8139_v60 = vpack.c.bf16 %v6383_v51, %v6375_v27  ;;  %2597 = vmatpush2.bf16.msra.mxu0 %v6118_v37  ;;  %v6127_v27 = vld [vmem:[%s9804_s3 + $0x5f0] ss:$28 sps:$4 sm:$0xff]   ;;  %v6138_v51 = vld [vmem:[%s9804_s3 + $0x204] ss:$28 sps:$4 sm:$0xff]  }
 0x110   :  { %v479_v59 = vadd.f32 %v478_v55, %v7845_v5  ;;  %v6387_v17 = vpop.eup %6386  ;;  %6412 = vtanh.f32 %v477_v47  ;;  %v289_v19 = vpop.f32.mrf.mxu0  ;;  %v8144_v25 = vpack.c.bf16 %v6385_v56, %v6377_v32  ;;  %2790 = vmatpush2.bf16.msra.mxu1 %v6121_v42  ;;  %2598 = vmatprep.subr.bf16.mxu0 %v6126_v44  ;;  %v6130_v44 = vld [vmem:[%s9804_s3 + $0x238] ss:$28 sps:$4 sm:$0xff]   ;;  %v6141_v56 = vld [vmem:[%s9804_s3 + $0x584] ss:$28 sps:$4 sm:$0xff]  }
 0x111   :  { %v482_v8 = vpop.f32.mrf.mxu1  ;;  %v6389_v31 = vpop.eup %6388  ;;  %6414 = vtanh.f32 %v286_v57  ;;  %v290_v35 = vadd.f32 %v289_v19, %v7836_v2  ;;  %2280 = vmatprep.mubr.bf16.mxu0 %v8139_v60  ;;  %v8156_v32 = vpack.c.bf16 %v6381_v45, %v6387_v17  ;;  %2791 = vmatprep.subr.bf16.mxu1 %v6129_v50  ;;  %v6133_v50 = vld [vmem:[%s9804_s3 + $0x5b8] ss:$28 sps:$4 sm:$0xff]  }
 0x112   :  { %v6391_v36 = vpop.eup %6390  ;;  %6416 = vtanh.f32 %v479_v59  ;;  %2473 = vmatprep.mubr.bf16.mxu1 %v8144_v25  ;;  %v291_v37 = vpop.f32.mrf.mxu0  ;;  %2281 = vmatmul.mubr.bf16.gmra.mxu0 %v8146_v20  ;;  %v483_v59 = vadd.f32 %v482_v8, %v7850_v11 }
 0x113   :  { %v484_v38 = vpop.f32.mrf.mxu1  ;;  %v6393_v40 = vpop.eup %6392  ;;  %6418 = vtanh.f32 %v473_v52  ;;  %v292_v41 = vadd.f32 %v291_v37, %v7841_v4  ;;  %2474 = vmatmul.mubr.bf16.gmra.mxu1 %v8156_v32  ;;  %2599 = vmatpush2.bf16.msra.mxu0 %v6124_v7 }
 0x114   :  { %v485_v42 = vadd.f32 %v484_v38, %v7845_v5  ;;  %v6395_v45 = vpop.eup %6394  ;;  %6420 = vtanh.f32 %v290_v35  ;;  %v293_v46 = vpop.f32.mrf.mxu0  ;;  %2792 = vmatpush2.bf16.msra.mxu1 %v6127_v27  ;;  %2600 = vmatprep.subr.bf16.mxu0 %v6132_v30 }
 0x115   :  { %v486_v47 = vpop.f32.mrf.mxu1  ;;  %v6397_v52 = vpop.eup %6396  ;;  %6422 = vtanh.f32 %v292_v41  ;;  %v294_v53 = vadd.f32 %v293_v46, %v7836_v2  ;;  %2793 = vmatprep.subr.bf16.mxu1 %v6135_v21  ;;  %v6136_v21 = vld [vmem:[%s9804_s3 + $0x200] ss:$28 sps:$4 sm:$0xff]  }
 0x116   :  { %v487_v55 = vadd.f32 %v486_v47, %v7850_v11  ;;  %v6399_v57 = vpop.eup %6398  ;;  %6424 = vtanh.f32 %v485_v42  ;;  %v295_v7 = vpop.f32.mrf.mxu0  ;;  %v8190_v42 = vpack.c.bf16 %v6395_v45, %v6389_v31  ;;  %v6147_v31 = vld [vmem:[%s9804_s3 + $0x54c] ss:$28 sps:$4 sm:$0xff]  }
 0x117   :  { %v488_v17 = vpop.f32.mrf.mxu1  ;;  %v6401_v19 = vpop.eup %6400  ;;  %6426 = vtanh.f32 %v294_v53  ;;  %v296_v27 = vadd.f32 %v295_v7, %v7841_v4  ;;  %v8183_v35 = vpack.c.bf16 %v6399_v57, %v6391_v36  ;;  %2601 = vmatpush2.bf16.msra.mxu0 %v6130_v44  ;;  %v6139_v36 = vld [vmem:[%s9804_s3 + $0x580] ss:$28 sps:$4 sm:$0xff]   ;;  %v6144_v44 = vld [vmem:[%s9804_s3 + $0x1cc] ss:$28 sps:$4 sm:$0xff]  }
 0x118   :  { %v489_v30 = vadd.f32 %v488_v17, %v7845_v5  ;;  %v6403_v37 = vpop.eup %6402  ;;  %6428 = vtanh.f32 %v487_v55  ;;  %v299_v38 = vpop.f32.mrf.mxu0  ;;  %v8188_v41 = vpack.c.bf16 %v6401_v19, %v6393_v40  ;;  %9869 = vst [vmem:[#allocation6_spill] sm:$0xff] %v8190_v42  ;;  %2794 = vmatpush2.bf16.msra.mxu1 %v6133_v50  ;;  %2602 = vmatprep.subr.bf16.mxu0 %v6138_v51  ;;  %v6150_v19 = vld [vmem:[%s9804_s3 + $0x19c] ss:$28 sps:$4 sm:$0xff]  }
 0x119   :  { %9867 = vst [vmem:[#allocation4_spill] sm:$0xff] %v8183_v35  ;;  %v492_v8 = vpop.f32.mrf.mxu1  ;;  %v6405_v46 = vpop.eup %6404  ;;  %6430 = vtanh.f32 %v296_v27  ;;  %v300_v47 = vadd.f32 %v299_v38, %v7836_v2  ;;  %2290 = vmatprep.mubr.bf16.mxu0 %v8183_v35  ;;  %v8200_v40 = vpack.c.bf16 %v6397_v52, %v6403_v37  ;;  %2795 = vmatprep.subr.bf16.mxu1 %v6141_v56  ;;  %v6142_v56 = vld [vmem:[%s9804_s3 + $0x1c8] ss:$28 sps:$4 sm:$0xff]   ;;  %v6153_v37 = vld [vmem:[%s9804_s3 + $0x51c] ss:$28 sps:$4 sm:$0xff]  }
 0x11a   :  { %9868 = vst [vmem:[#allocation5_spill] sm:$0xff] %v8188_v41  ;;  %v6407_v45 = vpop.eup %6406  ;;  %6432 = vtanh.f32 %v489_v30  ;;  %2483 = vmatprep.mubr.bf16.mxu1 %v8188_v41  ;;  %v301_v50 = vpop.f32.mrf.mxu0  ;;  %2291 = vmatmul.mubr.bf16.gmra.mxu0 %v8190_v42 }
 0x11b   :  { %9870 = vst [vmem:[#allocation7_spill] sm:$0xff] %v8200_v40  ;;  %v494_v51 = vpop.f32.mrf.mxu1  ;;  %v6409_v53 = vpop.eup %6408  ;;  %6434 = vtanh.f32 %v483_v59  ;;  %v302_v55 = vadd.f32 %v301_v50, %v7841_v4  ;;  %2484 = vmatmul.mubr.bf16.gmra.mxu1 %v8200_v40  ;;  %2603 = vmatpush2.bf16.msra.mxu0 %v6136_v21  ;;  %v6145_v59 = vld [vmem:[%s9804_s3 + $0x548] ss:$28 sps:$4 sm:$0xff]  }
 0x11c   :  { %v495_v52 = vadd.f32 %v494_v51, %v7845_v5  ;;  %v6411_v57 = vpop.eup %6410  ;;  %6436 = vtanh.f32 %v300_v47  ;;  %v303_v7 = vpop.f32.mrf.mxu0  ;;  %2796 = vmatpush2.bf16.msra.mxu1 %v6139_v36  ;;  %2604 = vmatprep.subr.bf16.mxu0 %v6144_v44  ;;  %v493_v36 = vadd.f32 %v492_v8, %v7850_v11 }
 0x11d   :  { %v496_v17 = vpop.f32.mrf.mxu1  ;;  %v6413_v27 = vpop.eup %6412  ;;  %6438 = vtanh.f32 %v302_v55  ;;  %v304_v30 = vadd.f32 %v303_v7, %v7836_v2  ;;  %2797 = vmatprep.subr.bf16.mxu1 %v6147_v31  ;;  %v8231_v0 = vpack.c.bf16 %v6411_v57, %v6405_v46 }
 0x11e   :  { %v497_v21 = vadd.f32 %v496_v17, %v7850_v11  ;;  %v6415_v38 = vpop.eup %6414  ;;  %6440 = vtanh.f32 %v495_v52  ;;  %v305_v44 = vpop.f32.mrf.mxu0 }
 0x11f   :  { %v498_v47 = vpop.f32.mrf.mxu1  ;;  %v6417_v50 = vpop.eup %6416  ;;  %6442 = vtanh.f32 %v304_v30  ;;  %v306_v51 = vadd.f32 %v305_v44, %v7841_v4  ;;  %v8227_v7 = vpack.c.bf16 %v6415_v38, %v6407_v45  ;;  %2605 = vmatpush2.bf16.msra.mxu0 %v6142_v56  ;;  %9873 = vst [vmem:[#allocation10_spill] sm:$0xff] %v8231_v0 }
 0x120   :  { %v499_v55 = vadd.f32 %v498_v47, %v7845_v5  ;;  %v6419_v31 = vpop.eup %6418  ;;  %6444 = vtanh.f32 %v497_v21  ;;  %v309_v17 = vpop.f32.mrf.mxu0  ;;  %v8229_v3 = vpack.c.bf16 %v6417_v50, %v6409_v53  ;;  %2798 = vmatpush2.bf16.msra.mxu1 %v6145_v59  ;;  %2960 = vmatprep.subr.bf16.mxu0 %v6150_v19 }
 0x121   :  { %9871 = vst [vmem:[#allocation8_spill] sm:$0xff] %v8227_v7  ;;  %v502_v1 = vpop.f32.mrf.mxu1  ;;  %v6421_v8 = vpop.eup %6420  ;;  %6446 = vtanh.f32 %v306_v51  ;;  %v310_v52 = vadd.f32 %v309_v17, %v7836_v2  ;;  %2300 = vmatprep.mubr.bf16.mxu0 %v8227_v7  ;;  %v8235_v30 = vpack.c.bf16 %v6413_v27, %v6419_v31  ;;  %3153 = vmatprep.subr.bf16.mxu1 %v6153_v37 }
 0x122   :  { %9872 = vst [vmem:[#allocation9_spill] sm:$0xff] %v8229_v3  ;;  %v6423_v45 = vpop.eup %6422  ;;  %6448 = vtanh.f32 %v499_v55  ;;  %2493 = vmatprep.mubr.bf16.mxu1 %v8229_v3  ;;  %v311_v56 = vpop.f32.mrf.mxu0  ;;  %2301 = vmatmul.mubr.bf16.gmra.mxu0 %v8231_v0  ;;  %v503_v50 = vadd.f32 %v502_v1, %v7850_v11 }
 0x123   :  { %9874 = vst [vmem:[#allocation11_spill] sm:$0xff] %v8235_v30  ;;  %v504_v53 = vpop.f32.mrf.mxu1  ;;  %v6425_v46 = vpop.eup %6424  ;;  %6450 = vtanh.f32 %v493_v36  ;;  %v312_v57 = vadd.f32 %v311_v56, %v7841_v4  ;;  %2494 = vmatmul.mubr.bf16.gmra.mxu1 %v8235_v30 }
 0x124   :  { %v505_v59 = vadd.f32 %v504_v53, %v7845_v5  ;;  %v6427_v19 = vpop.eup %6426  ;;  %6452 = vtanh.f32 %v310_v52  ;;  %v313_v27 = vpop.f32.mrf.mxu0 }
 0x125   :  { %v506_v21 = vpop.f32.mrf.mxu1  ;;  %v6429_v37 = vpop.eup %6428  ;;  %6454 = vtanh.f32 %v312_v57  ;;  %v314_v38 = vadd.f32 %v313_v27, %v7836_v2 }
 0x126   :  { %v507_v44 = vadd.f32 %v506_v21, %v7850_v11  ;;  %v6431_v47 = vpop.eup %6430  ;;  %6456 = vtanh.f32 %v505_v59  ;;  %v315_v36 = vpop.f32.mrf.mxu0  ;;  %v8251_v21 = vpack.c.bf16 %v6427_v19, %v6421_v8 }
 0x127   :  { %v508_v51 = vpop.f32.mrf.mxu1  ;;  %v6433_v55 = vpop.eup %6432  ;;  %6458 = vtanh.f32 %v314_v38  ;;  %v316_v31 = vadd.f32 %v315_v36, %v7841_v4  ;;  %v8247_v52 = vpack.c.bf16 %v6431_v47, %v6423_v45 }
 0x128   :  { %v509_v17 = vadd.f32 %v508_v51, %v7845_v5  ;;  %v6435_v56 = vpop.eup %6434  ;;  %6460 = vtanh.f32 %v507_v44  ;;  %v319_v53 = vpop.f32.mrf.mxu0  ;;  %v8249_v27 = vpack.c.bf16 %v6433_v55, %v6425_v46  ;;  %9877 = vst [vmem:[#allocation14_spill] sm:$0xff] %v8251_v21 }
 0x129   :  { %9875 = vst [vmem:[#allocation12_spill] sm:$0xff] %v8247_v52  ;;  %v512_v57 = vpop.f32.mrf.mxu1  ;;  %v6437_v1 = vpop.eup %6436  ;;  %6462 = vtanh.f32 %v316_v31  ;;  %v320_v59 = vadd.f32 %v319_v53, %v7836_v2  ;;  %2310 = vmatprep.mubr.bf16.mxu0 %v8247_v52  ;;  %v8255_v38 = vpack.c.bf16 %v6429_v37, %v6435_v56 }
 0x12a   :  { %9876 = vst [vmem:[#allocation13_spill] sm:$0xff] %v8249_v27  ;;  %v6439_v36 = vpop.eup %6438  ;;  %6464 = vtanh.f32 %v509_v17  ;;  %2503 = vmatprep.mubr.bf16.mxu1 %v8249_v27  ;;  %v321_v45 = vpop.f32.mrf.mxu0  ;;  %2311 = vmatmul.mubr.bf16.gmra.mxu0 %v8251_v21  ;;  %v513_v53 = vadd.f32 %v512_v57, %v7850_v11 }
 0x12b   :  { %9878 = vst [vmem:[#allocation15_spill] sm:$0xff] %v8255_v38  ;;  %v514_v44 = vpop.f32.mrf.mxu1  ;;  %v6441_v46 = vpop.eup %6440  ;;  %6466 = vtanh.f32 %v503_v50  ;;  %v322_v8 = vadd.f32 %v321_v45, %v7841_v4  ;;  %2504 = vmatmul.mubr.bf16.gmra.mxu1 %v8255_v38 }
 0x12c   :  { %v515_v19 = vadd.f32 %v514_v44, %v7845_v5  ;;  %v6443_v47 = vpop.eup %6442  ;;  %6468 = vtanh.f32 %v320_v59  ;;  %v323_v37 = vpop.f32.mrf.mxu0 }
 0x12d   :  { %v516_v51 = vpop.f32.mrf.mxu1  ;;  %v6445_v55 = vpop.eup %6444  ;;  %6470 = vtanh.f32 %v322_v8  ;;  %v324_v31 = vadd.f32 %v323_v37, %v7836_v2 }
 0x12e   :  { %v517_v17 = vadd.f32 %v516_v51, %v7850_v11  ;;  %v6447_v56 = vpop.eup %6446  ;;  %6472 = vtanh.f32 %v515_v19  ;;  %v325_v50 = vpop.f32.mrf.mxu0  ;;  %v8271_v51 = vpack.c.bf16 %v6443_v47, %v6437_v1 }
 0x12f   :  { %v518_v45 = vpop.f32.mrf.mxu1  ;;  %v6449_v62 = vpop.eup %6448  ;;  %6474 = vtanh.f32 %v324_v31  ;;  %v326_v44 = vadd.f32 %v325_v50, %v7841_v4  ;;  %v8267_v38 = vpack.c.bf16 %v6447_v56, %v6439_v36 }
 0x130   :  { %v519_v59 = vadd.f32 %v518_v45, %v7845_v5  ;;  %v6451_v21 = vpop.eup %6450  ;;  %6476 = vtanh.f32 %v517_v17  ;;  %v329_v8 = vpop.f32.mrf.mxu0  ;;  %v8269_v27 = vpack.c.bf16 %v6449_v62, %v6441_v46  ;;  %9881 = vst [vmem:[#allocation18_spill] sm:$0xff] %v8271_v51 }
 0x131   :  { %9879 = vst [vmem:[#allocation16_spill] sm:$0xff] %v8267_v38  ;;  %v522_v37 = vpop.f32.mrf.mxu1  ;;  %v6453_v57 = vpop.eup %6452  ;;  %6478 = vtanh.f32 %v326_v44  ;;  %v330_v19 = vadd.f32 %v329_v8, %v7836_v2  ;;  %2320 = vmatprep.mubr.bf16.mxu0 %v8267_v38  ;;  %v8275_v31 = vpack.c.bf16 %v6445_v55, %v6451_v21 }
 0x132   :  { %9880 = vst [vmem:[#allocation17_spill] sm:$0xff] %v8269_v27  ;;  %v6455_v50 = vpop.eup %6454  ;;  %6480 = vtanh.f32 %v519_v59  ;;  %2513 = vmatprep.mubr.bf16.mxu1 %v8269_v27  ;;  %v331_v36 = vpop.f32.mrf.mxu0  ;;  %2321 = vmatmul.mubr.bf16.gmra.mxu0 %v8271_v51  ;;  %v523_v8 = vadd.f32 %v522_v37, %v7850_v11 }
 0x133   :  { %9882 = vst [vmem:[#allocation19_spill] sm:$0xff] %v8275_v31  ;;  %v524_v17 = vpop.f32.mrf.mxu1  ;;  %v6457_v62 = vpop.eup %6456  ;;  %6482 = vtanh.f32 %v513_v53  ;;  %v332_v1 = vadd.f32 %v331_v36, %v7841_v4  ;;  %2514 = vmatmul.mubr.bf16.gmra.mxu1 %v8275_v31 }
 0x134   :  { %v525_v46 = vadd.f32 %v524_v17, %v7845_v5  ;;  %v6459_v47 = vpop.eup %6458  ;;  %6484 = vtanh.f32 %v330_v19  ;;  %v333_v21 = vpop.f32.mrf.mxu0 }
 0x135   :  { %v526_v55 = vpop.f32.mrf.mxu1  ;;  %v6461_v56 = vpop.eup %6460  ;;  %6486 = vtanh.f32 %v332_v1  ;;  %v334_v45 = vadd.f32 %v333_v21, %v7836_v2 }
 0x136   :  { %v527_v44 = vadd.f32 %v526_v55, %v7850_v11  ;;  %v6463_v59 = vpop.eup %6462  ;;  %6488 = vtanh.f32 %v525_v46  ;;  %v335_v53 = vpop.f32.mrf.mxu0  ;;  %v8291_v55 = vpack.c.bf16 %v6459_v47, %v6453_v57 }
 0x137   :  { %v528_v36 = vpop.f32.mrf.mxu1  ;;  %v6465_v51 = vpop.eup %6464  ;;  %6490 = vtanh.f32 %v334_v45  ;;  %v336_v17 = vadd.f32 %v335_v53, %v7841_v4  ;;  %v8287_v31 = vpack.c.bf16 %v6463_v59, %v6455_v50 }
 0x138   :  { %v529_v19 = vadd.f32 %v528_v36, %v7845_v5  ;;  %v6467_v27 = vpop.eup %6466  ;;  %6492 = vtanh.f32 %v527_v44  ;;  %v339_v1 = vpop.f32.mrf.mxu0  ;;  %v8289_v38 = vpack.c.bf16 %v6465_v51, %v6457_v62  ;;  %9885 = vst [vmem:[#allocation22_spill] sm:$0xff] %v8291_v55 }
 0x139   :  { %9883 = vst [vmem:[#allocation20_spill] sm:$0xff] %v8287_v31  ;;  %v532_v21 = vpop.f32.mrf.mxu1  ;;  %v6469_v37 = vpop.eup %6468  ;;  %6494 = vtanh.f32 %v336_v17  ;;  %v340_v46 = vadd.f32 %v339_v1, %v7836_v2  ;;  %2330 = vmatprep.mubr.bf16.mxu0 %v8287_v31  ;;  %v8295_v45 = vpack.c.bf16 %v6461_v56, %v6467_v27 }
 0x13a   :  { %9884 = vst [vmem:[#allocation21_spill] sm:$0xff] %v8289_v38  ;;  %v6471_v53 = vpop.eup %6470  ;;  %6496 = vtanh.f32 %v529_v19  ;;  %2523 = vmatprep.mubr.bf16.mxu1 %v8289_v38  ;;  %v341_v50 = vpop.f32.mrf.mxu0  ;;  %2331 = vmatmul.mubr.bf16.gmra.mxu0 %v8291_v55  ;;  %v533_v1 = vadd.f32 %v532_v21, %v7850_v11 }
 0x13b   :  { %9886 = vst [vmem:[#allocation23_spill] sm:$0xff] %v8295_v45  ;;  %v534_v44 = vpop.f32.mrf.mxu1  ;;  %v6473_v51 = vpop.eup %6472  ;;  %6498 = vtanh.f32 %v523_v8  ;;  %v342_v57 = vadd.f32 %v341_v50, %v7841_v4  ;;  %2524 = vmatmul.mubr.bf16.gmra.mxu1 %v8295_v45 }
 0x13c   :  { %v535_v62 = vadd.f32 %v534_v44, %v7845_v5  ;;  %v6475_v47 = vpop.eup %6474  ;;  %6500 = vtanh.f32 %v340_v46  ;;  %v343_v27 = vpop.f32.mrf.mxu0 }
 0x13d   :  { %v536_v56 = vpop.f32.mrf.mxu1  ;;  %v6477_v59 = vpop.eup %6476  ;;  %6502 = vtanh.f32 %v342_v57  ;;  %v344_v36 = vadd.f32 %v343_v27, %v7836_v2 }
 0x13e   :  { %v537_v17 = vadd.f32 %v536_v56, %v7850_v11  ;;  %v6479_v19 = vpop.eup %6478  ;;  %6504 = vtanh.f32 %v535_v62  ;;  %v345_v8 = vpop.f32.mrf.mxu0  ;;  %v8311_v56 = vpack.c.bf16 %v6475_v47, %v6469_v37 }
 0x13f   :  { %v538_v50 = vpop.f32.mrf.mxu1  ;;  %v6481_v55 = vpop.eup %6480  ;;  %6506 = vtanh.f32 %v344_v36  ;;  %v346_v44 = vadd.f32 %v345_v8, %v7841_v4  ;;  %v8307_v45 = vpack.c.bf16 %v6479_v19, %v6471_v53 }
 0x140   :  { %v539_v46 = vadd.f32 %v538_v50, %v7845_v5  ;;  %v6483_v38 = vpop.eup %6482  ;;  %6508 = vtanh.f32 %v537_v17  ;;  %v349_v57 = vpop.f32.mrf.mxu0  ;;  %v8309_v31 = vpack.c.bf16 %v6481_v55, %v6473_v51  ;;  %9889 = vst [vmem:[#allocation26_spill] sm:$0xff] %v8311_v56 }
 0x141   :  { %9887 = vst [vmem:[#allocation24_spill] sm:$0xff] %v8307_v45  ;;  %v542_v27 = vpop.f32.mrf.mxu1  ;;  %v6485_v21 = vpop.eup %6484  ;;  %6510 = vtanh.f32 %v346_v44  ;;  %v350_v62 = vadd.f32 %v349_v57, %v7836_v2  ;;  %2340 = vmatprep.mubr.bf16.mxu0 %v8307_v45  ;;  %v8315_v36 = vpack.c.bf16 %v6477_v59, %v6483_v38 }
 0x142   :  { %9888 = vst [vmem:[#allocation25_spill] sm:$0xff] %v8309_v31  ;;  %v6487_v8 = vpop.eup %6486  ;;  %6512 = vtanh.f32 %v539_v46  ;;  %2533 = vmatprep.mubr.bf16.mxu1 %v8309_v31  ;;  %v351_v53 = vpop.f32.mrf.mxu0  ;;  %2341 = vmatmul.mubr.bf16.gmra.mxu0 %v8311_v56  ;;  %v543_v57 = vadd.f32 %v542_v27, %v7850_v11 }
 0x143   :  { %9890 = vst [vmem:[#allocation27_spill] sm:$0xff] %v8315_v36  ;;  %v544_v17 = vpop.f32.mrf.mxu1  ;;  %v6489_v55 = vpop.eup %6488  ;;  %6514 = vtanh.f32 %v533_v1  ;;  %v352_v37 = vadd.f32 %v351_v53, %v7841_v4  ;;  %2534 = vmatmul.mubr.bf16.gmra.mxu1 %v8315_v36 }
 0x144   :  { %v545_v51 = vadd.f32 %v544_v17, %v7845_v5  ;;  %v6491_v47 = vpop.eup %6490  ;;  %6516 = vtanh.f32 %v350_v62  ;;  %v353_v38 = vpop.f32.mrf.mxu0 }
 0x145   :  { %v546_v59 = vpop.f32.mrf.mxu1  ;;  %v6493_v19 = vpop.eup %6492  ;;  %6518 = vtanh.f32 %v352_v37  ;;  %v354_v50 = vadd.f32 %v353_v38, %v7836_v2  ;;  %v8331_v2 = vpack.c.bf16 %v6491_v47, %v6485_v21 }
 0x146   :  { %v547_v44 = vadd.f32 %v546_v59, %v7850_v11  ;;  %v6495_v46 = vpop.eup %6494  ;;  %6520 = vtanh.f32 %v545_v51  ;;  %v355_v1 = vpop.f32.mrf.mxu0 }
 0x147   :  { %v548_v53 = vpop.f32.mrf.mxu1  ;;  %v6497_v56 = vpop.eup %6496  ;;  %6522 = vtanh.f32 %v354_v50  ;;  %v356_v17 = vadd.f32 %v355_v1, %v7841_v4  ;;  %v8327_v36 = vpack.c.bf16 %v6495_v46, %v6487_v8 }
 0x148   :  { %v549_v62 = vadd.f32 %v548_v53, %v7845_v5  ;;  %v6499_v31 = vpop.eup %6498  ;;  %6524 = vtanh.f32 %v547_v44  ;;  %v8329_v37 = vpack.c.bf16 %v6497_v56, %v6489_v55 }
 0x149   :  { %v6501_v38 = vpop.eup %6500  ;;  %6526 = vtanh.f32 %v356_v17  ;;  %2350 = vmatprep.mubr.bf16.mxu0 %v8327_v36  ;;  %v8334_v11 = vpack.c.bf16 %v6493_v19, %v6499_v31 }
 0x14a   :  { %v6503_v27 = vpop.eup %6502  ;;  %6528 = vtanh.f32 %v549_v62  ;;  %2543 = vmatprep.mubr.bf16.mxu1 %v8329_v37  ;;  %2351 = vmatmul.mubr.bf16.gmra.mxu0 %v8331_v2 }
 0x14b   :  { %v6505_v4 = vpop.eup %6504  ;;  %6530 = vtanh.f32 %v543_v57  ;;  %2544 = vmatmul.mubr.bf16.gmra.mxu1 %v8334_v11 }
 0x14c   :  { %v6507_v5 = vpop.eup %6506 }
 0x14d   :  { %v6509_v56 = vpop.eup %6508  ;;  %v8343_v31 = vpack.c.bf16 %v6507_v5, %v6501_v38  ;;  %v6148_v5 = vld [vmem:[%s9804_s3 + $0x198] ss:$28 sps:$4 sm:$0xff]  }
 0x14e   :  { %v6511_v21 = vpop.eup %6510 }
 0x14f   :  { %v6513_v8 = vpop.eup %6512  ;;  %v8339_v55 = vpack.c.bf16 %v6511_v21, %v6503_v27  ;;  %v6156_v21 = vld [vmem:[%s9804_s3 + $0x164] ss:$28 sps:$4 sm:$0xff]  }
 0x150   :  { %v6515_v51 = vpop.eup %6514  ;;  %v8341_v47 = vpack.c.bf16 %v6513_v8, %v6505_v4  ;;  %v6159_v8 = vld [vmem:[%s9804_s3 + $0x4e4] ss:$28 sps:$4 sm:$0xff]  }
 0x151   :  { %v6517_v59 = vpop.eup %6516  ;;  %2360 = vmatprep.mubr.bf16.mxu0 %v8339_v55  ;;  %v8346_v19 = vpack.c.bf16 %v6509_v56, %v6515_v51  ;;  %v6151_v56 = vld [vmem:[%s9804_s3 + $0x518] ss:$28 sps:$4 sm:$0xff]   ;;  %v6154_v51 = vld [vmem:[%s9804_s3 + $0x160] ss:$28 sps:$4 sm:$0xff]  }
 0x152   :  { %v6519_v50 = vpop.eup %6518  ;;  %2553 = vmatprep.mubr.bf16.mxu1 %v8341_v47  ;;  %2361 = vmatmul.mubr.bf16.gmra.mxu0 %v8343_v31 }
 0x153   :  { %v6521_v44 = vpop.eup %6520  ;;  %2554 = vmatmul.mubr.bf16.gmra.mxu1 %v8346_v19 }
 0x154   :  { %v6523_v46 = vpop.eup %6522 }
 0x155   :  { %v6525_v57 = vpop.eup %6524  ;;  %v8355_v27 = vpack.c.bf16 %v6523_v46, %v6517_v59  ;;  %v6162_v59 = vld [vmem:[%s9804_s3 + $0x12c] ss:$28 sps:$4 sm:$0xff]  }
 0x156   :  { %v6527_v1 = vpop.eup %6526  ;;  %v6160_v46 = vld [vmem:[%s9804_s3 + $0x128] ss:$28 sps:$4 sm:$0xff]  }
 0x157   :  { %v6529_v53 = vpop.eup %6528  ;;  %v8351_v17 = vpack.c.bf16 %v6527_v1, %v6519_v50  ;;  %v6157_v50 = vld [vmem:[%s9804_s3 + $0x4e0] ss:$28 sps:$4 sm:$0xff]   ;;  %v6168_v1 = vld [vmem:[%s9804_s3 + $0xf4] ss:$28 sps:$4 sm:$0xff]  }
 0x158   :  { %v6531_v62 = vpop.eup %6530  ;;  %v8353_v38 = vpack.c.bf16 %v6529_v53, %v6521_v44  ;;  %v6165_v44 = vld [vmem:[%s9804_s3 + $0x4ac] ss:$28 sps:$4 sm:$0xff]   ;;  %v6171_v53 = vld [vmem:[%s9804_s3 + $0x474] ss:$28 sps:$4 sm:$0xff]  }
 0x159   :  { %2370 = vmatprep.mubr.bf16.mxu0 %v8351_v17  ;;  %v8358_v4 = vpack.c.bf16 %v6525_v57, %v6531_v62  ;;  %v6163_v57 = vld [vmem:[%s9804_s3 + $0x4a8] ss:$28 sps:$4 sm:$0xff]   ;;  %v6166_v62 = vld [vmem:[%s9804_s3 + $0xf0] ss:$28 sps:$4 sm:$0xff]  }
 0x15a   :  { %9891 = vst [vmem:[#allocation28_spill] sm:$0xff] %v8353_v38  ;;  %2563 = vmatprep.mubr.bf16.mxu1 %v8353_v38  ;;  %2371 = vmatmul.mubr.bf16.gmra.mxu0 %v8355_v27 }
 0x15b   :  { %2564 = vmatmul.mubr.bf16.gmra.mxu1 %v8358_v4  ;;  %2606 = vmatprep.mubr.bf16.mxu0 %v7875_v6 }
 0x15c   :  { %2799 = vmatprep.mubr.bf16.mxu1 %v7880_v12 }
 0x162   :  { %2607 = vmatmul.mubr.bf16.vlgmr.msra.gmra.mxu0 %v7882_v13 }
 0x163   :  { %2800 = vmatmul.mubr.bf16.vlgmr.msra.gmra.mxu1 %v7892_v18  ;;  %2961 = vmatpush1.bf16.msra.mxu0 %v6148_v5  ;;  %v6169_v5 = vld [vmem:[%s9804_s3 + $0x470] ss:$28 sps:$4 sm:$0xff]  }
 0x164   :  { %2616 = vmatprep.mubr.bf16.mxu0 %v7919_v43  ;;  %2809 = vmatprep.mubr.bf16.mxu1 %v7924_v48 }
 0x165   :  { %3154 = vmatpush1.bf16.msra.mxu1 %v6151_v56  ;;  %2962 = vmatprep.subr.bf16.mxu0 %v6156_v21  ;;  %v6174_v56 = vld [vmem:[%s9804_s3 + $0xbc] ss:$28 sps:$4 sm:$0xff]  }
 0x166   :  { %3155 = vmatprep.subr.bf16.mxu1 %v6159_v8  ;;  %v6177_v21 = vld [vmem:[%s9804_s3 + $0x43c] ss:$28 sps:$4 sm:$0xff]  }
 0x167   :  { %2963 = vmatpush1.bf16.msra.mxu0 %v6154_v51  ;;  %v6172_v8 = vld [vmem:[%s9804_s3 + $0xb8] ss:$28 sps:$4 sm:$0xff]  }
 0x168   :  { %2964 = vmatprep.subr.bf16.mxu0 %v6162_v59  ;;  %v6175_v51 = vld [vmem:[%s9804_s3 + $0x438] ss:$28 sps:$4 sm:$0xff]   ;;  %v6180_v59 = vld [vmem:[%s9804_s3 + $0x84] ss:$28 sps:$4 sm:$0xff]  }
 0x169   :  { %3156 = vmatpush1.bf16.msra.mxu1 %v6157_v50  ;;  %v6183_v50 = vld [vmem:[%s9804_s3 + $0x404] ss:$28 sps:$4 sm:$0xff]  }
 0x16a   :  { %2617 = vmatmul.mubr.bf16.gmra.mxu0 %v7926_v49  ;;  %3157 = vmatprep.subr.bf16.mxu1 %v6165_v44  ;;  %v6178_v44 = vld [vmem:[%s9804_s3 + $0x80] ss:$28 sps:$4 sm:$0xff]  }
 0x16b   :  { %2810 = vmatmul.mubr.bf16.gmra.mxu1 %v7936_v54  ;;  %2626 = vmatprep.mubr.bf16.mxu0 %v7963_v28 }
 0x16c   :  { %2819 = vmatprep.mubr.bf16.mxu1 %v7968_v33  ;;  %2965 = vmatpush1.bf16.msra.mxu0 %v6160_v46  ;;  %v6181_v46 = vld [vmem:[%s9804_s3 + $0x400] ss:$28 sps:$4 sm:$0xff]  }
 0x16d   :  { %3158 = vmatpush1.bf16.msra.mxu1 %v6163_v57  ;;  %2966 = vmatprep.subr.bf16.mxu0 %v6168_v1  ;;  %v6186_v57 = vld [vmem:[%s9804_s3 + $0x4c] ss:$28 sps:$4 sm:$0xff]  }
 0x16e   :  { %3159 = vmatprep.subr.bf16.mxu1 %v6171_v53  ;;  %v6189_v1 = vld [vmem:[%s9804_s3 + $0x3cc] ss:$28 sps:$4 sm:$0xff]  }
 0x16f   :  { %v6184_v53 = vld [vmem:[%s9804_s3 + $0x48] ss:$28 sps:$4 sm:$0xff]  }
 0x170   :  { %2967 = vmatpush1.bf16.msra.mxu0 %v6166_v62  ;;  %v6187_v62 = vld [vmem:[%s9804_s3 + $0x3c8] ss:$28 sps:$4 sm:$0xff]  }
 0x171   :  { %3160 = vmatpush1.bf16.msra.mxu1 %v6169_v5  ;;  %2968 = vmatprep.subr.bf16.mxu0 %v6174_v56  ;;  %v6192_v5 = vld [vmem:[%s9804_s3 + $0x14] ss:$28 sps:$4 sm:$0xff]  }
 0x172   :  { %2627 = vmatmul.mubr.bf16.gmra.mxu0 %v7970_v34  ;;  %3161 = vmatprep.subr.bf16.mxu1 %v6177_v21  ;;  %v6195_v56 = vld [vmem:[%s9804_s3 + $0x394] ss:$28 sps:$4 sm:$0xff]  }
 0x173   :  { %2820 = vmatmul.mubr.bf16.gmra.mxu1 %v7980_v39  ;;  %2636 = vmatprep.mubr.bf16.mxu0 %v8007_v16  ;;  %v6190_v21 = vld [vmem:[%s9804_s3 + $0x10] ss:$28 sps:$4 sm:$0xff]  }
 0x174   :  { %2829 = vmatprep.mubr.bf16.mxu1 %v8012_v22  ;;  %2969 = vmatpush1.bf16.msra.mxu0 %v6172_v8  ;;  %v6193_v8 = vld [vmem:[%s9804_s3 + $0x390] ss:$28 sps:$4 sm:$0xff]  }
 0x175   :  { %3162 = vmatpush1.bf16.msra.mxu1 %v6175_v51  ;;  %2970 = vmatprep.subr.bf16.mxu0 %v6180_v59  ;;  %v6198_v51 = vld [vmem:[%s9804_s3 + $0x35c] ss:$28 sps:$4 sm:$0xff]  }
 0x176   :  { %3163 = vmatprep.subr.bf16.mxu1 %v6183_v50  ;;  %v6201_v59 = vld [vmem:[%s9804_s3 + $0x6dc] ss:$28 sps:$4 sm:$0xff]  }
 0x177   :  { %v6196_v50 = vld [vmem:[%s9804_s3 + $0x358] ss:$28 sps:$4 sm:$0xff]  }
 0x178   :  { %2971 = vmatpush1.bf16.msra.mxu0 %v6178_v44  ;;  %v6199_v44 = vld [vmem:[%s9804_s3 + $0x6d8] ss:$28 sps:$4 sm:$0xff]  }
 0x179   :  { %3164 = vmatpush1.bf16.msra.mxu1 %v6181_v46  ;;  %2972 = vmatprep.subr.bf16.mxu0 %v6186_v57  ;;  %v6204_v46 = vld [vmem:[%s9804_s3 + $0x324] ss:$28 sps:$4 sm:$0xff]  }
 0x17a   :  { %2637 = vmatmul.mubr.bf16.gmra.mxu0 %v8014_v23  ;;  %3165 = vmatprep.subr.bf16.mxu1 %v6189_v1  ;;  %v6207_v57 = vld [vmem:[%s9804_s3 + $0x6a4] ss:$28 sps:$4 sm:$0xff]  }
 0x17b   :  { %2830 = vmatmul.mubr.bf16.gmra.mxu1 %v8024_v29  ;;  %2646 = vmatprep.mubr.bf16.mxu0 %v8051_v63  ;;  %v6202_v1 = vld [vmem:[%s9804_s3 + $0x320] ss:$28 sps:$4 sm:$0xff]  }
 0x17c   :  { %2839 = vmatprep.mubr.bf16.mxu1 %v8056_v14  ;;  %2973 = vmatpush1.bf16.msra.mxu0 %v6184_v53  ;;  %v6205_v53 = vld [vmem:[%s9804_s3 + $0x6a0] ss:$28 sps:$4 sm:$0xff]  }
 0x17d   :  { %3166 = vmatpush1.bf16.msra.mxu1 %v6187_v62  ;;  %2974 = vmatprep.subr.bf16.mxu0 %v6192_v5  ;;  %v6210_v62 = vld [vmem:[%s9804_s3 + $0x2ec] ss:$28 sps:$4 sm:$0xff]  }
 0x17e   :  { %3167 = vmatprep.subr.bf16.mxu1 %v6195_v56  ;;  %v6213_v5 = vld [vmem:[%s9804_s3 + $0x66c] ss:$28 sps:$4 sm:$0xff]  }
 0x17f   :  { %v6208_v56 = vld [vmem:[%s9804_s3 + $0x2e8] ss:$28 sps:$4 sm:$0xff]  }
 0x180   :  { %2975 = vmatpush1.bf16.msra.mxu0 %v6190_v21  ;;  %v6211_v21 = vld [vmem:[%s9804_s3 + $0x668] ss:$28 sps:$4 sm:$0xff]  }
 0x181   :  { %3168 = vmatpush1.bf16.msra.mxu1 %v6193_v8  ;;  %2976 = vmatprep.subr.bf16.mxu0 %v6198_v51  ;;  %v6216_v8 = vld [vmem:[%s9804_s3 + $0x2b4] ss:$28 sps:$4 sm:$0xff]  }
 0x182   :  { %2647 = vmatmul.mubr.bf16.gmra.mxu0 %v8058_v15  ;;  %3169 = vmatprep.subr.bf16.mxu1 %v6201_v59  ;;  %v6219_v51 = vld [vmem:[%s9804_s3 + $0x634] ss:$28 sps:$4 sm:$0xff]  }
 0x183   :  { %2840 = vmatmul.mubr.bf16.gmra.mxu1 %v8068_v24  ;;  %2656 = vmatprep.mubr.bf16.mxu0 %v8095_v58  ;;  %v6214_v59 = vld [vmem:[%s9804_s3 + $0x2b0] ss:$28 sps:$4 sm:$0xff]  }
 0x184   :  { %2849 = vmatprep.mubr.bf16.mxu1 %v8100_v9  ;;  %2977 = vmatpush2.bf16.msra.mxu0 %v6196_v50  ;;  %v6217_v50 = vld [vmem:[%s9804_s3 + $0x630] ss:$28 sps:$4 sm:$0xff]  }
 0x185   :  { %3170 = vmatpush2.bf16.msra.mxu1 %v6199_v44  ;;  %2978 = vmatprep.subr.bf16.mxu0 %v6204_v46  ;;  %v6222_v44 = vld [vmem:[%s9804_s3 + $0x27c] ss:$28 sps:$4 sm:$0xff]  }
 0x186   :  { %3171 = vmatprep.subr.bf16.mxu1 %v6207_v57  ;;  %v6225_v46 = vld [vmem:[%s9804_s3 + $0x5fc] ss:$28 sps:$4 sm:$0xff]  }
 0x187   :  { %v6220_v57 = vld [vmem:[%s9804_s3 + $0x278] ss:$28 sps:$4 sm:$0xff]  }
 0x188   :  { %2979 = vmatpush2.bf16.msra.mxu0 %v6202_v1  ;;  %v6223_v1 = vld [vmem:[%s9804_s3 + $0x5f8] ss:$28 sps:$4 sm:$0xff]  }
 0x189   :  { %3172 = vmatpush2.bf16.msra.mxu1 %v6205_v53  ;;  %2980 = vmatprep.subr.bf16.mxu0 %v6210_v62  ;;  %v6228_v53 = vld [vmem:[%s9804_s3 + $0x244] ss:$28 sps:$4 sm:$0xff]  }
 0x18a   :  { %2657 = vmatmul.mubr.bf16.gmra.mxu0 %v8102_v10  ;;  %3173 = vmatprep.subr.bf16.mxu1 %v6213_v5  ;;  %v6231_v62 = vld [vmem:[%s9804_s3 + $0x5c4] ss:$28 sps:$4 sm:$0xff]  }
 0x18b   :  { %2850 = vmatmul.mubr.bf16.gmra.mxu1 %v8112_v26  ;;  %2666 = vmatprep.mubr.bf16.mxu0 %v8139_v60  ;;  %v6226_v5 = vld [vmem:[%s9804_s3 + $0x240] ss:$28 sps:$4 sm:$0xff]  }
 0x18c   :  { %2859 = vmatprep.mubr.bf16.mxu1 %v8144_v25  ;;  %2981 = vmatpush2.bf16.msra.mxu0 %v6208_v56  ;;  %v6229_v56 = vld [vmem:[%s9804_s3 + $0x5c0] ss:$28 sps:$4 sm:$0xff]  }
 0x18d   :  { %3174 = vmatpush2.bf16.msra.mxu1 %v6211_v21  ;;  %2982 = vmatprep.subr.bf16.mxu0 %v6216_v8  ;;  %v6234_v21 = vld [vmem:[%s9804_s3 + $0x20c] ss:$28 sps:$4 sm:$0xff]  }
 0x18e   :  { %3175 = vmatprep.subr.bf16.mxu1 %v6219_v51  ;;  %v6237_v8 = vld [vmem:[%s9804_s3 + $0x58c] ss:$28 sps:$4 sm:$0xff]  }
 0x18f   :  { %v6232_v51 = vld [vmem:[%s9804_s3 + $0x208] ss:$28 sps:$4 sm:$0xff]  }
 0x190   :  { %2983 = vmatpush2.bf16.msra.mxu0 %v6214_v59  ;;  %v6235_v59 = vld [vmem:[%s9804_s3 + $0x588] ss:$28 sps:$4 sm:$0xff]  }
 0x191   :  { %3176 = vmatpush2.bf16.msra.mxu1 %v6217_v50  ;;  %2984 = vmatprep.subr.bf16.mxu0 %v6222_v44  ;;  %v6240_v50 = vld [vmem:[%s9804_s3 + $0x1d4] ss:$28 sps:$4 sm:$0xff]  }
 0x192   :  { %2667 = vmatmul.mubr.bf16.gmra.mxu0 %v8146_v20  ;;  %3177 = vmatprep.subr.bf16.mxu1 %v6225_v46  ;;  %v6243_v44 = vld [vmem:[%s9804_s3 + $0x554] ss:$28 sps:$4 sm:$0xff]   ;;  %v999_v46 = vld [vmem:[%s9806_s4] sm:$0x7f] }
 0x193   :  { %2860 = vmatmul.mubr.bf16.gmra.mxu1 %v8156_v32  ;;  %2676 = vmatprep.mubr.bf16.mxu0 %v8183_v35  ;;  %v9903_v35 = vld [vmem:[#allocation22_spill] sm:$0xff] }
 0x194   :  { %2869 = vmatprep.mubr.bf16.mxu1 %v8188_v41  ;;  %2985 = vmatpush2.bf16.msra.mxu0 %v6220_v57  ;;  %v6238_v57 = vld [vmem:[%s9804_s3 + $0x1d0] ss:$28 sps:$4 sm:$0xff]  }
 0x195   :  { %3178 = vmatpush2.bf16.msra.mxu1 %v6223_v1  ;;  %2986 = vmatprep.subr.bf16.mxu0 %v6228_v53  ;;  %v6241_v1 = vld [vmem:[%s9804_s3 + $0x550] ss:$28 sps:$4 sm:$0xff]   ;;  %v6244_v53 = vld [vmem:[%s9804_s3 + $0x360] ss:$28 sps:$4 sm:$0xff]  }
 0x196   :  { %3179 = vmatprep.subr.bf16.mxu1 %v6231_v62  ;;  %v6246_v62 = vld [vmem:[%s9804_s3 + $0x6e0] ss:$28 sps:$4 sm:$0xff]  }
 0x198   :  { %2987 = vmatpush2.bf16.msra.mxu0 %v6226_v5  ;;  %v9892_v5 = vsub.s32 0, %v7826_v61 }
 0x199   :  { %3180 = vmatpush2.bf16.msra.mxu1 %v6229_v56  ;;  %2988 = vmatprep.subr.bf16.mxu0 %v6234_v21  ;;  %v9893_v21 = vsub.s32 1, %v7826_v61 }
 0x19a   :  { %2677 = vmatmul.mubr.bf16.gmra.mxu0 %v8190_v42  ;;  %3181 = vmatprep.subr.bf16.mxu1 %v6237_v8  ;;  %v8594_v56 = vrot.slane %v999_v46, %v9892_v5 }
 0x19b   :  { %2870 = vmatmul.mubr.bf16.gmra.mxu1 %v8200_v40  ;;  %2686 = vmatprep.mubr.bf16.mxu0 %v8227_v7  ;;  %v8598_v8 = vrot.slane %v999_v46, %v9893_v21 }
 0x19c   :  { %2879 = vmatprep.mubr.bf16.mxu1 %v8229_v3  ;;  %2989 = vmatpush2.bf16.msra.mxu0 %v6232_v51 }
 0x19d   :  { %3182 = vmatpush2.bf16.msra.mxu1 %v6235_v59  ;;  %2990 = vmatprep.subr.bf16.mxu0 %v6240_v50 }
 0x19e   :  { %3183 = vmatprep.subr.bf16.mxu1 %v6243_v44  ;;  %v9894_v44 = vld [vmem:[#allocation13_spill] sm:$0xff] }
 0x1a0   :  { %2991 = vmatpush2.bf16.msra.mxu0 %v6238_v57 }
 0x1a1   :  { %3184 = vmatpush2.bf16.msra.mxu1 %v6241_v1  ;;  %5727 = vmatprep.subr.bf16.mxu0 %v6244_v53 }
 0x1a2   :  { %v2222_v51 = vpop.f32.mrf.mxu0  ;;  %2687 = vmatmul.mubr.bf16.gmra.mxu0 %v8231_v0  ;;  %5839 = vmatprep.subr.bf16.mxu1 %v6246_v62 }
 0x1a3   :  { %v2223_v59 = vadd.f32 %v2222_v51, %v8594_v56  ;;  %v2415_v50 = vpop.f32.mrf.mxu1  ;;  %2880 = vmatmul.mubr.bf16.gmra.mxu1 %v8235_v30  ;;  %2696 = vmatprep.mubr.bf16.mxu0 %v8247_v52 }
 0x1a4   :  { %2889 = vmatprep.mubr.bf16.mxu1 %v9894_v44  ;;  %v2224_v57 = vpop.f32.mrf.mxu0  ;;  %v9895_v44 = vld [vmem:[#allocation14_spill] sm:$0xff] }
 0x1a5   :  { %v2416_v5 = vadd.f32 %v2415_v50, %v2223_v59  ;;  %v2225_v46 = vadd.f32 %v2224_v57, %v8598_v8  ;;  %v2417_v21 = vpop.f32.mrf.mxu1 }
 0x1a6   :  { %v2226_v1 = vpop.f32.mrf.mxu0 }
 0x1a7   :  { %v5503_v53 = vmul.f32 -1.442695, %v2416_v5  ;;  %v2418_v61 = vadd.f32 %v2417_v21, %v2225_v46  ;;  %v2227_v0 = vadd.f32 %v2226_v1, %v8594_v56  ;;  %v2419_v62 = vpop.f32.mrf.mxu1  ;;  %v9896_v46 = vld [vmem:[#allocation15_spill] sm:$0xff]  ;;  %v9897_v21 = vld [vmem:[#allocation16_spill] sm:$0xff]  ;;  %v9898_v1 = vld [vmem:[#allocation17_spill] sm:$0xff] }
 0x1a8   :  { %v2228_v3 = vpop.f32.mrf.mxu0 }
 0x1a9   :  { %6532 = vpow2.f32 %v5503_v53  ;;  %v5504_v51 = vmul.f32 -1.442695, %v2418_v61  ;;  %v2420_v7 = vadd.f32 %v2419_v62, %v2227_v0  ;;  %v2229_v30 = vadd.f32 %v2228_v3, %v8598_v8  ;;  %v2421_v52 = vpop.f32.mrf.mxu1 }
 0x1aa   :  { %v2232_v40 = vpop.f32.mrf.mxu0  ;;  %2697 = vmatmul.mubr.bf16.gmra.mxu0 %v9895_v44 }
 0x1ab   :  { %6534 = vpow2.f32 %v5504_v51  ;;  %v5510_v59 = vmul.f32 -1.442695, %v2420_v7  ;;  %v2422_v50 = vadd.f32 %v2421_v52, %v2229_v30  ;;  %v2233_v57 = vadd.f32 %v2232_v40, %v8594_v56  ;;  %v2425_v5 = vpop.f32.mrf.mxu1  ;;  %2890 = vmatmul.mubr.bf16.gmra.mxu1 %v9896_v46  ;;  %2706 = vmatprep.mubr.bf16.mxu0 %v9897_v21 }
 0x1ac   :  { %2899 = vmatprep.mubr.bf16.mxu1 %v9898_v1  ;;  %v2234_v61 = vpop.f32.mrf.mxu0 }
 0x1ad   :  { %6536 = vpow2.f32 %v5510_v59  ;;  %v5511_v0 = vmul.f32 -1.442695, %v2422_v50  ;;  %v2426_v3 = vadd.f32 %v2425_v5, %v2233_v57  ;;  %v2235_v53 = vadd.f32 %v2234_v61, %v8598_v8  ;;  %v2427_v62 = vpop.f32.mrf.mxu1  ;;  %v9899_v50 = vld [vmem:[#allocation18_spill] sm:$0xff] }
 0x1ae   :  { %v2236_v44 = vpop.f32.mrf.mxu0 }
 0x1af   :  { %6538 = vpow2.f32 %v5511_v0  ;;  %v5517_v7 = vmul.f32 -1.442695, %v2426_v3  ;;  %v2428_v30 = vadd.f32 %v2427_v62, %v2235_v53  ;;  %v2237_v40 = vadd.f32 %v2236_v44, %v8594_v56  ;;  %v2429_v52 = vpop.f32.mrf.mxu1  ;;  %v9900_v3 = vld [vmem:[#allocation19_spill] sm:$0xff]  ;;  %v9901_v44 = vld [vmem:[#allocation20_spill] sm:$0xff]  ;;  %v9902_v53 = vld [vmem:[#allocation21_spill] sm:$0xff] }
 0x1b0   :  { %v2238_v51 = vpop.f32.mrf.mxu0 }
 0x1b1   :  { %6540 = vpow2.f32 %v5517_v7  ;;  %v5518_v46 = vmul.f32 -1.442695, %v2428_v30  ;;  %v2430_v21 = vadd.f32 %v2429_v52, %v2237_v40  ;;  %v2239_v1 = vadd.f32 %v2238_v51, %v8598_v8  ;;  %v2431_v42 = vpop.f32.mrf.mxu1 }
 0x1b2   :  { %v2242_v59 = vpop.f32.mrf.mxu0  ;;  %2707 = vmatmul.mubr.bf16.gmra.mxu0 %v9899_v50 }
 0x1b3   :  { %6542 = vpow2.f32 %v5518_v46  ;;  %v5524_v57 = vmul.f32 -1.442695, %v2430_v21  ;;  %v2432_v5 = vadd.f32 %v2431_v42, %v2239_v1  ;;  %v2243_v61 = vadd.f32 %v2242_v59, %v8594_v56  ;;  %v2435_v0 = vpop.f32.mrf.mxu1  ;;  %2900 = vmatmul.mubr.bf16.gmra.mxu1 %v9900_v3  ;;  %2716 = vmatprep.mubr.bf16.mxu0 %v9901_v44 }
 0x1b4   :  { %2909 = vmatprep.mubr.bf16.mxu1 %v9902_v53  ;;  %v2244_v62 = vpop.f32.mrf.mxu0 }
 0x1b5   :  { %6544 = vpow2.f32 %v5524_v57  ;;  %v5525_v7 = vmul.f32 -1.442695, %v2432_v5  ;;  %v2436_v30 = vadd.f32 %v2435_v0, %v2243_v61  ;;  %v2245_v40 = vadd.f32 %v2244_v62, %v8598_v8  ;;  %v2437_v52 = vpop.f32.mrf.mxu1 }
 0x1b6   :  { %v6533_v51 = vpop.eup %6532  ;;  %v2246_v46 = vpop.f32.mrf.mxu0 }
 0x1b7   :  { %v4340_v21 = vadd.f32 1.0, %v6533_v51  ;;  %6546 = vpow2.f32 %v5525_v7  ;;  %v5531_v42 = vmul.f32 -1.442695, %v2436_v30  ;;  %v2438_v1 = vadd.f32 %v2437_v52, %v2245_v40  ;;  %v2439_v59 = vpop.f32.mrf.mxu1  ;;  %v9904_v51 = vld [vmem:[#allocation23_spill] sm:$0xff] }
 0x1b8   :  { %v6535_v50 = vpop.eup %6534  ;;  %v2247_v3 = vadd.f32 %v2246_v46, %v8594_v56  ;;  %v2248_v44 = vpop.f32.mrf.mxu0  ;;  %v9905_v46 = vld [vmem:[#allocation25_spill] sm:$0xff] }
 0x1b9   :  { %6548 = vrcp.f32 %v4340_v21  ;;  %v4341_v53 = vadd.f32 1.0, %v6535_v50  ;;  %v5532_v41 = vmul.f32 -1.442695, %v2438_v1  ;;  %v2249_v57 = vadd.f32 %v2248_v44, %v8598_v8  ;;  %v2441_v5 = vpop.f32.mrf.mxu1 }
 0x1ba   :  { %v6537_v61 = vpop.eup %6536  ;;  %6550 = vpow2.f32 %v5531_v42  ;;  %v2440_v0 = vadd.f32 %v2439_v59, %v2247_v3  ;;  %v2252_v62 = vpop.f32.mrf.mxu0  ;;  %2717 = vmatmul.mubr.bf16.gmra.mxu0 %v9903_v35 }
 0x1bb   :  { %6552 = vrcp.f32 %v4341_v53  ;;  %v4347_v7 = vadd.f32 1.0, %v6537_v61  ;;  %v2442_v30 = vadd.f32 %v2441_v5, %v2249_v57  ;;  %v2253_v40 = vadd.f32 %v2252_v62, %v8594_v56  ;;  %v2445_v52 = vpop.f32.mrf.mxu1  ;;  %2910 = vmatmul.mubr.bf16.gmra.mxu1 %v9904_v51  ;;  %2726 = vmatprep.mubr.bf16.mxu0 %v8307_v45 }
 0x1bc   :  { %v6539_v50 = vpop.eup %6538  ;;  %6554 = vpow2.f32 %v5532_v41  ;;  %v5538_v44 = vmul.f32 -1.442695, %v2440_v0  ;;  %2919 = vmatprep.mubr.bf16.mxu1 %v9905_v46  ;;  %v2254_v21 = vpop.f32.mrf.mxu0 }
 0x1bd   :  { %6556 = vrcp.f32 %v4347_v7  ;;  %v4348_v3 = vadd.f32 1.0, %v6539_v50  ;;  %v5539_v42 = vmul.f32 -1.442695, %v2442_v30  ;;  %v2446_v1 = vadd.f32 %v2445_v52, %v2253_v40  ;;  %v2447_v53 = vpop.f32.mrf.mxu1 }
 0x1be   :  { %v6541_v59 = vpop.eup %6540  ;;  %6558 = vpow2.f32 %v5538_v44  ;;  %v2255_v57 = vadd.f32 %v2254_v21, %v8598_v8  ;;  %v2256_v5 = vpop.f32.mrf.mxu0 }
 0x1bf   :  { %6560 = vrcp.f32 %v4348_v3  ;;  %v4354_v61 = vadd.f32 1.0, %v6541_v59  ;;  %v5545_v62 = vmul.f32 -1.442695, %v2446_v1  ;;  %v2257_v45 = vadd.f32 %v2256_v5, %v8594_v56  ;;  %v2449_v41 = vpop.f32.mrf.mxu1  ;;  %v9906_v3 = vld [vmem:[#allocation26_spill] sm:$0xff] }
 0x1c0   :  { %v6543_v0 = vpop.eup %6542  ;;  %6562 = vpow2.f32 %v5539_v42  ;;  %v2448_v46 = vadd.f32 %v2447_v53, %v2255_v57  ;;  %v2258_v51 = vpop.f32.mrf.mxu0  ;;  %v9907_v42 = vld [vmem:[#allocation27_spill] sm:$0xff] }
 0x1c1   :  { %6564 = vrcp.f32 %v4354_v61  ;;  %v4355_v7 = vadd.f32 1.0, %v6543_v0  ;;  %v2450_v30 = vadd.f32 %v2449_v41, %v2257_v45  ;;  %v2259_v40 = vadd.f32 %v2258_v51, %v8598_v8  ;;  %v2451_v52 = vpop.f32.mrf.mxu1 }
 0x1c2   :  { %v6545_v50 = vpop.eup %6544  ;;  %6566 = vpow2.f32 %v5545_v62  ;;  %v5546_v44 = vmul.f32 -1.442695, %v2448_v46  ;;  %v2262_v21 = vpop.f32.mrf.mxu0  ;;  %2727 = vmatmul.mubr.bf16.gmra.mxu0 %v9906_v3 }
 0x1c3   :  { %6568 = vrcp.f32 %v4355_v7  ;;  %v4361_v1 = vadd.f32 1.0, %v6545_v50  ;;  %v5552_v59 = vmul.f32 -1.442695, %v2450_v30  ;;  %v2452_v5 = vadd.f32 %v2451_v52, %v2259_v40  ;;  %v2455_v35 = vpop.f32.mrf.mxu1  ;;  %2920 = vmatmul.mubr.bf16.gmra.mxu1 %v9907_v42  ;;  %2736 = vmatprep.mubr.bf16.mxu0 %v8327_v36 }
 0x1c4   :  { %v6547_v53 = vpop.eup %6546  ;;  %6570 = vpow2.f32 %v5546_v44  ;;  %v2263_v45 = vadd.f32 %v2262_v21, %v8594_v56  ;;  %2929 = vmatprep.mubr.bf16.mxu1 %v8329_v37  ;;  %v2264_v51 = vpop.f32.mrf.mxu0 }
 0x1c5   :  { %6572 = vrcp.f32 %v4361_v1  ;;  %v4362_v46 = vadd.f32 1.0, %v6547_v53  ;;  %v5553_v57 = vmul.f32 -1.442695, %v2452_v5  ;;  %v2265_v61 = vadd.f32 %v2264_v51, %v8598_v8  ;;  %v2457_v62 = vpop.f32.mrf.mxu1 }
 0x1c6   :  { %v6549_v41 = vpop.eup %6548  ;;  %6574 = vpow2.f32 %v5552_v59  ;;  %v2456_v0 = vadd.f32 %v2455_v35, %v2263_v45  ;;  %v2266_v7 = vpop.f32.mrf.mxu0 }
 0x1c7   :  { %v6551_v30 = vpop.eup %6550  ;;  %5012 = vst [vmem:[%s9807_s5] sm:$0xff] %v6549_v41  ;;  %6576 = vrcp.f32 %v4362_v46  ;;  %v2458_v40 = vadd.f32 %v2457_v62, %v2265_v61  ;;  %v2267_v52 = vadd.f32 %v2266_v7, %v8594_v56  ;;  %v2459_v50 = vpop.f32.mrf.mxu1 }
 0x1c8   :  { %v6553_v44 = vpop.eup %6552  ;;  %v4368_v21 = vadd.f32 1.0, %v6551_v30  ;;  %6578 = vpow2.f32 %v5553_v57  ;;  %v5559_v1 = vmul.f32 -1.442695, %v2456_v0  ;;  %v2268_v5 = vpop.f32.mrf.mxu0 }
 0x1c9   :  { %v6555_v53 = vpop.eup %6554  ;;  %5013 = vst [vmem:[%s9807_s5 + $0x8] sm:$0xff] %v6553_v44  ;;  %v5560_v35 = vmul.f32 -1.442695, %v2458_v40  ;;  %v2460_v59 = vadd.f32 %v2459_v50, %v2267_v52  ;;  %v2269_v45 = vadd.f32 %v2268_v5, %v8598_v8  ;;  %v2461_v51 = vpop.f32.mrf.mxu1 }
 0x1ca   :  { %v6557_v46 = vpop.eup %6556  ;;  %6580 = vrcp.f32 %v4368_v21  ;;  %v4369_v61 = vadd.f32 1.0, %v6555_v53  ;;  %v2272_v62 = vpop.f32.mrf.mxu0  ;;  %2737 = vmatmul.mubr.bf16.gmra.mxu0 %v8331_v2 }
 0x1cb   :  { %v6559_v41 = vpop.eup %6558  ;;  %5020 = vst [vmem:[%s9807_s5 + $0x38] sm:$0xff] %v6557_v46  ;;  %6582 = vpow2.f32 %v5559_v1  ;;  %v5566_v57 = vmul.f32 -1.442695, %v2460_v59  ;;  %v2462_v0 = vadd.f32 %v2461_v51, %v2269_v45  ;;  %v2273_v7 = vadd.f32 %v2272_v62, %v8594_v56  ;;  %v2465_v30 = vpop.f32.mrf.mxu1  ;;  %2930 = vmatmul.mubr.bf16.gmra.mxu1 %v8334_v11  ;;  %2746 = vmatprep.mubr.bf16.mxu0 %v8339_v55 }
 0x1cc   :  { %v6561_v40 = vpop.eup %6560  ;;  %6584 = vrcp.f32 %v4369_v61  ;;  %v4375_v52 = vadd.f32 1.0, %v6559_v41  ;;  %2939 = vmatprep.mubr.bf16.mxu1 %v8341_v47  ;;  %v2274_v50 = vpop.f32.mrf.mxu0 }
 0x1cd   :  { %v6563_v44 = vpop.eup %6562  ;;  %5021 = vst [vmem:[%s9807_s5 + $0x40] sm:$0xff] %v6561_v40  ;;  %6586 = vpow2.f32 %v5560_v35  ;;  %v5567_v21 = vmul.f32 -1.442695, %v2462_v0  ;;  %v2466_v1 = vadd.f32 %v2465_v30, %v2273_v7  ;;  %v2275_v5 = vadd.f32 %v2274_v50, %v8598_v8  ;;  %v2467_v53 = vpop.f32.mrf.mxu1 }
 0x1ce   :  { %v6565_v59 = vpop.eup %6564  ;;  %6588 = vrcp.f32 %v4375_v52  ;;  %v4376_v45 = vadd.f32 1.0, %v6563_v44  ;;  %v2276_v51 = vpop.f32.mrf.mxu0 }
 0x1cf   :  { %v6567_v46 = vpop.eup %6566  ;;  %5027 = vst [vmem:[%s9807_s5 + $0x70] sm:$0xff] %v6565_v59  ;;  %6590 = vpow2.f32 %v5566_v57  ;;  %v5573_v61 = vmul.f32 -1.442695, %v2466_v1  ;;  %v2468_v62 = vadd.f32 %v2467_v53, %v2275_v5  ;;  %v2277_v41 = vadd.f32 %v2276_v51, %v8594_v56  ;;  %v2469_v35 = vpop.f32.mrf.mxu1 }
 0x1d0   :  { %v6569_v0 = vpop.eup %6568  ;;  %6592 = vrcp.f32 %v4376_v45  ;;  %v4382_v7 = vadd.f32 1.0, %v6567_v46  ;;  %v2278_v30 = vpop.f32.mrf.mxu0 }
 0x1d1   :  { %v6571_v40 = vpop.eup %6570  ;;  %5028 = vst [vmem:[%s9807_s5 + $0x78] sm:$0xff] %v6569_v0  ;;  %6594 = vpow2.f32 %v5567_v21  ;;  %v5574_v52 = vmul.f32 -1.442695, %v2468_v62  ;;  %v2470_v50 = vadd.f32 %v2469_v35, %v2277_v41  ;;  %v2279_v44 = vadd.f32 %v2278_v30, %v8598_v8  ;;  %v2471_v57 = vpop.f32.mrf.mxu1 }
 0x1d2   :  { %v6573_v1 = vpop.eup %6572  ;;  %6596 = vrcp.f32 %v4382_v7  ;;  %v4383_v5 = vadd.f32 1.0, %v6571_v40  ;;  %v2282_v53 = vpop.f32.mrf.mxu0  ;;  %2747 = vmatmul.mubr.bf16.gmra.mxu0 %v8343_v31 }
 0x1d3   :  { %v6575_v59 = vpop.eup %6574  ;;  %5034 = vst [vmem:[%s9807_s5 + $0xa8] sm:$0xff] %v6573_v1  ;;  %6598 = vpow2.f32 %v5573_v61  ;;  %v5580_v45 = vmul.f32 -1.442695, %v2470_v50  ;;  %v2472_v51 = vadd.f32 %v2471_v57, %v2279_v44  ;;  %v2283_v21 = vadd.f32 %v2282_v53, %v8594_v56  ;;  %v2475_v46 = vpop.f32.mrf.mxu1  ;;  %2940 = vmatmul.mubr.bf16.gmra.mxu1 %v8346_v19  ;;  %2756 = vmatprep.mubr.bf16.mxu0 %v8351_v17 }
 0x1d4   :  { %v6577_v62 = vpop.eup %6576  ;;  %6600 = vrcp.f32 %v4383_v5  ;;  %v4389_v41 = vadd.f32 1.0, %v6575_v59  ;;  %2949 = vmatprep.mubr.bf16.mxu1 %v8353_v38  ;;  %v2284_v35 = vpop.f32.mrf.mxu0 }
 0x1d5   :  { %v6579_v0 = vpop.eup %6578  ;;  %5035 = vst [vmem:[%s9807_s5 + $0xb0] sm:$0xff] %v6577_v62  ;;  %6602 = vpow2.f32 %v5574_v52  ;;  %v5581_v61 = vmul.f32 -1.442695, %v2472_v51  ;;  %v2476_v7 = vadd.f32 %v2475_v46, %v2283_v21  ;;  %v2285_v30 = vadd.f32 %v2284_v35, %v8598_v8  ;;  %v2477_v40 = vpop.f32.mrf.mxu1 }
 0x1d6   :  { %6604 = vrcp.f32 %v4389_v41  ;;  %v4390_v50 = vadd.f32 1.0, %v6579_v0  ;;  %v2286_v44 = vpop.f32.mrf.mxu0 }
 0x1d7   :  { %v6581_v57 = vpop.eup %6580  ;;  %6606 = vpow2.f32 %v5580_v45  ;;  %v5587_v1 = vmul.f32 -1.442695, %v2476_v7  ;;  %v2478_v5 = vadd.f32 %v2477_v40, %v2285_v30  ;;  %v2287_v53 = vadd.f32 %v2286_v44, %v8594_v56  ;;  %v2479_v59 = vpop.f32.mrf.mxu1 }
 0x1d8   :  { %v6583_v38 = vpop.eup %6582  ;;  %5041 = vst [vmem:[%s9807_s5 + $0xe0] sm:$0xff] %v6581_v57  ;;  %6608 = vrcp.f32 %v4390_v50  ;;  %v2288_v52 = vpop.f32.mrf.mxu0 }
 0x1d9   :  { %v6585_v51 = vpop.eup %6584  ;;  %v4396_v21 = vadd.f32 1.0, %v6583_v38  ;;  %6610 = vpow2.f32 %v5581_v61  ;;  %v5588_v46 = vmul.f32 -1.442695, %v2478_v5  ;;  %v2480_v62 = vadd.f32 %v2479_v59, %v2287_v53  ;;  %v2481_v41 = vpop.f32.mrf.mxu1 }
 0x1da   :  { %v6587_v35 = vpop.eup %6586  ;;  %5042 = vst [vmem:[%s9807_s5 + $0xe8] sm:$0xff] %v6585_v51  ;;  %6612 = vpow2.f32 %v5587_v1  ;;  %v2289_v45 = vadd.f32 %v2288_v52, %v8598_v8  ;;  %v2292_v0 = vpop.f32.mrf.mxu0  ;;  %2757 = vmatmul.mubr.bf16.gmra.mxu0 %v8355_v27 }
 0x1db   :  { %v6589_v7 = vpop.eup %6588  ;;  %6614 = vrcp.f32 %v4396_v21  ;;  %v4397_v30 = vadd.f32 1.0, %v6587_v35  ;;  %v5594_v40 = vmul.f32 -1.442695, %v2480_v62  ;;  %v2293_v38 = vadd.f32 %v2292_v0, %v8594_v56  ;;  %v2485_v61 = vpop.f32.mrf.mxu1  ;;  %2950 = vmatmul.mubr.bf16.gmra.mxu1 %v8358_v4  ;;  %2992 = vmatprep.mubr.bf16.mxu0 %v7875_v6 }
 0x1dc   :  { %v6591_v50 = vpop.eup %6590  ;;  %5048 = vst [vmem:[%s9807_s5 + $0x118] sm:$0xff] %v6589_v7  ;;  %6616 = vpow2.f32 %v5588_v46  ;;  %v2482_v44 = vadd.f32 %v2481_v41, %v2289_v45  ;;  %3185 = vmatprep.mubr.bf16.mxu1 %v7880_v12  ;;  %v2294_v57 = vpop.f32.mrf.mxu0  ;;  %v6245_v7 = vld [vmem:[%s9804_s3 + $0x1a0] ss:$28 sps:$4 sm:$0xff]  }
 0x1dd   :  { %v6593_v1 = vpop.eup %6592  ;;  %6618 = vrcp.f32 %v4397_v30  ;;  %v4403_v5 = vadd.f32 1.0, %v6591_v50  ;;  %v2486_v53 = vadd.f32 %v2485_v61, %v2293_v38  ;;  %v2295_v59 = vadd.f32 %v2294_v57, %v8598_v8  ;;  %v2487_v52 = vpop.f32.mrf.mxu1  ;;  %v6247_v61 = vld [vmem:[%s9804_s3 + $0x520] ss:$28 sps:$4 sm:$0xff]  }
 0x1de   :  { %v6595_v51 = vpop.eup %6594  ;;  %5049 = vst [vmem:[%s9807_s5 + $0x120] sm:$0xff] %v6593_v1  ;;  %6620 = vpow2.f32 %v5594_v40  ;;  %v5595_v21 = vmul.f32 -1.442695, %v2482_v44  ;;  %v2296_v62 = vpop.f32.mrf.mxu0 }
 0x1df   :  { %v6597_v46 = vpop.eup %6596  ;;  %6622 = vrcp.f32 %v4403_v5  ;;  %v4404_v41 = vadd.f32 1.0, %v6595_v51  ;;  %v5601_v35 = vmul.f32 -1.442695, %v2486_v53  ;;  %v2488_v45 = vadd.f32 %v2487_v52, %v2295_v59  ;;  %v2489_v0 = vpop.f32.mrf.mxu1  ;;  %v6248_v53 = vld [vmem:[%s9804_s3 + $0x328] ss:$28 sps:$4 sm:$0xff]  }
 0x1e0   :  { %v6599_v30 = vpop.eup %6598  ;;  %5055 = vst [vmem:[%s9807_s5 + $0x150] sm:$0xff] %v6597_v46  ;;  %6624 = vpow2.f32 %v5595_v21  ;;  %v2297_v40 = vadd.f32 %v2296_v62, %v8594_v56  ;;  %v2298_v38 = vpop.f32.mrf.mxu0  ;;  %v6250_v21 = vld [vmem:[%s9804_s3 + $0x6a8] ss:$28 sps:$4 sm:$0xff]  }
 0x1e1   :  { %v6601_v50 = vpop.eup %6600  ;;  %6626 = vrcp.f32 %v4404_v41  ;;  %v4410_v44 = vadd.f32 1.0, %v6599_v30  ;;  %v5602_v57 = vmul.f32 -1.442695, %v2488_v45  ;;  %v2299_v1 = vadd.f32 %v2298_v38, %v8598_v8  ;;  %v2491_v5 = vpop.f32.mrf.mxu1 }
 0x1e2   :  { %v6603_v59 = vpop.eup %6602  ;;  %5056 = vst [vmem:[%s9807_s5 + $0x158] sm:$0xff] %v6601_v50  ;;  %6628 = vpow2.f32 %v5601_v35  ;;  %v2490_v52 = vadd.f32 %v2489_v0, %v2297_v40  ;;  %v2302_v51 = vpop.f32.mrf.mxu0  ;;  %2993 = vmatmul.mubr.bf16.vlgmr.msra.gmra.mxu0 %v7882_v13  ;;  %v6249_v35 = vld [vmem:[%s9804_s3 + $0x168] ss:$28 sps:$4 sm:$0xff]  }
 0x1e3   :  { %v6605_v62 = vpop.eup %6604  ;;  %6630 = vrcp.f32 %v4410_v44  ;;  %v4411_v46 = vadd.f32 1.0, %v6603_v59  ;;  %v2492_v41 = vadd.f32 %v2491_v5, %v2299_v1  ;;  %v2303_v45 = vadd.f32 %v2302_v51, %v8594_v56  ;;  %v2495_v30 = vpop.f32.mrf.mxu1  ;;  %3186 = vmatmul.mubr.bf16.vlgmr.msra.gmra.mxu1 %v7892_v18  ;;  %5728 = vmatpush3.bf16.msra.mxu0 %v6245_v7  ;;  %v6252_v7 = vld [vmem:[%s9804_s3 + $0x2f0] ss:$28 sps:$4 sm:$0xff]  }
 0x1e4   :  { %v6607_v0 = vpop.eup %6606  ;;  %5062 = vst [vmem:[%s9807_s5 + $0x188] sm:$0xff] %v6605_v62  ;;  %6632 = vpow2.f32 %v5602_v57  ;;  %v5608_v40 = vmul.f32 -1.442695, %v2490_v52  ;;  %3002 = vmatprep.mubr.bf16.mxu0 %v7919_v43  ;;  %3195 = vmatprep.mubr.bf16.mxu1 %v7924_v48  ;;  %v2304_v38 = vpop.f32.mrf.mxu0  ;;  %v6251_v57 = vld [vmem:[%s9804_s3 + $0x4e8] ss:$28 sps:$4 sm:$0xff]  }
 0x1e5   :  { %v6609_v50 = vpop.eup %6608  ;;  %6634 = vrcp.f32 %v4411_v46  ;;  %v4417_v44 = vadd.f32 1.0, %v6607_v0  ;;  %v5609_v1 = vmul.f32 -1.442695, %v2492_v41  ;;  %v2496_v5 = vadd.f32 %v2495_v30, %v2303_v45  ;;  %v2497_v59 = vpop.f32.mrf.mxu1  ;;  %5840 = vmatpush3.bf16.msra.mxu1 %v6247_v61  ;;  %5729 = vmatprep.subr.bf16.mxu0 %v6248_v53  ;;  %v6254_v46 = vld [vmem:[%s9804_s3 + $0x670] ss:$28 sps:$4 sm:$0xff]  }
 0x1e6   :  { %v6611_v52 = vpop.eup %6610  ;;  %5063 = vst [vmem:[%s9807_s5 + $0x190] sm:$0xff] %v6609_v50  ;;  %6636 = vpow2.f32 %v5608_v40  ;;  %v2305_v51 = vadd.f32 %v2304_v38, %v8598_v8  ;;  %v2306_v62 = vpop.f32.mrf.mxu0  ;;  %5841 = vmatprep.subr.bf16.mxu1 %v6250_v21  ;;  %v6253_v21 = vld [vmem:[%s9804_s3 + $0x130] ss:$28 sps:$4 sm:$0xff]  }
 0x1e7   :  { %v6613_v61 = vpop.eup %6612  ;;  %6638 = vrcp.f32 %v4417_v44  ;;  %v4418_v53 = vadd.f32 1.0, %v6611_v52  ;;  %v5615_v41 = vmul.f32 -1.442695, %v2496_v5  ;;  %v2307_v45 = vadd.f32 %v2306_v62, %v8594_v56  ;;  %v2499_v30 = vpop.f32.mrf.mxu1  ;;  %5730 = vmatpush3.bf16.msra.mxu0 %v6249_v35 }
 0x1e8   :  { %v6615_v0 = vpop.eup %6614  ;;  %v4424_v48 = vadd.f32 1.0, %v6613_v61  ;;  %6640 = vpow2.f32 %v5609_v1  ;;  %v2498_v40 = vadd.f32 %v2497_v59, %v2305_v51  ;;  %v2308_v50 = vpop.f32.mrf.mxu0  ;;  %5731 = vmatprep.subr.bf16.mxu0 %v6252_v7  ;;  %v6255_v1 = vld [vmem:[%s9804_s3 + $0x4b0] ss:$28 sps:$4 sm:$0xff]   ;;  %v6256_v7 = vld [vmem:[%s9804_s3 + $0x2b8] ss:$28 sps:$4 sm:$0xff]  }
 0x1e9   :  { %v6617_v38 = vpop.eup %6616  ;;  %5069 = vst [vmem:[%s9807_s5 + $0x1c0] sm:$0xff] %v6615_v0  ;;  %6642 = vrcp.f32 %v4418_v53  ;;  %v2500_v44 = vadd.f32 %v2499_v30, %v2307_v45  ;;  %v2309_v5 = vadd.f32 %v2308_v50, %v8598_v8  ;;  %v2501_v35 = vpop.f32.mrf.mxu1  ;;  %5842 = vmatpush3.bf16.msra.mxu1 %v6251_v57  ;;  %v6258_v57 = vld [vmem:[%s9804_s3 + $0x638] ss:$28 sps:$4 sm:$0xff]  }
 0x1ea   :  { %v6619_v59 = vpop.eup %6618  ;;  %6644 = vrcp.f32 %v4424_v48  ;;  %v4425_v52 = vadd.f32 1.0, %v6617_v38  ;;  %v5616_v51 = vmul.f32 -1.442695, %v2498_v40  ;;  %v2312_v62 = vpop.f32.mrf.mxu0  ;;  %3003 = vmatmul.mubr.bf16.gmra.mxu0 %v7926_v49  ;;  %5843 = vmatprep.subr.bf16.mxu1 %v6254_v46 }
 0x1eb   :  { %v6621_v61 = vpop.eup %6620  ;;  %5070 = vst [vmem:[%s9807_s5 + $0x1c8] sm:$0xff] %v6619_v59  ;;  %6646 = vpow2.f32 %v5615_v41  ;;  %v5622_v53 = vmul.f32 -1.442695, %v2500_v44  ;;  %v2502_v45 = vadd.f32 %v2501_v35, %v2309_v5  ;;  %v2313_v48 = vadd.f32 %v2312_v62, %v8594_v56  ;;  %v2505_v30 = vpop.f32.mrf.mxu1  ;;  %3196 = vmatmul.mubr.bf16.gmra.mxu1 %v7936_v54  ;;  %3012 = vmatprep.mubr.bf16.mxu0 %v7963_v28  ;;  %v6257_v41 = vld [vmem:[%s9804_s3 + $0xf8] ss:$28 sps:$4 sm:$0xff]  }
 0x1ec   :  { %v6623_v46 = vpop.eup %6622  ;;  %6648 = vrcp.f32 %v4425_v52  ;;  %v4431_v0 = vadd.f32 1.0, %v6621_v61  ;;  %3205 = vmatprep.mubr.bf16.mxu1 %v7968_v33  ;;  %v2314_v40 = vpop.f32.mrf.mxu0  ;;  %5732 = vmatpush3.bf16.msra.mxu0 %v6253_v21  ;;  %v6259_v21 = vld [vmem:[%s9804_s3 + $0x478] ss:$28 sps:$4 sm:$0xff]   ;;  %v6260_v59 = vld [vmem:[%s9804_s3 + $0x280] ss:$28 sps:$4 sm:$0xff]  }
 0x1ed   :  { %v6625_v50 = vpop.eup %6624  ;;  %5076 = vst [vmem:[%s9807_s5 + $0x1f8] sm:$0xff] %v6623_v46  ;;  %6650 = vpow2.f32 %v5616_v51  ;;  %v5623_v38 = vmul.f32 -1.442695, %v2502_v45  ;;  %v2506_v44 = vadd.f32 %v2505_v30, %v2313_v48  ;;  %v2315_v5 = vadd.f32 %v2314_v40, %v8598_v8  ;;  %v2507_v35 = vpop.f32.mrf.mxu1  ;;  %5844 = vmatpush3.bf16.msra.mxu1 %v6255_v1  ;;  %5733 = vmatprep.subr.bf16.mxu0 %v6256_v7  ;;  %v6262_v51 = vld [vmem:[%s9804_s3 + $0x600] ss:$28 sps:$4 sm:$0xff]  }
 0x1ee   :  { %v6627_v52 = vpop.eup %6626  ;;  %6652 = vrcp.f32 %v4431_v0  ;;  %v4432_v62 = vadd.f32 1.0, %v6625_v50  ;;  %v2316_v61 = vpop.f32.mrf.mxu0  ;;  %5845 = vmatprep.subr.bf16.mxu1 %v6258_v57  ;;  %v6261_v57 = vld [vmem:[%s9804_s3 + $0xc0] ss:$28 sps:$4 sm:$0xff]  }
 0x1ef   :  { %v6629_v45 = vpop.eup %6628  ;;  %5077 = vst [vmem:[%s9807_s5 + $0x200] sm:$0xff] %v6627_v52  ;;  %6654 = vpow2.f32 %v5622_v53  ;;  %v5629_v1 = vmul.f32 -1.442695, %v2506_v44  ;;  %v2508_v7 = vadd.f32 %v2507_v35, %v2315_v5  ;;  %v2317_v48 = vadd.f32 %v2316_v61, %v8594_v56  ;;  %v2509_v30 = vpop.f32.mrf.mxu1  ;;  %v6264_v52 = vld [vmem:[%s9804_s3 + $0x248] ss:$28 sps:$4 sm:$0xff]  }
 0x1f0   :  { %v6631_v46 = vpop.eup %6630  ;;  %6656 = vrcp.f32 %v4432_v62  ;;  %v4438_v0 = vadd.f32 1.0, %v6629_v45  ;;  %v2318_v40 = vpop.f32.mrf.mxu0  ;;  %5734 = vmatpush3.bf16.msra.mxu0 %v6257_v41  ;;  %v6263_v41 = vld [vmem:[%s9804_s3 + $0x440] ss:$28 sps:$4 sm:$0xff]  }
 0x1f1   :  { %v6633_v50 = vpop.eup %6632  ;;  %5083 = vst [vmem:[%s9807_s5 + $0x230] sm:$0xff] %v6631_v46  ;;  %6658 = vpow2.f32 %v5623_v38  ;;  %v5630_v53 = vmul.f32 -1.442695, %v2508_v7  ;;  %v2510_v44 = vadd.f32 %v2509_v30, %v2317_v48  ;;  %v2319_v5 = vadd.f32 %v2318_v40, %v8598_v8  ;;  %v2511_v35 = vpop.f32.mrf.mxu1  ;;  %5846 = vmatpush3.bf16.msra.mxu1 %v6259_v21  ;;  %5735 = vmatprep.subr.bf16.mxu0 %v6260_v59  ;;  %v6266_v38 = vld [vmem:[%s9804_s3 + $0x5c8] ss:$28 sps:$4 sm:$0xff]  }
 0x1f2   :  { %v6635_v62 = vpop.eup %6634  ;;  %6660 = vrcp.f32 %v4438_v0  ;;  %v4439_v61 = vadd.f32 1.0, %v6633_v50  ;;  %v2322_v45 = vpop.f32.mrf.mxu0  ;;  %3013 = vmatmul.mubr.bf16.gmra.mxu0 %v7970_v34  ;;  %5847 = vmatprep.subr.bf16.mxu1 %v6262_v51 }
 0x1f3   :  { %v6637_v21 = vpop.eup %6636  ;;  %5084 = vst [vmem:[%s9807_s5 + $0x238] sm:$0xff] %v6635_v62  ;;  %6662 = vpow2.f32 %v5629_v1  ;;  %v5636_v59 = vmul.f32 -1.442695, %v2510_v44  ;;  %v2512_v7 = vadd.f32 %v2511_v35, %v2319_v5  ;;  %v2323_v48 = vadd.f32 %v2322_v45, %v8594_v56  ;;  %v2515_v30 = vpop.f32.mrf.mxu1  ;;  %3206 = vmatmul.mubr.bf16.gmra.mxu1 %v7980_v39  ;;  %3022 = vmatprep.mubr.bf16.mxu0 %v8007_v16  ;;  %v6265_v1 = vld [vmem:[%s9804_s3 + $0x88] ss:$28 sps:$4 sm:$0xff]  }
 0x1f4   :  { %v6639_v51 = vpop.eup %6638  ;;  %6664 = vrcp.f32 %v4439_v61  ;;  %v4445_v46 = vadd.f32 1.0, %v6637_v21  ;;  %3215 = vmatprep.mubr.bf16.mxu1 %v8012_v22  ;;  %v2324_v0 = vpop.f32.mrf.mxu0  ;;  %5736 = vmatpush3.bf16.msra.mxu0 %v6261_v57  ;;  %v6267_v57 = vld [vmem:[%s9804_s3 + $0x408] ss:$28 sps:$4 sm:$0xff]   ;;  %v6268_v62 = vld [vmem:[%s9804_s3 + $0x210] ss:$28 sps:$4 sm:$0xff]  }
 0x1f5   :  { %v6641_v40 = vpop.eup %6640  ;;  %5090 = vst [vmem:[%s9807_s5 + $0x268] sm:$0xff] %v6639_v51  ;;  %6666 = vpow2.f32 %v5630_v53  ;;  %v5637_v50 = vmul.f32 -1.442695, %v2512_v7  ;;  %v2516_v44 = vadd.f32 %v2515_v30, %v2323_v48  ;;  %v2325_v5 = vadd.f32 %v2324_v0, %v8598_v8  ;;  %v2517_v35 = vpop.f32.mrf.mxu1  ;;  %5848 = vmatpush3.bf16.msra.mxu1 %v6263_v41  ;;  %5737 = vmatprep.subr.bf16.mxu0 %v6264_v52  ;;  %v6270_v53 = vld [vmem:[%s9804_s3 + $0x590] ss:$28 sps:$4 sm:$0xff]  }
 0x1f6   :  { %v6643_v61 = vpop.eup %6642  ;;  %6668 = vrcp.f32 %v4445_v46  ;;  %v4446_v45 = vadd.f32 1.0, %v6641_v40  ;;  %v2326_v21 = vpop.f32.mrf.mxu0  ;;  %5849 = vmatprep.subr.bf16.mxu1 %v6266_v38  ;;  %v6269_v46 = vld [vmem:[%s9804_s3 + $0x50] ss:$28 sps:$4 sm:$0xff]  }
 0x1f7   :  { %v6645_v7 = vpop.eup %6644  ;;  %5091 = vst [vmem:[%s9807_s5 + $0x270] sm:$0xff] %v6643_v61  ;;  %6670 = vpow2.f32 %v5636_v59  ;;  %v5643_v41 = vmul.f32 -1.442695, %v2516_v44  ;;  %v2518_v52 = vadd.f32 %v2517_v35, %v2325_v5  ;;  %v2327_v48 = vadd.f32 %v2326_v21, %v8594_v56  ;;  %v2519_v30 = vpop.f32.mrf.mxu1  ;;  %v6271_v59 = vld [vmem:[%s9804_s3 + $0x3d0] ss:$28 sps:$4 sm:$0xff]  }
 0x1f8   :  { %v6647_v51 = vpop.eup %6646  ;;  %5097 = vst [vmem:[%s9807_s5 + $0x2a0] sm:$0xff] %v6645_v7  ;;  %6672 = vrcp.f32 %v4446_v45  ;;  %v2328_v38 = vpop.f32.mrf.mxu0  ;;  %5738 = vmatpush3.bf16.msra.mxu0 %v6265_v1  ;;  %v6272_v1 = vld [vmem:[%s9804_s3 + $0x1d8] ss:$28 sps:$4 sm:$0xff]  }
 0x1f9   :  { %v6649_v0 = vpop.eup %6648  ;;  %v4452_v40 = vadd.f32 1.0, %v6647_v51  ;;  %6674 = vpow2.f32 %v5637_v50  ;;  %v5644_v44 = vmul.f32 -1.442695, %v2518_v52  ;;  %v2520_v5 = vadd.f32 %v2519_v30, %v2327_v48  ;;  %v2521_v35 = vpop.f32.mrf.mxu1  ;;  %5850 = vmatpush3.bf16.msra.mxu1 %v6267_v57  ;;  %5739 = vmatprep.subr.bf16.mxu0 %v6268_v62  ;;  %v6274_v50 = vld [vmem:[%s9804_s3 + $0x558] ss:$28 sps:$4 sm:$0xff]  }
 0x1fa   :  { %v6651_v61 = vpop.eup %6650  ;;  %5098 = vst [vmem:[%s9807_s5 + $0x2a8] sm:$0xff] %v6649_v0  ;;  %6676 = vpow2.f32 %v5643_v41  ;;  %v2329_v45 = vadd.f32 %v2328_v38, %v8598_v8  ;;  %v2332_v21 = vpop.f32.mrf.mxu0  ;;  %3023 = vmatmul.mubr.bf16.gmra.mxu0 %v8014_v23  ;;  %5851 = vmatprep.subr.bf16.mxu1 %v6270_v53  ;;  %v6273_v51 = vld [vmem:[%s9804_s3 + $0x18] ss:$28 sps:$4 sm:$0xff]  }
 0x1fb   :  { %v6653_v57 = vpop.eup %6652  ;;  %6678 = vrcp.f32 %v4452_v40  ;;  %v4453_v62 = vadd.f32 1.0, %v6651_v61  ;;  %v5650_v7 = vmul.f32 -1.442695, %v2520_v5  ;;  %v2333_v52 = vadd.f32 %v2332_v21, %v8594_v56  ;;  %v2525_v48 = vpop.f32.mrf.mxu1  ;;  %3216 = vmatmul.mubr.bf16.gmra.mxu1 %v8024_v29  ;;  %3032 = vmatprep.mubr.bf16.mxu0 %v8051_v63 }
 0x1fc   :  { %v6655_v41 = vpop.eup %6654  ;;  %5104 = vst [vmem:[%s9807_s5 + $0x2d8] sm:$0xff] %v6653_v57  ;;  %6680 = vpow2.f32 %v5644_v44  ;;  %v2522_v53 = vadd.f32 %v2521_v35, %v2329_v45  ;;  %3225 = vmatprep.mubr.bf16.mxu1 %v8056_v14  ;;  %v2334_v30 = vpop.f32.mrf.mxu0  ;;  %5740 = vmatpush3.bf16.msra.mxu0 %v6269_v46  ;;  %v6275_v44 = vld [vmem:[%s9804_s3 + $0x398] ss:$28 sps:$4 sm:$0xff]  }
 0x1fd   :  { %v6657_v38 = vpop.eup %6656  ;;  %6682 = vrcp.f32 %v4453_v62  ;;  %v4459_v0 = vadd.f32 1.0, %v6655_v41  ;;  %v2526_v40 = vadd.f32 %v2525_v48, %v2333_v52  ;;  %v2335_v5 = vadd.f32 %v2334_v30, %v8598_v8  ;;  %v2527_v61 = vpop.f32.mrf.mxu1  ;;  %5852 = vmatpush3.bf16.msra.mxu1 %v6271_v59  ;;  %5741 = vmatprep.subr.bf16.mxu0 %v6272_v1 }
 0x1fe   :  { %v6659_v35 = vpop.eup %6658  ;;  %5105 = vst [vmem:[%s9807_s5 + $0x2e0] sm:$0xff] %v6657_v38  ;;  %6684 = vpow2.f32 %v5650_v7  ;;  %v5651_v46 = vmul.f32 -1.442695, %v2522_v53  ;;  %v2336_v45 = vpop.f32.mrf.mxu0  ;;  %5853 = vmatprep.subr.bf16.mxu1 %v6274_v50 }
 0x1ff   :  { %v6661_v21 = vpop.eup %6660  ;;  %6686 = vrcp.f32 %v4459_v0  ;;  %v4460_v57 = vadd.f32 1.0, %v6659_v35  ;;  %v5657_v62 = vmul.f32 -1.442695, %v2526_v40  ;;  %v2528_v52 = vadd.f32 %v2527_v61, %v2335_v5  ;;  %v2529_v59 = vpop.f32.mrf.mxu1 }
 0x200   :  { %v6663_v1 = vpop.eup %6662  ;;  %5111 = vst [vmem:[%s9807_s5 + $0x310] sm:$0xff] %v6661_v21  ;;  %6688 = vpow2.f32 %v5651_v46  ;;  %v2337_v48 = vadd.f32 %v2336_v45, %v8594_v56  ;;  %v2338_v41 = vpop.f32.mrf.mxu0  ;;  %5742 = vmatpush3.bf16.msra.mxu0 %v6273_v51 }
 0x201   :  { %v6665_v7 = vpop.eup %6664  ;;  %6690 = vrcp.f32 %v4460_v57  ;;  %v4466_v53 = vadd.f32 1.0, %v6663_v1  ;;  %v5658_v50 = vmul.f32 -1.442695, %v2528_v52  ;;  %v2339_v30 = vadd.f32 %v2338_v41, %v8598_v8  ;;  %v2531_v38 = vpop.f32.mrf.mxu1  ;;  %5854 = vmatpush3.bf16.msra.mxu1 %v6275_v44 }
 0x202   :  { %v6667_v0 = vpop.eup %6666  ;;  %5112 = vst [vmem:[%s9807_s5 + $0x318] sm:$0xff] %v6665_v7  ;;  %6692 = vpow2.f32 %v5657_v62  ;;  %v2530_v40 = vadd.f32 %v2529_v59, %v2337_v48  ;;  %v2342_v5 = vpop.f32.mrf.mxu0  ;;  %3033 = vmatmul.mubr.bf16.gmra.mxu0 %v8058_v15 }
 0x203   :  { %v6669_v61 = vpop.eup %6668  ;;  %6694 = vrcp.f32 %v4466_v53  ;;  %v4467_v51 = vadd.f32 1.0, %v6667_v0  ;;  %v2532_v35 = vadd.f32 %v2531_v38, %v2339_v30  ;;  %v2343_v46 = vadd.f32 %v2342_v5, %v8594_v56  ;;  %v2535_v45 = vpop.f32.mrf.mxu1  ;;  %3226 = vmatmul.mubr.bf16.gmra.mxu1 %v8068_v24  ;;  %3042 = vmatprep.mubr.bf16.mxu0 %v8095_v58 }
 0x204   :  { %v6671_v44 = vpop.eup %6670  ;;  %5118 = vst [vmem:[%s9807_s5 + $0x348] sm:$0xff] %v6669_v61  ;;  %6696 = vpow2.f32 %v5658_v50  ;;  %v5664_v21 = vmul.f32 -1.442695, %v2530_v40  ;;  %3235 = vmatprep.mubr.bf16.mxu1 %v8100_v9  ;;  %v2344_v57 = vpop.f32.mrf.mxu0 }
 0x205   :  { %v6673_v62 = vpop.eup %6672  ;;  %6698 = vrcp.f32 %v4467_v51  ;;  %v4473_v52 = vadd.f32 1.0, %v6671_v44  ;;  %v5665_v59 = vmul.f32 -1.442695, %v2532_v35  ;;  %v2536_v1 = vadd.f32 %v2535_v45, %v2343_v46  ;;  %v2537_v48 = vpop.f32.mrf.mxu1 }
 0x206   :  { %v6675_v41 = vpop.eup %6674  ;;  %5119 = vst [vmem:[%s9807_s5 + $0x350] sm:$0xff] %v6673_v62  ;;  %6700 = vpow2.f32 %v5664_v21  ;;  %v2345_v7 = vadd.f32 %v2344_v57, %v8598_v8  ;;  %v2346_v53 = vpop.f32.mrf.mxu0 }
 0x207   :  { %v6677_v50 = vpop.eup %6676  ;;  %6702 = vrcp.f32 %v4473_v52  ;;  %v4474_v30 = vadd.f32 1.0, %v6675_v41  ;;  %v5671_v38 = vmul.f32 -1.442695, %v2536_v1  ;;  %v2347_v0 = vadd.f32 %v2346_v53, %v8594_v56  ;;  %v2539_v40 = vpop.f32.mrf.mxu1 }
 0x208   :  { %v6679_v5 = vpop.eup %6678  ;;  %v4480_v61 = vadd.f32 1.0, %v6677_v50  ;;  %6704 = vpow2.f32 %v5665_v59  ;;  %v2538_v51 = vadd.f32 %v2537_v48, %v2345_v7  ;;  %v2348_v35 = vpop.f32.mrf.mxu0 }
 0x209   :  { %v6681_v46 = vpop.eup %6680  ;;  %5125 = vst [vmem:[%s9807_s5 + $0x380] sm:$0xff] %v6679_v5  ;;  %6706 = vrcp.f32 %v4474_v30  ;;  %v2540_v45 = vadd.f32 %v2539_v40, %v2347_v0  ;;  %v2349_v44 = vadd.f32 %v2348_v35, %v8598_v8  ;;  %v2541_v21 = vpop.f32.mrf.mxu1 }
 0x20a   :  { %v6683_v57 = vpop.eup %6682  ;;  %6708 = vrcp.f32 %v4480_v61  ;;  %v4481_v62 = vadd.f32 1.0, %v6681_v46  ;;  %v5672_v52 = vmul.f32 -1.442695, %v2538_v51  ;;  %v2352_v1 = vpop.f32.mrf.mxu0  ;;  %3043 = vmatmul.mubr.bf16.gmra.mxu0 %v8102_v10 }
 0x20b   :  { %v6685_v59 = vpop.eup %6684  ;;  %5126 = vst [vmem:[%s9807_s5 + $0x388] sm:$0xff] %v6683_v57  ;;  %6710 = vpow2.f32 %v5671_v38  ;;  %v5678_v48 = vmul.f32 -1.442695, %v2540_v45  ;;  %v2542_v41 = vadd.f32 %v2541_v21, %v2349_v44  ;;  %v2353_v7 = vadd.f32 %v2352_v1, %v8594_v56  ;;  %v2545_v53 = vpop.f32.mrf.mxu1  ;;  %3236 = vmatmul.mubr.bf16.gmra.mxu1 %v8112_v26  ;;  %3052 = vmatprep.mubr.bf16.mxu0 %v8139_v60 }
 0x20c   :  { %v6687_v50 = vpop.eup %6686  ;;  %6712 = vrcp.f32 %v4481_v62  ;;  %v4487_v30 = vadd.f32 1.0, %v6685_v59  ;;  %3245 = vmatprep.mubr.bf16.mxu1 %v8144_v25  ;;  %v2354_v0 = vpop.f32.mrf.mxu0 }
 0x20d   :  { %v6689_v40 = vpop.eup %6688  ;;  %5132 = vst [vmem:[%s9807_s5 + $0x3b8] sm:$0xff] %v6687_v50  ;;  %6714 = vpow2.f32 %v5672_v52  ;;  %v5679_v38 = vmul.f32 -1.442695, %v2542_v41  ;;  %v2546_v5 = vadd.f32 %v2545_v53, %v2353_v7  ;;  %v2355_v61 = vadd.f32 %v2354_v0, %v8598_v8  ;;  %v2547_v51 = vpop.f32.mrf.mxu1 }
 0x20e   :  { %v6691_v35 = vpop.eup %6690  ;;  %6716 = vrcp.f32 %v4487_v30  ;;  %v4488_v46 = vadd.f32 1.0, %v6689_v40  ;;  %v2356_v45 = vpop.f32.mrf.mxu0 }
 0x20f   :  { %v6693_v44 = vpop.eup %6692  ;;  %5133 = vst [vmem:[%s9807_s5 + $0x3c0] sm:$0xff] %v6691_v35  ;;  %6718 = vpow2.f32 %v5678_v48  ;;  %v5685_v21 = vmul.f32 -1.442695, %v2546_v5  ;;  %v2548_v57 = vadd.f32 %v2547_v51, %v2355_v61  ;;  %v2357_v62 = vadd.f32 %v2356_v45, %v8594_v56  ;;  %v2549_v52 = vpop.f32.mrf.mxu1  ;;  %v9908_v45 = vld [vmem:[#allocation4_spill] sm:$0xff] }
 0x210   :  { %v6695_v1 = vpop.eup %6694  ;;  %6720 = vrcp.f32 %v4488_v46  ;;  %v4494_v59 = vadd.f32 1.0, %v6693_v44  ;;  %v2358_v41 = vpop.f32.mrf.mxu0 }
 0x211   :  { %v6697_v7 = vpop.eup %6696  ;;  %5139 = vst [vmem:[%s9807_s5 + $0x3f0] sm:$0xff] %v6695_v1  ;;  %6722 = vpow2.f32 %v5679_v38  ;;  %v5686_v53 = vmul.f32 -1.442695, %v2548_v57  ;;  %v2550_v50 = vadd.f32 %v2549_v52, %v2357_v62  ;;  %v2359_v30 = vadd.f32 %v2358_v41, %v8598_v8  ;;  %v2551_v48 = vpop.f32.mrf.mxu1  ;;  %v9909_v62 = vld [vmem:[#allocation5_spill] sm:$0xff] }
 0x212   :  { %v6699_v0 = vpop.eup %6698  ;;  %6724 = vrcp.f32 %v4494_v59  ;;  %v4495_v40 = vadd.f32 1.0, %v6697_v7  ;;  %v2362_v5 = vpop.f32.mrf.mxu0  ;;  %3053 = vmatmul.mubr.bf16.gmra.mxu0 %v8146_v20 }
 0x213   :  { %v6701_v61 = vpop.eup %6700  ;;  %5140 = vst [vmem:[%s9807_s5 + $0x3f8] sm:$0xff] %v6699_v0  ;;  %6726 = vpow2.f32 %v5685_v21  ;;  %v5692_v51 = vmul.f32 -1.442695, %v2550_v50  ;;  %v2552_v35 = vadd.f32 %v2551_v48, %v2359_v30  ;;  %v2363_v38 = vadd.f32 %v2362_v5, %v8594_v56  ;;  %v2555_v46 = vpop.f32.mrf.mxu1  ;;  %3246 = vmatmul.mubr.bf16.gmra.mxu1 %v8156_v32  ;;  %3062 = vmatprep.mubr.bf16.mxu0 %v9908_v45 }
 0x214   :  { %v6703_v44 = vpop.eup %6702  ;;  %6728 = vrcp.f32 %v4495_v40  ;;  %v4501_v57 = vadd.f32 1.0, %v6701_v61  ;;  %3255 = vmatprep.mubr.bf16.mxu1 %v9909_v62  ;;  %v2364_v52 = vpop.f32.mrf.mxu0 }
 0x215   :  { %v6705_v1 = vpop.eup %6704  ;;  %5146 = vst [vmem:[%s9807_s5 + $0x428] sm:$0xff] %v6703_v44  ;;  %6730 = vpow2.f32 %v5686_v53  ;;  %v5693_v21 = vmul.f32 -1.442695, %v2552_v35  ;;  %v2556_v59 = vadd.f32 %v2555_v46, %v2363_v38  ;;  %v2365_v41 = vadd.f32 %v2364_v52, %v8598_v8  ;;  %v2557_v7 = vpop.f32.mrf.mxu1 }
 0x216   :  { %v6707_v50 = vpop.eup %6706  ;;  %6732 = vrcp.f32 %v4501_v57  ;;  %v4502_v30 = vadd.f32 1.0, %v6705_v1  ;;  %v2366_v48 = vpop.f32.mrf.mxu0 }
 0x217   :  { %v6709_v0 = vpop.eup %6708  ;;  %5147 = vst [vmem:[%s9807_s5 + $0x430] sm:$0xff] %v6707_v50  ;;  %6734 = vpow2.f32 %v5692_v51  ;;  %v5699_v40 = vmul.f32 -1.442695, %v2556_v59  ;;  %v2558_v5 = vadd.f32 %v2557_v7, %v2365_v41  ;;  %v2367_v61 = vadd.f32 %v2366_v48, %v8594_v56  ;;  %v2559_v53 = vpop.f32.mrf.mxu1  ;;  %v9910_v41 = vld [vmem:[#allocation6_spill] sm:$0xff] }
 0x218   :  { %v6711_v35 = vpop.eup %6710  ;;  %5153 = vst [vmem:[%s9807_s5 + $0x460] sm:$0xff] %v6709_v0  ;;  %6736 = vrcp.f32 %v4502_v30  ;;  %v2368_v38 = vpop.f32.mrf.mxu0 }
 0x219   :  { %v6713_v46 = vpop.eup %6712  ;;  %v4508_v44 = vadd.f32 1.0, %v6711_v35  ;;  %6738 = vpow2.f32 %v5693_v21  ;;  %v5700_v57 = vmul.f32 -1.442695, %v2558_v5  ;;  %v2560_v52 = vadd.f32 %v2559_v53, %v2367_v61  ;;  %v2561_v1 = vpop.f32.mrf.mxu1  ;;  %v9911_v5 = vld [vmem:[#allocation7_spill] sm:$0xff]  ;;  %v9912_v61 = vld [vmem:[#allocation8_spill] sm:$0xff]  ;;  %v9913_v35 = vld [vmem:[#allocation9_spill] sm:$0xff] }
 0x21a   :  { %v6715_v50 = vpop.eup %6714  ;;  %5154 = vst [vmem:[%s9807_s5 + $0x468] sm:$0xff] %v6713_v46  ;;  %6740 = vpow2.f32 %v5699_v40  ;;  %v2369_v51 = vadd.f32 %v2368_v38, %v8598_v8  ;;  %v2372_v59 = vpop.f32.mrf.mxu0  ;;  %3063 = vmatmul.mubr.bf16.gmra.mxu0 %v9910_v41 }
 0x21b   :  { %v6717_v7 = vpop.eup %6716  ;;  %6742 = vrcp.f32 %v4508_v44  ;;  %v4509_v30 = vadd.f32 1.0, %v6715_v50  ;;  %v5706_v48 = vmul.f32 -1.442695, %v2560_v52  ;;  %v2373_v21 = vadd.f32 %v2372_v59, %v8594_v56  ;;  %v2565_v0 = vpop.f32.mrf.mxu1  ;;  %3256 = vmatmul.mubr.bf16.gmra.mxu1 %v9911_v5  ;;  %3072 = vmatprep.mubr.bf16.mxu0 %v9912_v61 }
 0x21c   :  { %v6719_v53 = vpop.eup %6718  ;;  %5160 = vst [vmem:[%s9807_s5 + $0x498] sm:$0xff] %v6717_v7  ;;  %6744 = vpow2.f32 %v5700_v57  ;;  %v2562_v40 = vadd.f32 %v2561_v1, %v2369_v51  ;;  %3265 = vmatprep.mubr.bf16.mxu1 %v9913_v35  ;;  %v2374_v38 = vpop.f32.mrf.mxu0  ;;  %v7428_v57 = vld [vmem:[%s9806_s4] sm:$0x7f] }
 0x21d   :  { %v6721_v46 = vpop.eup %6720  ;;  %6746 = vrcp.f32 %v4509_v30  ;;  %v4515_v44 = vadd.f32 1.0, %v6719_v53  ;;  %v2566_v52 = vadd.f32 %v2565_v0, %v2373_v21  ;;  %v2375_v50 = vadd.f32 %v2374_v38, %v8598_v8  ;;  %v2567_v59 = vpop.f32.mrf.mxu1  ;;  %v9914_v1 = vld [vmem:[#allocation2_spill] sm:$0xff] }
 0x21e   :  { %v6723_v5 = vpop.eup %6722  ;;  %5161 = vst [vmem:[%s9807_s5 + $0x4a0] sm:$0xff] %v6721_v46  ;;  %6748 = vpow2.f32 %v5706_v48  ;;  %v5707_v61 = vmul.f32 -1.442695, %v2562_v40  ;;  %v2376_v7 = vpop.f32.mrf.mxu0  ;;  %v9915_v51 = vsub.s32 2, %v9914_v1 }
 0x21f   :  { %v6725_v21 = vpop.eup %6724  ;;  %6750 = vrcp.f32 %v4515_v44  ;;  %v4516_v0 = vadd.f32 1.0, %v6723_v5  ;;  %v5713_v53 = vmul.f32 -1.442695, %v2566_v52  ;;  %v2568_v38 = vadd.f32 %v2567_v59, %v2375_v50  ;;  %v2569_v35 = vpop.f32.mrf.mxu1  ;;  %v9916_v59 = vld [vmem:[#allocation10_spill] sm:$0xff] }
 0x220   :  { %v8953_v30 = vrot.slane %v7428_v57, %v9915_v51  ;;  %v6727_v41 = vpop.eup %6726  ;;  %5167 = vst [vmem:[%s9807_s5 + $0x4d0] sm:$0xff] %v6725_v21  ;;  %6752 = vpow2.f32 %v5707_v61  ;;  %v2377_v48 = vadd.f32 %v2376_v7, %v8594_v56  ;;  %v2378_v40 = vpop.f32.mrf.mxu0  ;;  %v9917_v56 = vsub.s32 3, %v9914_v1 }
 0x221   :  { %v6729_v46 = vpop.eup %6728  ;;  %6754 = vrcp.f32 %v4516_v0  ;;  %v4522_v62 = vadd.f32 1.0, %v6727_v41  ;;  %v5714_v51 = vmul.f32 -1.442695, %v2568_v38  ;;  %v2379_v45 = vadd.f32 %v2378_v40, %v8598_v8  ;;  %v2571_v44 = vpop.f32.mrf.mxu1  ;;  %v9918_v38 = vld [vmem:[#allocation11_spill] sm:$0xff]  ;;  %v9919_v40 = vld [vmem:[#allocation12_spill] sm:$0xff] }
 0x222   :  { %v6731_v5 = vpop.eup %6730  ;;  %5168 = vst [vmem:[%s9807_s5 + $0x4d8] sm:$0xff] %v6729_v46  ;;  %6756 = vpow2.f32 %v5713_v53  ;;  %v2570_v52 = vadd.f32 %v2569_v35, %v2377_v48  ;;  %v2608_v50 = vpop.f32.mrf.mxu0  ;;  %3073 = vmatmul.mubr.bf16.gmra.mxu0 %v9916_v59  ;;  %v8966_v61 = vrot.slane %v7428_v57, %v9917_v56  ;;  %v9920_v57 = vld [vmem:[#allocation13_spill] sm:$0xff]  ;;  %v9921_v59 = vld [vmem:[#allocation14_spill] sm:$0xff] }
 0x223   :  { %v6733_v7 = vpop.eup %6732  ;;  %6758 = vrcp.f32 %v4522_v62  ;;  %v4523_v41 = vadd.f32 1.0, %v6731_v5  ;;  %v2572_v21 = vadd.f32 %v2571_v44, %v2379_v45  ;;  %v2609_v8 = vadd.f32 %v2608_v50, %v8953_v30  ;;  %v2801_v0 = vpop.f32.mrf.mxu1  ;;  %3266 = vmatmul.mubr.bf16.gmra.mxu1 %v9918_v38  ;;  %3082 = vmatprep.mubr.bf16.mxu0 %v9919_v40 }
 0x224   :  { %v6735_v53 = vpop.eup %6734  ;;  %5174 = vst [vmem:[%s9807_s5 + $0x508] sm:$0xff] %v6733_v7  ;;  %6760 = vpow2.f32 %v5714_v51  ;;  %v5720_v35 = vmul.f32 -1.442695, %v2570_v52  ;;  %3275 = vmatprep.mubr.bf16.mxu1 %v9920_v57  ;;  %v2610_v48 = vpop.f32.mrf.mxu0 }
 0x225   :  { %v6737_v62 = vpop.eup %6736  ;;  %6762 = vrcp.f32 %v4523_v41  ;;  %v4529_v45 = vadd.f32 1.0, %v6735_v53  ;;  %v5721_v46 = vmul.f32 -1.442695, %v2572_v21  ;;  %v2802_v44 = vadd.f32 %v2801_v0, %v2609_v8  ;;  %v2803_v5 = vpop.f32.mrf.mxu1 }
 0x226   :  { %v6739_v50 = vpop.eup %6738  ;;  %5175 = vst [vmem:[%s9807_s5 + $0x510] sm:$0xff] %v6737_v62  ;;  %6764 = vpow2.f32 %v5720_v35  ;;  %v2611_v56 = vadd.f32 %v2610_v48, %v8966_v61  ;;  %v2612_v7 = vpop.f32.mrf.mxu0 }
 0x227   :  { %v6741_v51 = vpop.eup %6740  ;;  %6766 = vrcp.f32 %v4529_v45  ;;  %v4530_v52 = vadd.f32 1.0, %v6739_v50  ;;  %v5505_v57 = vmul.f32 -1.442695, %v2802_v44  ;;  %v2613_v40 = vadd.f32 %v2612_v7, %v8953_v30  ;;  %v2805_v41 = vpop.f32.mrf.mxu1 }
 0x228   :  { %v6743_v53 = vpop.eup %6742  ;;  %v4536_v21 = vadd.f32 1.0, %v6741_v51  ;;  %6768 = vpow2.f32 %v5721_v46  ;;  %v2804_v8 = vadd.f32 %v2803_v5, %v2611_v56  ;;  %v2614_v0 = vpop.f32.mrf.mxu0 }
 0x229   :  { %v6745_v38 = vpop.eup %6744  ;;  %5181 = vst [vmem:[%s9807_s5 + $0x540] sm:$0xff] %v6743_v53  ;;  %6770 = vrcp.f32 %v4530_v52  ;;  %v2806_v35 = vadd.f32 %v2805_v41, %v2613_v40  ;;  %v2615_v48 = vadd.f32 %v2614_v0, %v8966_v61  ;;  %v2807_v62 = vpop.f32.mrf.mxu1  ;;  %v9922_v52 = vld [vmem:[#allocation15_spill] sm:$0xff]  ;;  %v9923_v41 = vld [vmem:[#allocation16_spill] sm:$0xff] }
 0x22a   :  { %v6747_v45 = vpop.eup %6746  ;;  %6772 = vrcp.f32 %v4536_v21  ;;  %v4537_v44 = vadd.f32 1.0, %v6745_v38  ;;  %v5506_v50 = vmul.f32 -1.442695, %v2804_v8  ;;  %v2618_v7 = vpop.f32.mrf.mxu0  ;;  %3083 = vmatmul.mubr.bf16.gmra.mxu0 %v9921_v59  ;;  %v9924_v21 = vld [vmem:[#allocation17_spill] sm:$0xff] }
 0x22b   :  { %v6749_v46 = vpop.eup %6748  ;;  %5182 = vst [vmem:[%s9807_s5 + $0x548] sm:$0xff] %v6747_v45  ;;  %6774 = vpow2.f32 %v5505_v57  ;;  %v5512_v5 = vmul.f32 -1.442695, %v2806_v35  ;;  %v2808_v56 = vadd.f32 %v2807_v62, %v2615_v48  ;;  %v2619_v40 = vadd.f32 %v2618_v7, %v8953_v30  ;;  %v2811_v51 = vpop.f32.mrf.mxu1  ;;  %3276 = vmatmul.mubr.bf16.gmra.mxu1 %v9922_v52  ;;  %3092 = vmatprep.mubr.bf16.mxu0 %v9923_v41 }
 0x22c   :  { %v6751_v38 = vpop.eup %6750  ;;  %6776 = vrcp.f32 %v4537_v44  ;;  %v4543_v53 = vadd.f32 1.0, %v6749_v46  ;;  %3285 = vmatprep.mubr.bf16.mxu1 %v9924_v21  ;;  %v2620_v8 = vpop.f32.mrf.mxu0 }
 0x22d   :  { %v6753_v0 = vpop.eup %6752  ;;  %5188 = vst [vmem:[%s9807_s5 + $0x578] sm:$0xff] %v6751_v38  ;;  %6778 = vpow2.f32 %v5506_v50  ;;  %v5513_v57 = vmul.f32 -1.442695, %v2808_v56  ;;  %v2812_v35 = vadd.f32 %v2811_v51, %v2619_v40  ;;  %v2621_v48 = vadd.f32 %v2620_v8, %v8966_v61  ;;  %v2813_v62 = vpop.f32.mrf.mxu1 }
 0x22e   :  { %v6755_v45 = vpop.eup %6754  ;;  %6780 = vrcp.f32 %v4543_v53  ;;  %v4544_v7 = vadd.f32 1.0, %v6753_v0  ;;  %v2622_v41 = vpop.f32.mrf.mxu0 }
 0x22f   :  { %v6757_v44 = vpop.eup %6756  ;;  %5189 = vst [vmem:[%s9807_s5 + $0x580] sm:$0xff] %v6755_v45  ;;  %6782 = vpow2.f32 %v5512_v5  ;;  %v5519_v46 = vmul.f32 -1.442695, %v2812_v35  ;;  %v2814_v21 = vadd.f32 %v2813_v62, %v2621_v48  ;;  %v2623_v38 = vadd.f32 %v2622_v41, %v8953_v30  ;;  %v2815_v50 = vpop.f32.mrf.mxu1  ;;  %v9925_v62 = vld [vmem:[#allocation18_spill] sm:$0xff] }
 0x230   :  { %v6759_v56 = vpop.eup %6758  ;;  %6784 = vrcp.f32 %v4544_v7  ;;  %v4550_v40 = vadd.f32 1.0, %v6757_v44  ;;  %v2624_v51 = vpop.f32.mrf.mxu0 }
 0x231   :  { %v6761_v8 = vpop.eup %6760  ;;  %5195 = vst [vmem:[%s9807_s5 + $0x5b0] sm:$0xff] %v6759_v56  ;;  %6786 = vpow2.f32 %v5513_v57  ;;  %v5520_v53 = vmul.f32 -1.442695, %v2814_v21  ;;  %v2816_v0 = vadd.f32 %v2815_v50, %v2623_v38  ;;  %v2625_v45 = vadd.f32 %v2624_v51, %v8966_v61  ;;  %v2817_v5 = vpop.f32.mrf.mxu1  ;;  %v9926_v38 = vld [vmem:[#allocation19_spill] sm:$0xff]  ;;  %v9927_v50 = vld [vmem:[#allocation20_spill] sm:$0xff] }
 0x232   :  { %v6763_v35 = vpop.eup %6762  ;;  %6788 = vrcp.f32 %v4550_v40  ;;  %v4551_v48 = vadd.f32 1.0, %v6761_v8  ;;  %v2628_v41 = vpop.f32.mrf.mxu0  ;;  %3093 = vmatmul.mubr.bf16.gmra.mxu0 %v9925_v62  ;;  %v9928_v8 = vld [vmem:[#allocation21_spill] sm:$0xff] }
 0x233   :  { %v6765_v7 = vpop.eup %6764  ;;  %5196 = vst [vmem:[%s9807_s5 + $0x5b8] sm:$0xff] %v6763_v35  ;;  %6790 = vpow2.f32 %v5519_v46  ;;  %v5526_v44 = vmul.f32 -1.442695, %v2816_v0  ;;  %v2818_v56 = vadd.f32 %v2817_v5, %v2625_v45  ;;  %v2629_v21 = vadd.f32 %v2628_v41, %v8953_v30  ;;  %v2821_v57 = vpop.f32.mrf.mxu1  ;;  %3286 = vmatmul.mubr.bf16.gmra.mxu1 %v9926_v38  ;;  %3102 = vmatprep.mubr.bf16.mxu0 %v9927_v50 }
 0x234   :  { %v6767_v40 = vpop.eup %6766  ;;  %6792 = vrcp.f32 %v4551_v48  ;;  %v4557_v51 = vadd.f32 1.0, %v6765_v7  ;;  %3295 = vmatprep.mubr.bf16.mxu1 %v9928_v8  ;;  %v2630_v62 = vpop.f32.mrf.mxu0 }
 0x235   :  { %v6769_v52 = vpop.eup %6768  ;;  %5202 = vst [vmem:[%s9807_s5 + $0x5e8] sm:$0xff] %v6767_v40  ;;  %6794 = vpow2.f32 %v5520_v53  ;;  %v5527_v46 = vmul.f32 -1.442695, %v2818_v56  ;;  %v2822_v0 = vadd.f32 %v2821_v57, %v2629_v21  ;;  %v2631_v45 = vadd.f32 %v2630_v62, %v8966_v61  ;;  %v2823_v5 = vpop.f32.mrf.mxu1 }
 0x236   :  { %v6771_v35 = vpop.eup %6770  ;;  %6796 = vrcp.f32 %v4557_v51  ;;  %v4558_v41 = vadd.f32 1.0, %v6769_v52  ;;  %v2632_v50 = vpop.f32.mrf.mxu0 }
 0x237   :  { %v6773_v48 = vpop.eup %6772  ;;  %5203 = vst [vmem:[%s9807_s5 + $0x5f0] sm:$0xff] %v6771_v35  ;;  %6798 = vpow2.f32 %v5526_v44  ;;  %v5533_v7 = vmul.f32 -1.442695, %v2822_v0  ;;  %v2824_v8 = vadd.f32 %v2823_v5, %v2631_v45  ;;  %v2633_v40 = vadd.f32 %v2632_v50, %v8953_v30  ;;  %v2825_v53 = vpop.f32.mrf.mxu1  ;;  %v9929_v0 = vld [vmem:[#allocation22_spill] sm:$0xff] }
 0x238   :  { %v6775_v56 = vpop.eup %6774  ;;  %5209 = vst [vmem:[%s9807_s5 + $0x620] sm:$0xff] %v6773_v48  ;;  %6800 = vrcp.f32 %v4558_v41  ;;  %v2634_v62 = vpop.f32.mrf.mxu0  ;;  %v9930_v48 = vld [vmem:[#allocation23_spill] sm:$0xff] }
 0x239   :  { %v6777_v52 = vpop.eup %6776  ;;  %v4342_v21 = vadd.f32 1.0, %v6775_v56  ;;  %6802 = vpow2.f32 %v5527_v46  ;;  %v5534_v57 = vmul.f32 -1.442695, %v2824_v8  ;;  %v2826_v51 = vadd.f32 %v2825_v53, %v2633_v40  ;;  %v2827_v38 = vpop.f32.mrf.mxu1  ;;  %v9931_v40 = vld [vmem:[#allocation24_spill] sm:$0xff]  ;;  %v9932_v56 = vld [vmem:[#allocation25_spill] sm:$0xff] }
 0x23a   :  { %v6779_v35 = vpop.eup %6778  ;;  %5210 = vst [vmem:[%s9807_s5 + $0x628] sm:$0xff] %v6777_v52  ;;  %6804 = vpow2.f32 %v5533_v7  ;;  %v2635_v44 = vadd.f32 %v2634_v62, %v8966_v61  ;;  %v2638_v50 = vpop.f32.mrf.mxu0  ;;  %3103 = vmatmul.mubr.bf16.gmra.mxu0 %v9929_v0 }
 0x23b   :  { %v6781_v45 = vpop.eup %6780  ;;  %6806 = vrcp.f32 %v4342_v21  ;;  %v4343_v5 = vadd.f32 1.0, %v6779_v35  ;;  %v5540_v41 = vmul.f32 -1.442695, %v2826_v51  ;;  %v2639_v46 = vadd.f32 %v2638_v50, %v8953_v30  ;;  %v2831_v8 = vpop.f32.mrf.mxu1  ;;  %3296 = vmatmul.mubr.bf16.gmra.mxu1 %v9930_v48  ;;  %3112 = vmatprep.mubr.bf16.mxu0 %v9931_v40 }
 0x23c   :  { %v6783_v53 = vpop.eup %6782  ;;  %5216 = vst [vmem:[%s9807_s5 + $0x658] sm:$0xff] %v6781_v45  ;;  %6808 = vpow2.f32 %v5534_v57  ;;  %v2828_v7 = vadd.f32 %v2827_v38, %v2635_v44  ;;  %3305 = vmatprep.mubr.bf16.mxu1 %v9932_v56  ;;  %v2640_v62 = vpop.f32.mrf.mxu0 }
 0x23d   :  { %v6785_v52 = vpop.eup %6784  ;;  %6810 = vrcp.f32 %v4343_v5  ;;  %v4349_v21 = vadd.f32 1.0, %v6783_v53  ;;  %v2832_v51 = vadd.f32 %v2831_v8, %v2639_v46  ;;  %v2641_v35 = vadd.f32 %v2640_v62, %v8966_v61  ;;  %v2833_v50 = vpop.f32.mrf.mxu1 }
 0x23e   :  { %v6787_v48 = vpop.eup %6786  ;;  %5217 = vst [vmem:[%s9807_s5 + $0x660] sm:$0xff] %v6785_v52  ;;  %6812 = vpow2.f32 %v5540_v41  ;;  %v5541_v40 = vmul.f32 -1.442695, %v2828_v7  ;;  %v2642_v45 = vpop.f32.mrf.mxu0 }
 0x23f   :  { %v6789_v57 = vpop.eup %6788  ;;  %6814 = vrcp.f32 %v4349_v21  ;;  %v4350_v38 = vadd.f32 1.0, %v6787_v48  ;;  %v5547_v44 = vmul.f32 -1.442695, %v2832_v51  ;;  %v2834_v56 = vadd.f32 %v2833_v50, %v2641_v35  ;;  %v2835_v0 = vpop.f32.mrf.mxu1 }
 0x240   :  { %v6791_v5 = vpop.eup %6790  ;;  %5223 = vst [vmem:[%s9807_s5 + $0x690] sm:$0xff] %v6789_v57  ;;  %6816 = vpow2.f32 %v5541_v40  ;;  %v2643_v46 = vadd.f32 %v2642_v45, %v8953_v30  ;;  %v2644_v8 = vpop.f32.mrf.mxu0 }
 0x241   :  { %v6793_v53 = vpop.eup %6792  ;;  %6818 = vrcp.f32 %v4350_v38  ;;  %v4356_v41 = vadd.f32 1.0, %v6791_v5  ;;  %v5548_v7 = vmul.f32 -1.442695, %v2834_v56  ;;  %v2645_v62 = vadd.f32 %v2644_v8, %v8966_v61  ;;  %v2837_v52 = vpop.f32.mrf.mxu1 }
 0x242   :  { %v6795_v48 = vpop.eup %6794  ;;  %5224 = vst [vmem:[%s9807_s5 + $0x698] sm:$0xff] %v6793_v53  ;;  %6820 = vpow2.f32 %v5547_v44  ;;  %v2836_v21 = vadd.f32 %v2835_v0, %v2643_v46  ;;  %v2648_v51 = vpop.f32.mrf.mxu0  ;;  %3113 = vmatmul.mubr.bf16.gmra.mxu0 %v9906_v3 }
 0x243   :  { %v6797_v40 = vpop.eup %6796  ;;  %6822 = vrcp.f32 %v4356_v41  ;;  %v4357_v35 = vadd.f32 1.0, %v6795_v48  ;;  %v2838_v50 = vadd.f32 %v2837_v52, %v2645_v62  ;;  %v2649_v45 = vadd.f32 %v2648_v51, %v8953_v30  ;;  %v2841_v56 = vpop.f32.mrf.mxu1  ;;  %3306 = vmatmul.mubr.bf16.gmra.mxu1 %v9907_v42  ;;  %3122 = vmatprep.mubr.bf16.mxu0 %v8327_v36 }
 0x244   :  { %v6799_v57 = vpop.eup %6798  ;;  %5230 = vst [vmem:[%s9807_s5 + $0x6c8] sm:$0xff] %v6797_v40  ;;  %6824 = vpow2.f32 %v5548_v7  ;;  %v5554_v0 = vmul.f32 -1.442695, %v2836_v21  ;;  %3315 = vmatprep.mubr.bf16.mxu1 %v8329_v37  ;;  %v2650_v38 = vpop.f32.mrf.mxu0 }
 0x245   :  { %v6801_v44 = vpop.eup %6800  ;;  %6826 = vrcp.f32 %v4357_v35  ;;  %v4363_v5 = vadd.f32 1.0, %v6799_v57  ;;  %v5555_v46 = vmul.f32 -1.442695, %v2838_v50  ;;  %v2842_v8 = vadd.f32 %v2841_v56, %v2649_v45  ;;  %v2843_v53 = vpop.f32.mrf.mxu1 }
 0x246   :  { %v6803_v41 = vpop.eup %6802  ;;  %5231 = vst [vmem:[%s9807_s5 + $0x6d0] sm:$0xff] %v6801_v44  ;;  %6828 = vpow2.f32 %v5554_v0  ;;  %v2651_v62 = vadd.f32 %v2650_v38, %v8966_v61  ;;  %v2652_v52 = vpop.f32.mrf.mxu0 }
 0x247   :  { %v6805_v7 = vpop.eup %6804  ;;  %6830 = vrcp.f32 %v4363_v5  ;;  %v4364_v48 = vadd.f32 1.0, %v6803_v41  ;;  %v5561_v21 = vmul.f32 -1.442695, %v2842_v8  ;;  %v2653_v51 = vadd.f32 %v2652_v52, %v8953_v30  ;;  %v2845_v40 = vpop.f32.mrf.mxu1 }
 0x248   :  { %v6807_v35 = vpop.eup %6806  ;;  %v4370_v50 = vadd.f32 1.0, %v6805_v7  ;;  %6832 = vpow2.f32 %v5555_v46  ;;  %v2844_v45 = vadd.f32 %v2843_v53, %v2651_v62  ;;  %v2654_v56 = vpop.f32.mrf.mxu0 }
 0x249   :  { %v6809_v57 = vpop.eup %6808  ;;  %5014 = vst [vmem:[%s9807_s5 + $0x10] sm:$0xff] %v6807_v35  ;;  %6834 = vrcp.f32 %v4364_v48  ;;  %v2846_v0 = vadd.f32 %v2845_v40, %v2653_v51  ;;  %v2655_v38 = vadd.f32 %v2654_v56, %v8966_v61  ;;  %v2847_v44 = vpop.f32.mrf.mxu1 }
 0x24a   :  { %v6811_v5 = vpop.eup %6810  ;;  %6836 = vrcp.f32 %v4370_v50  ;;  %v4371_v8 = vadd.f32 1.0, %v6809_v57  ;;  %v5562_v41 = vmul.f32 -1.442695, %v2844_v45  ;;  %v2658_v52 = vpop.f32.mrf.mxu0  ;;  %3123 = vmatmul.mubr.bf16.gmra.mxu0 %v8331_v2 }
 0x24b   :  { %v6813_v46 = vpop.eup %6812  ;;  %5015 = vst [vmem:[%s9807_s5 + $0x18] sm:$0xff] %v6811_v5  ;;  %6838 = vpow2.f32 %v5561_v21  ;;  %v5568_v53 = vmul.f32 -1.442695, %v2846_v0  ;;  %v2848_v62 = vadd.f32 %v2847_v44, %v2655_v38  ;;  %v2659_v7 = vadd.f32 %v2658_v52, %v8953_v30  ;;  %v2851_v48 = vpop.f32.mrf.mxu1  ;;  %3316 = vmatmul.mubr.bf16.gmra.mxu1 %v8334_v11  ;;  %3132 = vmatprep.mubr.bf16.mxu0 %v8339_v55 }
 0x24c   :  { %v6815_v51 = vpop.eup %6814  ;;  %6840 = vrcp.f32 %v4371_v8  ;;  %v4377_v40 = vadd.f32 1.0, %v6813_v46  ;;  %3325 = vmatprep.mubr.bf16.mxu1 %v8341_v47  ;;  %v2660_v35 = vpop.f32.mrf.mxu0 }
 0x24d   :  { %v6817_v50 = vpop.eup %6816  ;;  %5022 = vst [vmem:[%s9807_s5 + $0x48] sm:$0xff] %v6815_v51  ;;  %6842 = vpow2.f32 %v5562_v41  ;;  %v5569_v21 = vmul.f32 -1.442695, %v2848_v62  ;;  %v2852_v45 = vadd.f32 %v2851_v48, %v2659_v7  ;;  %v2661_v56 = vadd.f32 %v2660_v35, %v8966_v61  ;;  %v2853_v57 = vpop.f32.mrf.mxu1 }
 0x24e   :  { %v6819_v0 = vpop.eup %6818  ;;  %6844 = vrcp.f32 %v4377_v40  ;;  %v4378_v38 = vadd.f32 1.0, %v6817_v50  ;;  %v2662_v44 = vpop.f32.mrf.mxu0 }
 0x24f   :  { %v6821_v5 = vpop.eup %6820  ;;  %5023 = vst [vmem:[%s9807_s5 + $0x50] sm:$0xff] %v6819_v0  ;;  %6846 = vpow2.f32 %v5568_v53  ;;  %v5575_v8 = vmul.f32 -1.442695, %v2852_v45  ;;  %v2854_v52 = vadd.f32 %v2853_v57, %v2661_v56  ;;  %v2663_v46 = vadd.f32 %v2662_v44, %v8953_v30  ;;  %v2855_v41 = vpop.f32.mrf.mxu1 }
 0x250   :  { %v6823_v62 = vpop.eup %6822  ;;  %6848 = vrcp.f32 %v4378_v38  ;;  %v4384_v7 = vadd.f32 1.0, %v6821_v5  ;;  %v2664_v48 = vpop.f32.mrf.mxu0 }
 0x251   :  { %v6825_v51 = vpop.eup %6824  ;;  %5029 = vst [vmem:[%s9807_s5 + $0x80] sm:$0xff] %v6823_v62  ;;  %6850 = vpow2.f32 %v5569_v21  ;;  %v5576_v40 = vmul.f32 -1.442695, %v2854_v52  ;;  %v2856_v35 = vadd.f32 %v2855_v41, %v2663_v46  ;;  %v2665_v50 = vadd.f32 %v2664_v48, %v8966_v61  ;;  %v2857_v53 = vpop.f32.mrf.mxu1  ;;  %v9933_v41 = vld [vmem:[#allocation28_spill] sm:$0xff] }
 0x252   :  { %v6827_v45 = vpop.eup %6826  ;;  %6852 = vrcp.f32 %v4384_v7  ;;  %v4385_v56 = vadd.f32 1.0, %v6825_v51  ;;  %v2668_v57 = vpop.f32.mrf.mxu0  ;;  %3133 = vmatmul.mubr.bf16.gmra.mxu0 %v8343_v31 }
 0x253   :  { %v6829_v0 = vpop.eup %6828  ;;  %5030 = vst [vmem:[%s9807_s5 + $0x88] sm:$0xff] %v6827_v45  ;;  %6854 = vpow2.f32 %v5575_v8  ;;  %v5582_v38 = vmul.f32 -1.442695, %v2856_v35  ;;  %v2858_v44 = vadd.f32 %v2857_v53, %v2665_v50  ;;  %v2669_v21 = vadd.f32 %v2668_v57, %v8953_v30  ;;  %v2861_v5 = vpop.f32.mrf.mxu1  ;;  %3326 = vmatmul.mubr.bf16.gmra.mxu1 %v8346_v19  ;;  %3142 = vmatprep.mubr.bf16.mxu0 %v8351_v17 }
 0x254   :  { %v6831_v52 = vpop.eup %6830  ;;  %6856 = vrcp.f32 %v4385_v56  ;;  %v4391_v46 = vadd.f32 1.0, %v6829_v0  ;;  %3335 = vmatprep.mubr.bf16.mxu1 %v9933_v41  ;;  %v2670_v62 = vpop.f32.mrf.mxu0 }
 0x255   :  { %v6833_v7 = vpop.eup %6832  ;;  %5036 = vst [vmem:[%s9807_s5 + $0xb8] sm:$0xff] %v6831_v52  ;;  %6858 = vpow2.f32 %v5576_v40  ;;  %v5583_v8 = vmul.f32 -1.442695, %v2858_v44  ;;  %v2862_v48 = vadd.f32 %v2861_v5, %v2669_v21  ;;  %v2671_v51 = vadd.f32 %v2670_v62, %v8966_v61  ;;  %v2863_v35 = vpop.f32.mrf.mxu1 }
 0x256   :  { %v6835_v50 = vpop.eup %6834  ;;  %6860 = vrcp.f32 %v4391_v46  ;;  %v4392_v53 = vadd.f32 1.0, %v6833_v7  ;;  %v2672_v45 = vpop.f32.mrf.mxu0 }
 0x257   :  { %v6837_v56 = vpop.eup %6836  ;;  %5037 = vst [vmem:[%s9807_s5 + $0xc0] sm:$0xff] %v6835_v50  ;;  %6862 = vpow2.f32 %v5582_v38  ;;  %v5589_v57 = vmul.f32 -1.442695, %v2862_v48  ;;  %v2864_v0 = vadd.f32 %v2863_v35, %v2671_v51  ;;  %v2673_v52 = vadd.f32 %v2672_v45, %v8953_v30  ;;  %v2865_v40 = vpop.f32.mrf.mxu1 }
 0x258   :  { %v6839_v44 = vpop.eup %6838  ;;  %5043 = vst [vmem:[%s9807_s5 + $0xf0] sm:$0xff] %v6837_v56  ;;  %6864 = vrcp.f32 %v4392_v53  ;;  %v2674_v21 = vpop.f32.mrf.mxu0 }
 0x259   :  { %v6841_v5 = vpop.eup %6840  ;;  %v4398_v46 = vadd.f32 1.0, %v6839_v44  ;;  %6866 = vpow2.f32 %v5583_v8  ;;  %v5590_v62 = vmul.f32 -1.442695, %v2864_v0  ;;  %v2866_v7 = vadd.f32 %v2865_v40, %v2673_v52  ;;  %v2867_v41 = vpop.f32.mrf.mxu1 }
 0x25a   :  { %v6843_v50 = vpop.eup %6842  ;;  %5044 = vst [vmem:[%s9807_s5 + $0xf8] sm:$0xff] %v6841_v5  ;;  %6868 = vpow2.f32 %v5589_v57  ;;  %v2675_v38 = vadd.f32 %v2674_v21, %v8966_v61  ;;  %v2678_v48 = vpop.f32.mrf.mxu0  ;;  %3143 = vmatmul.mubr.bf16.gmra.mxu0 %v8355_v27 }
 0x25b   :  { %v6845_v51 = vpop.eup %6844  ;;  %6870 = vrcp.f32 %v4398_v46  ;;  %v4399_v35 = vadd.f32 1.0, %v6843_v50  ;;  %v5596_v53 = vmul.f32 -1.442695, %v2866_v7  ;;  %v2679_v8 = vadd.f32 %v2678_v48, %v8953_v30  ;;  %v2871_v45 = vpop.f32.mrf.mxu1  ;;  %3336 = vmatmul.mubr.bf16.gmra.mxu1 %v8358_v4  ;;  %3378 = vmatprep.mubr.bf16.mxu0 %v7875_v6 }
 0x25c   :  { %v6847_v56 = vpop.eup %6846  ;;  %5050 = vst [vmem:[%s9807_s5 + $0x128] sm:$0xff] %v6845_v51  ;;  %6872 = vpow2.f32 %v5590_v62  ;;  %v2868_v57 = vadd.f32 %v2867_v41, %v2675_v38  ;;  %3539 = vmatprep.mubr.bf16.mxu1 %v7880_v12  ;;  %v2680_v0 = vpop.f32.mrf.mxu0 }
 0x25d   :  { %v6849_v52 = vpop.eup %6848  ;;  %6874 = vrcp.f32 %v4399_v35  ;;  %v4405_v40 = vadd.f32 1.0, %v6847_v56  ;;  %v2872_v44 = vadd.f32 %v2871_v45, %v2679_v8  ;;  %v2681_v21 = vadd.f32 %v2680_v0, %v8966_v61  ;;  %v2873_v5 = vpop.f32.mrf.mxu1 }
 0x25e   :  { %v6851_v46 = vpop.eup %6850  ;;  %5051 = vst [vmem:[%s9807_s5 + $0x130] sm:$0xff] %v6849_v52  ;;  %6876 = vpow2.f32 %v5596_v53  ;;  %v5597_v6 = vmul.f32 -1.442695, %v2868_v57  ;;  %v2682_v7 = vpop.f32.mrf.mxu0 }
 0x25f   :  { %v6853_v62 = vpop.eup %6852  ;;  %6878 = vrcp.f32 %v4405_v40  ;;  %v4406_v41 = vadd.f32 1.0, %v6851_v46  ;;  %v5603_v12 = vmul.f32 -1.442695, %v2872_v44  ;;  %v2874_v50 = vadd.f32 %v2873_v5, %v2681_v21  ;;  %v2875_v38 = vpop.f32.mrf.mxu1 }
 0x260   :  { %v6855_v48 = vpop.eup %6854  ;;  %5057 = vst [vmem:[%s9807_s5 + $0x160] sm:$0xff] %v6853_v62  ;;  %6880 = vpow2.f32 %v5597_v6  ;;  %v2683_v51 = vadd.f32 %v2682_v7, %v8953_v30  ;;  %v2684_v35 = vpop.f32.mrf.mxu0 }
 0x261   :  { %v6857_v8 = vpop.eup %6856  ;;  %6882 = vrcp.f32 %v4406_v41  ;;  %v4412_v53 = vadd.f32 1.0, %v6855_v48  ;;  %v5604_v45 = vmul.f32 -1.442695, %v2874_v50  ;;  %v2685_v56 = vadd.f32 %v2684_v35, %v8966_v61  ;;  %v2877_v57 = vpop.f32.mrf.mxu1  ;;  %v9934_v41 = vld [vmem:[#allocation3_spill] sm:$0xff] }
 0x262   :  { %v6859_v0 = vpop.eup %6858  ;;  %5058 = vst [vmem:[%s9807_s5 + $0x168] sm:$0xff] %v6857_v8  ;;  %6884 = vpow2.f32 %v5603_v12  ;;  %v2876_v52 = vadd.f32 %v2875_v38, %v2683_v51  ;;  %v2688_v40 = vpop.f32.mrf.mxu0  ;;  %3379 = vmatmul.mubr.bf16.vlgmr.msra.gmra.mxu0 %v7882_v13 }
 0x263   :  { %v6861_v44 = vpop.eup %6860  ;;  %6886 = vrcp.f32 %v4412_v53  ;;  %v4413_v21 = vadd.f32 1.0, %v6859_v0  ;;  %v2878_v5 = vadd.f32 %v2877_v57, %v2685_v56  ;;  %v2689_v46 = vadd.f32 %v2688_v40, %v8953_v30  ;;  %v2881_v6 = vpop.f32.mrf.mxu1  ;;  %3540 = vmatmul.mubr.bf16.vlgmr.msra.gmra.mxu1 %v7892_v18  ;;  %3386 = vmatprep.mubr.bf16.mxu0 %v7919_v43 }
 0x264   :  { %v6863_v7 = vpop.eup %6862  ;;  %5064 = vst [vmem:[%s9807_s5 + $0x198] sm:$0xff] %v6861_v44  ;;  %6888 = vpow2.f32 %v5604_v45  ;;  %v5610_v62 = vmul.f32 -1.442695, %v2876_v52  ;;  %3547 = vmatprep.mubr.bf16.mxu1 %v9934_v41  ;;  %v2690_v13 = vpop.f32.mrf.mxu0 }
 0x265   :  { %v6865_v12 = vpop.eup %6864  ;;  %6890 = vrcp.f32 %v4413_v21  ;;  %v4419_v50 = vadd.f32 1.0, %v6863_v7  ;;  %v5611_v38 = vmul.f32 -1.442695, %v2878_v5  ;;  %v2882_v48 = vadd.f32 %v2881_v6, %v2689_v46  ;;  %v2883_v51 = vpop.f32.mrf.mxu1 }
 0x266   :  { %v6867_v35 = vpop.eup %6866  ;;  %5065 = vst [vmem:[%s9807_s5 + $0x1a0] sm:$0xff] %v6865_v12  ;;  %6892 = vpow2.f32 %v5610_v62  ;;  %v2691_v18 = vadd.f32 %v2690_v13, %v8966_v61  ;;  %v2692_v43 = vpop.f32.mrf.mxu0 }
 0x267   :  { %v6869_v8 = vpop.eup %6868  ;;  %6894 = vrcp.f32 %v4419_v50  ;;  %v4420_v53 = vadd.f32 1.0, %v6867_v35  ;;  %v5617_v45 = vmul.f32 -1.442695, %v2882_v48  ;;  %v2693_v56 = vadd.f32 %v2692_v43, %v8953_v30  ;;  %v2885_v57 = vpop.f32.mrf.mxu1 }
 0x268   :  { %v6871_v0 = vpop.eup %6870  ;;  %v4426_v52 = vadd.f32 1.0, %v6869_v8  ;;  %6896 = vpow2.f32 %v5611_v38  ;;  %v2884_v40 = vadd.f32 %v2883_v51, %v2691_v18  ;;  %v2694_v44 = vpop.f32.mrf.mxu0 }
 0x269   :  { %v6873_v21 = vpop.eup %6872  ;;  %5071 = vst [vmem:[%s9807_s5 + $0x1d0] sm:$0xff] %v6871_v0  ;;  %6898 = vrcp.f32 %v4420_v53  ;;  %v2886_v5 = vadd.f32 %v2885_v57, %v2693_v56  ;;  %v2695_v46 = vadd.f32 %v2694_v44, %v8966_v61  ;;  %v2887_v6 = vpop.f32.mrf.mxu1 }
 0x26a   :  { %v6875_v7 = vpop.eup %6874  ;;  %6900 = vrcp.f32 %v4426_v52  ;;  %v4427_v62 = vadd.f32 1.0, %v6873_v21  ;;  %v5618_v41 = vmul.f32 -1.442695, %v2884_v40  ;;  %v2698_v13 = vpop.f32.mrf.mxu0  ;;  %3387 = vmatmul.mubr.bf16.gmra.mxu0 %v7926_v49 }
 0x26b   :  { %v6877_v12 = vpop.eup %6876  ;;  %5072 = vst [vmem:[%s9807_s5 + $0x1d8] sm:$0xff] %v6875_v7  ;;  %6902 = vpow2.f32 %v5617_v45  ;;  %v5624_v50 = vmul.f32 -1.442695, %v2886_v5  ;;  %v2888_v38 = vadd.f32 %v2887_v6, %v2695_v46  ;;  %v2699_v48 = vadd.f32 %v2698_v13, %v8953_v30  ;;  %v2891_v51 = vpop.f32.mrf.mxu1  ;;  %3548 = vmatmul.mubr.bf16.gmra.mxu1 %v7936_v54  ;;  %3394 = vmatprep.mubr.bf16.mxu0 %v7963_v28 }
 0x26c   :  { %v6879_v35 = vpop.eup %6878  ;;  %6904 = vrcp.f32 %v4427_v62  ;;  %v4433_v18 = vadd.f32 1.0, %v6877_v12  ;;  %3555 = vmatprep.mubr.bf16.mxu1 %v7968_v33  ;;  %v2700_v49 = vpop.f32.mrf.mxu0 }
 0x26d   :  { %v6881_v43 = vpop.eup %6880  ;;  %5078 = vst [vmem:[%s9807_s5 + $0x208] sm:$0xff] %v6879_v35  ;;  %6906 = vpow2.f32 %v5618_v41  ;;  %v5625_v8 = vmul.f32 -1.442695, %v2888_v38  ;;  %v2892_v53 = vadd.f32 %v2891_v51, %v2699_v48  ;;  %v2701_v45 = vadd.f32 %v2700_v49, %v8966_v61  ;;  %v2893_v56 = vpop.f32.mrf.mxu1 }
 0x26e   :  { %v6883_v54 = vpop.eup %6882  ;;  %6908 = vrcp.f32 %v4433_v18  ;;  %v4434_v28 = vadd.f32 1.0, %v6881_v43  ;;  %v2702_v57 = vpop.f32.mrf.mxu0 }
 0x26f   :  { %v6885_v0 = vpop.eup %6884  ;;  %5079 = vst [vmem:[%s9807_s5 + $0x210] sm:$0xff] %v6883_v54  ;;  %6910 = vpow2.f32 %v5624_v50  ;;  %v5631_v33 = vmul.f32 -1.442695, %v2892_v53  ;;  %v2894_v52 = vadd.f32 %v2893_v56, %v2701_v45  ;;  %v2703_v40 = vadd.f32 %v2702_v57, %v8953_v30  ;;  %v2895_v44 = vpop.f32.mrf.mxu1 }
 0x270   :  { %v6887_v21 = vpop.eup %6886  ;;  %6912 = vrcp.f32 %v4434_v28  ;;  %v4440_v5 = vadd.f32 1.0, %v6885_v0  ;;  %v2704_v46 = vpop.f32.mrf.mxu0 }
 0x271   :  { %v6889_v6 = vpop.eup %6888  ;;  %5085 = vst [vmem:[%s9807_s5 + $0x240] sm:$0xff] %v6887_v21  ;;  %6914 = vpow2.f32 %v5625_v8  ;;  %v5632_v7 = vmul.f32 -1.442695, %v2894_v52  ;;  %v2896_v62 = vadd.f32 %v2895_v44, %v2703_v40  ;;  %v2705_v41 = vadd.f32 %v2704_v46, %v8966_v61  ;;  %v2897_v13 = vpop.f32.mrf.mxu1 }
 0x272   :  { %v6891_v12 = vpop.eup %6890  ;;  %6916 = vrcp.f32 %v4440_v5  ;;  %v4441_v50 = vadd.f32 1.0, %v6889_v6  ;;  %v2708_v38 = vpop.f32.mrf.mxu0  ;;  %3395 = vmatmul.mubr.bf16.gmra.mxu0 %v7970_v34 }
 0x273   :  { %v6893_v48 = vpop.eup %6892  ;;  %5086 = vst [vmem:[%s9807_s5 + $0x248] sm:$0xff] %v6891_v12  ;;  %6918 = vpow2.f32 %v5631_v33  ;;  %v5638_v51 = vmul.f32 -1.442695, %v2896_v62  ;;  %v2898_v35 = vadd.f32 %v2897_v13, %v2705_v41  ;;  %v2709_v18 = vadd.f32 %v2708_v38, %v8953_v30  ;;  %v2901_v49 = vpop.f32.mrf.mxu1  ;;  %3556 = vmatmul.mubr.bf16.gmra.mxu1 %v7980_v39  ;;  %3402 = vmatprep.mubr.bf16.mxu0 %v8007_v16 }
 0x274   :  { %v6895_v43 = vpop.eup %6894  ;;  %6920 = vrcp.f32 %v4441_v50  ;;  %v4447_v8 = vadd.f32 1.0, %v6893_v48  ;;  %3563 = vmatprep.mubr.bf16.mxu1 %v8012_v22  ;;  %v2710_v34 = vpop.f32.mrf.mxu0 }
 0x275   :  { %v6897_v53 = vpop.eup %6896  ;;  %5092 = vst [vmem:[%s9807_s5 + $0x278] sm:$0xff] %v6895_v43  ;;  %6922 = vpow2.f32 %v5632_v7  ;;  %v5639_v45 = vmul.f32 -1.442695, %v2898_v35  ;;  %v2902_v56 = vadd.f32 %v2901_v49, %v2709_v18  ;;  %v2711_v54 = vadd.f32 %v2710_v34, %v8966_v61  ;;  %v2903_v28 = vpop.f32.mrf.mxu1 }
 0x276   :  { %v6899_v39 = vpop.eup %6898  ;;  %6924 = vrcp.f32 %v4447_v8  ;;  %v4448_v16 = vadd.f32 1.0, %v6897_v53  ;;  %v2712_v57 = vpop.f32.mrf.mxu0 }
 0x277   :  { %v6901_v0 = vpop.eup %6900  ;;  %5093 = vst [vmem:[%s9807_s5 + $0x280] sm:$0xff] %v6899_v39  ;;  %6926 = vpow2.f32 %v5638_v51  ;;  %v5645_v22 = vmul.f32 -1.442695, %v2902_v56  ;;  %v2904_v33 = vadd.f32 %v2903_v28, %v2711_v54  ;;  %v2713_v52 = vadd.f32 %v2712_v57, %v8953_v30  ;;  %v2905_v40 = vpop.f32.mrf.mxu1 }
 0x278   :  { %v6903_v44 = vpop.eup %6902  ;;  %5099 = vst [vmem:[%s9807_s5 + $0x2b0] sm:$0xff] %v6901_v0  ;;  %6928 = vrcp.f32 %v4448_v16  ;;  %v2714_v21 = vpop.f32.mrf.mxu0 }
 0x279   :  { %v6905_v5 = vpop.eup %6904  ;;  %v4454_v46 = vadd.f32 1.0, %v6903_v44  ;;  %6930 = vpow2.f32 %v5639_v45  ;;  %v5646_v6 = vmul.f32 -1.442695, %v2904_v33  ;;  %v2906_v7 = vadd.f32 %v2905_v40, %v2713_v52  ;;  %v2907_v62 = vpop.f32.mrf.mxu1 }
 0x27a   :  { %v6907_v41 = vpop.eup %6906  ;;  %5100 = vst [vmem:[%s9807_s5 + $0x2b8] sm:$0xff] %v6905_v5  ;;  %6932 = vpow2.f32 %v5645_v22  ;;  %v2715_v13 = vadd.f32 %v2714_v21, %v8966_v61  ;;  %v2718_v12 = vpop.f32.mrf.mxu0  ;;  %3403 = vmatmul.mubr.bf16.gmra.mxu0 %v8014_v23 }
 0x27b   :  { %v6909_v50 = vpop.eup %6908  ;;  %6934 = vrcp.f32 %v4454_v46  ;;  %v4455_v38 = vadd.f32 1.0, %v6907_v41  ;;  %v5652_v48 = vmul.f32 -1.442695, %v2906_v7  ;;  %v2719_v51 = vadd.f32 %v2718_v12, %v8953_v30  ;;  %v2911_v35 = vpop.f32.mrf.mxu1  ;;  %3564 = vmatmul.mubr.bf16.gmra.mxu1 %v8024_v29  ;;  %3410 = vmatprep.mubr.bf16.mxu0 %v8051_v63 }
 0x27c   :  { %v6911_v18 = vpop.eup %6910  ;;  %5106 = vst [vmem:[%s9807_s5 + $0x2e8] sm:$0xff] %v6909_v50  ;;  %6936 = vpow2.f32 %v5646_v6  ;;  %v2908_v49 = vadd.f32 %v2907_v62, %v2715_v13  ;;  %3571 = vmatprep.mubr.bf16.mxu1 %v8056_v14  ;;  %v2720_v23 = vpop.f32.mrf.mxu0 }
 0x27d   :  { %v6913_v43 = vpop.eup %6912  ;;  %6938 = vrcp.f32 %v4455_v38  ;;  %v4461_v8 = vadd.f32 1.0, %v6911_v18  ;;  %v2912_v34 = vadd.f32 %v2911_v35, %v2719_v51  ;;  %v2721_v53 = vadd.f32 %v2720_v23, %v8966_v61  ;;  %v2913_v45 = vpop.f32.mrf.mxu1 }
 0x27e   :  { %v6915_v29 = vpop.eup %6914  ;;  %5107 = vst [vmem:[%s9807_s5 + $0x2f0] sm:$0xff] %v6913_v43  ;;  %6940 = vpow2.f32 %v5652_v48  ;;  %v5653_v63 = vmul.f32 -1.442695, %v2908_v49  ;;  %v2722_v56 = vpop.f32.mrf.mxu0 }
 0x27f   :  { %v6917_v54 = vpop.eup %6916  ;;  %6942 = vrcp.f32 %v4461_v8  ;;  %v4462_v28 = vadd.f32 1.0, %v6915_v29  ;;  %v5659_v14 = vmul.f32 -1.442695, %v2912_v34  ;;  %v2914_v39 = vadd.f32 %v2913_v45, %v2721_v53  ;;  %v2915_v16 = vpop.f32.mrf.mxu1 }
 0x280   :  { %v6919_v57 = vpop.eup %6918  ;;  %5113 = vst [vmem:[%s9807_s5 + $0x320] sm:$0xff] %v6917_v54  ;;  %6944 = vpow2.f32 %v5653_v63  ;;  %v2723_v0 = vadd.f32 %v2722_v56, %v8953_v30  ;;  %v2724_v22 = vpop.f32.mrf.mxu0 }
 0x281   :  { %v6921_v33 = vpop.eup %6920  ;;  %6946 = vrcp.f32 %v4462_v28  ;;  %v4468_v52 = vadd.f32 1.0, %v6919_v57  ;;  %v5660_v40 = vmul.f32 -1.442695, %v2914_v39  ;;  %v2725_v44 = vadd.f32 %v2724_v22, %v8966_v61  ;;  %v2917_v21 = vpop.f32.mrf.mxu1 }
 0x282   :  { %v6923_v5 = vpop.eup %6922  ;;  %5114 = vst [vmem:[%s9807_s5 + $0x328] sm:$0xff] %v6921_v33  ;;  %6948 = vpow2.f32 %v5659_v14  ;;  %v2916_v46 = vadd.f32 %v2915_v16, %v2723_v0  ;;  %v2728_v6 = vpop.f32.mrf.mxu0  ;;  %3411 = vmatmul.mubr.bf16.gmra.mxu0 %v8058_v15 }
 0x283   :  { %v6925_v7 = vpop.eup %6924  ;;  %6950 = vrcp.f32 %v4468_v52  ;;  %v4469_v62 = vadd.f32 1.0, %v6923_v5  ;;  %v2918_v41 = vadd.f32 %v2917_v21, %v2725_v44  ;;  %v2729_v13 = vadd.f32 %v2728_v6, %v8953_v30  ;;  %v2921_v12 = vpop.f32.mrf.mxu1  ;;  %3572 = vmatmul.mubr.bf16.gmra.mxu1 %v8068_v24  ;;  %3418 = vmatprep.mubr.bf16.mxu0 %v8095_v58 }
 0x284   :  { %v6927_v50 = vpop.eup %6926  ;;  %5120 = vst [vmem:[%s9807_s5 + $0x358] sm:$0xff] %v6925_v7  ;;  %6952 = vpow2.f32 %v5660_v40  ;;  %v5666_v38 = vmul.f32 -1.442695, %v2916_v46  ;;  %3579 = vmatprep.mubr.bf16.mxu1 %v8100_v9  ;;  %v2730_v15 = vpop.f32.mrf.mxu0 }
 0x285   :  { %v6929_v48 = vpop.eup %6928  ;;  %6954 = vrcp.f32 %v4469_v62  ;;  %v4475_v51 = vadd.f32 1.0, %v6927_v50  ;;  %v5667_v35 = vmul.f32 -1.442695, %v2918_v41  ;;  %v2922_v18 = vadd.f32 %v2921_v12, %v2729_v13  ;;  %v2923_v49 = vpop.f32.mrf.mxu1 }
 0x286   :  { %v6931_v23 = vpop.eup %6930  ;;  %5121 = vst [vmem:[%s9807_s5 + $0x360] sm:$0xff] %v6929_v48  ;;  %6956 = vpow2.f32 %v5666_v38  ;;  %v2731_v24 = vadd.f32 %v2730_v15, %v8966_v61  ;;  %v2732_v58 = vpop.f32.mrf.mxu0 }
 0x287   :  { %v6933_v43 = vpop.eup %6932  ;;  %6958 = vrcp.f32 %v4475_v51  ;;  %v4476_v8 = vadd.f32 1.0, %v6931_v23  ;;  %v5673_v9 = vmul.f32 -1.442695, %v2922_v18  ;;  %v2733_v34 = vadd.f32 %v2732_v58, %v8953_v30  ;;  %v2925_v53 = vpop.f32.mrf.mxu1 }
 0x288   :  { %v6935_v45 = vpop.eup %6934  ;;  %v4482_v29 = vadd.f32 1.0, %v6933_v43  ;;  %6960 = vpow2.f32 %v5667_v35  ;;  %v2924_v63 = vadd.f32 %v2923_v49, %v2731_v24  ;;  %v2734_v56 = vpop.f32.mrf.mxu0 }
 0x289   :  { %v6937_v54 = vpop.eup %6936  ;;  %5127 = vst [vmem:[%s9807_s5 + $0x390] sm:$0xff] %v6935_v45  ;;  %6962 = vrcp.f32 %v4476_v8  ;;  %v2926_v28 = vadd.f32 %v2925_v53, %v2733_v34  ;;  %v2735_v14 = vadd.f32 %v2734_v56, %v8966_v61  ;;  %v2927_v39 = vpop.f32.mrf.mxu1 }
 0x28a   :  { %v6939_v16 = vpop.eup %6938  ;;  %6964 = vrcp.f32 %v4482_v29  ;;  %v4483_v57 = vadd.f32 1.0, %v6937_v54  ;;  %v5674_v0 = vmul.f32 -1.442695, %v2924_v63  ;;  %v2738_v22 = vpop.f32.mrf.mxu0  ;;  %3419 = vmatmul.mubr.bf16.gmra.mxu0 %v8102_v10  ;;  %v9935_v54 = vld [vmem:[#allocation4_spill] sm:$0xff] }
 0x28b   :  { %v6941_v33 = vpop.eup %6940  ;;  %5128 = vst [vmem:[%s9807_s5 + $0x398] sm:$0xff] %v6939_v16  ;;  %6966 = vpow2.f32 %v5673_v9  ;;  %v5680_v52 = vmul.f32 -1.442695, %v2926_v28  ;;  %v2928_v40 = vadd.f32 %v2927_v39, %v2735_v14  ;;  %v2739_v44 = vadd.f32 %v2738_v22, %v8953_v30  ;;  %v2931_v21 = vpop.f32.mrf.mxu1  ;;  %3580 = vmatmul.mubr.bf16.gmra.mxu1 %v8112_v26  ;;  %3426 = vmatprep.mubr.bf16.mxu0 %v8139_v60  ;;  %v9936_v39 = vld [vmem:[#allocation5_spill] sm:$0xff] }
 0x28c   :  { %v6943_v5 = vpop.eup %6942  ;;  %6968 = vrcp.f32 %v4483_v57  ;;  %v4489_v46 = vadd.f32 1.0, %v6941_v33  ;;  %3587 = vmatprep.mubr.bf16.mxu1 %v8144_v25  ;;  %v2740_v10 = vpop.f32.mrf.mxu0 }
 0x28d   :  { %v6945_v6 = vpop.eup %6944  ;;  %5134 = vst [vmem:[%s9807_s5 + $0x3c8] sm:$0xff] %v6943_v5  ;;  %6970 = vpow2.f32 %v5674_v0  ;;  %v5681_v7 = vmul.f32 -1.442695, %v2928_v40  ;;  %v2932_v62 = vadd.f32 %v2931_v21, %v2739_v44  ;;  %v2741_v41 = vadd.f32 %v2740_v10, %v8966_v61  ;;  %v2933_v13 = vpop.f32.mrf.mxu1 }
 0x28e   :  { %v6947_v26 = vpop.eup %6946  ;;  %6972 = vrcp.f32 %v4489_v46  ;;  %v4490_v60 = vadd.f32 1.0, %v6945_v6  ;;  %v2742_v12 = vpop.f32.mrf.mxu0 }
 0x28f   :  { %v6949_v50 = vpop.eup %6948  ;;  %5135 = vst [vmem:[%s9807_s5 + $0x3d0] sm:$0xff] %v6947_v26  ;;  %6974 = vpow2.f32 %v5680_v52  ;;  %v5687_v25 = vmul.f32 -1.442695, %v2932_v62  ;;  %v2934_v38 = vadd.f32 %v2933_v13, %v2741_v41  ;;  %v2743_v15 = vadd.f32 %v2742_v12, %v8953_v30  ;;  %v2935_v48 = vpop.f32.mrf.mxu1 }
 0x290   :  { %v6951_v51 = vpop.eup %6950  ;;  %6976 = vrcp.f32 %v4490_v60  ;;  %v4496_v35 = vadd.f32 1.0, %v6949_v50  ;;  %v2744_v18 = vpop.f32.mrf.mxu0 }
 0x291   :  { %v6953_v49 = vpop.eup %6952  ;;  %5141 = vst [vmem:[%s9807_s5 + $0x400] sm:$0xff] %v6951_v51  ;;  %6978 = vpow2.f32 %v5681_v7  ;;  %v5688_v23 = vmul.f32 -1.442695, %v2934_v38  ;;  %v2936_v24 = vadd.f32 %v2935_v48, %v2743_v15  ;;  %v2745_v58 = vadd.f32 %v2744_v18, %v8966_v61  ;;  %v2937_v43 = vpop.f32.mrf.mxu1  ;;  %v9937_v38 = vld [vmem:[#allocation6_spill] sm:$0xff] }
 0x292   :  { %v6955_v8 = vpop.eup %6954  ;;  %6980 = vrcp.f32 %v4496_v35  ;;  %v4497_v9 = vadd.f32 1.0, %v6953_v49  ;;  %v2748_v34 = vpop.f32.mrf.mxu0  ;;  %3427 = vmatmul.mubr.bf16.gmra.mxu0 %v8146_v20  ;;  %v1019_v15 = vsub.s32 4, %v9914_v1 }
 0x293   :  { %v6957_v53 = vpop.eup %6956  ;;  %5142 = vst [vmem:[%s9807_s5 + $0x408] sm:$0xff] %v6955_v8  ;;  %6982 = vpow2.f32 %v5687_v25  ;;  %v5694_v45 = vmul.f32 -1.442695, %v2936_v24  ;;  %v2938_v29 = vadd.f32 %v2937_v43, %v2745_v58  ;;  %v2749_v63 = vadd.f32 %v2748_v34, %v8953_v30  ;;  %v2941_v56 = vpop.f32.mrf.mxu1  ;;  %3588 = vmatmul.mubr.bf16.gmra.mxu1 %v8156_v32  ;;  %3434 = vmatprep.mubr.bf16.mxu0 %v9935_v54  ;;  %v9939_v24 = vld [vmem:[#allocation8_spill] sm:$0xff]  ;;  %v9940_v8 = vld [vmem:[#allocation9_spill] sm:$0xff] }
 0x294   :  { %v6959_v28 = vpop.eup %6958  ;;  %6984 = vrcp.f32 %v4497_v9  ;;  %v4503_v14 = vadd.f32 1.0, %v6957_v53  ;;  %3595 = vmatprep.mubr.bf16.mxu1 %v9936_v39  ;;  %v2750_v20 = vpop.f32.mrf.mxu0 }
 0x295   :  { %v6961_v16 = vpop.eup %6960  ;;  %5148 = vst [vmem:[%s9807_s5 + $0x438] sm:$0xff] %v6959_v28  ;;  %6986 = vpow2.f32 %v5688_v23  ;;  %v5695_v57 = vmul.f32 -1.442695, %v2938_v29  ;;  %v2942_v0 = vadd.f32 %v2941_v56, %v2749_v63  ;;  %v2751_v22 = vadd.f32 %v2750_v20, %v8966_v61  ;;  %v2943_v33 = vpop.f32.mrf.mxu1  ;;  %v9938_v23 = vld [vmem:[#allocation7_spill] sm:$0xff] }
 0x296   :  { %v6963_v32 = vpop.eup %6962  ;;  %6988 = vrcp.f32 %v4503_v14  ;;  %v4504_v52 = vadd.f32 1.0, %v6961_v16  ;;  %v2752_v40 = vpop.f32.mrf.mxu0  ;;  %v7429_v14 = vld [vmem:[%s9806_s4] sm:$0x7f]  ;;  %v1023_v20 = vsub.s32 5, %v9914_v1 }
 0x297   :  { %v6965_v44 = vpop.eup %6964  ;;  %5149 = vst [vmem:[%s9807_s5 + $0x440] sm:$0xff] %v6963_v32  ;;  %6990 = vpow2.f32 %v5694_v45  ;;  %v5701_v21 = vmul.f32 -1.442695, %v2942_v0  ;;  %v2944_v5 = vadd.f32 %v2943_v33, %v2751_v22  ;;  %v2753_v46 = vadd.f32 %v2752_v40, %v8953_v30  ;;  %v2945_v10 = vpop.f32.mrf.mxu1 }
 0x298   :  { %v6967_v6 = vpop.eup %6966  ;;  %5155 = vst [vmem:[%s9807_s5 + $0x470] sm:$0xff] %v6965_v44  ;;  %6992 = vrcp.f32 %v4504_v52  ;;  %v2754_v7 = vpop.f32.mrf.mxu0  ;;  %v9283_v39 = vrot.slane %v7429_v14, %v1019_v15 }
 0x299   :  { %v6969_v62 = vpop.eup %6968  ;;  %v4510_v41 = vadd.f32 1.0, %v6967_v6  ;;  %6994 = vpow2.f32 %v5695_v57  ;;  %v5702_v13 = vmul.f32 -1.442695, %v2944_v5  ;;  %v2946_v26 = vadd.f32 %v2945_v10, %v2753_v46  ;;  %v2947_v60 = vpop.f32.mrf.mxu1 }
 0x29a   :  { %v6971_v12 = vpop.eup %6970  ;;  %5156 = vst [vmem:[%s9807_s5 + $0x478] sm:$0xff] %v6969_v62  ;;  %6996 = vpow2.f32 %v5701_v21  ;;  %v2755_v50 = vadd.f32 %v2754_v7, %v8966_v61  ;;  %v2758_v25 = vpop.f32.mrf.mxu0  ;;  %3435 = vmatmul.mubr.bf16.gmra.mxu0 %v9937_v38 }
 0x29b   :  { %v6973_v48 = vpop.eup %6972  ;;  %6998 = vrcp.f32 %v4510_v41  ;;  %v4511_v51 = vadd.f32 1.0, %v6971_v12  ;;  %v5708_v35 = vmul.f32 -1.442695, %v2946_v26  ;;  %v2759_v18 = vadd.f32 %v2758_v25, %v8953_v30  ;;  %v2951_v49 = vpop.f32.mrf.mxu1  ;;  %3596 = vmatmul.mubr.bf16.gmra.mxu1 %v9938_v23  ;;  %3442 = vmatprep.mubr.bf16.mxu0 %v9939_v24  ;;  %v9941_v41 = vld [vmem:[#allocation10_spill] sm:$0xff]  ;;  %v9943_v25 = vld [vmem:[#allocation12_spill] sm:$0xff] }
 0x29c   :  { %v6975_v58 = vpop.eup %6974  ;;  %5162 = vst [vmem:[%s9807_s5 + $0x4a8] sm:$0xff] %v6973_v48  ;;  %7000 = vpow2.f32 %v5702_v13  ;;  %v2948_v43 = vadd.f32 %v2947_v60, %v2755_v50  ;;  %3603 = vmatprep.mubr.bf16.mxu1 %v9940_v8  ;;  %v2760_v9 = vpop.f32.mrf.mxu0  ;;  %v9295_v13 = vrot.slane %v7429_v14, %v1023_v20  ;;  %v9942_v50 = vld [vmem:[#allocation11_spill] sm:$0xff]  ;;  %v9944_v48 = vld [vmem:[#allocation13_spill] sm:$0xff] }
 0x29d   :  { %v6977_v34 = vpop.eup %6976  ;;  %7002 = vrcp.f32 %v4511_v51  ;;  %v4517_v53 = vadd.f32 1.0, %v6975_v58  ;;  %v2952_v45 = vadd.f32 %v2951_v49, %v2759_v18  ;;  %v2761_v29 = vadd.f32 %v2760_v9, %v8966_v61  ;;  %v2953_v63 = vpop.f32.mrf.mxu1 }
 0x29e   :  { %v6979_v56 = vpop.eup %6978  ;;  %5163 = vst [vmem:[%s9807_s5 + $0x4b0] sm:$0xff] %v6977_v34  ;;  %7004 = vpow2.f32 %v5708_v35  ;;  %v5709_v54 = vmul.f32 -1.442695, %v2948_v43  ;;  %v2762_v28 = vpop.f32.mrf.mxu0 }
 0x29f   :  { %v6981_v16 = vpop.eup %6980  ;;  %7006 = vrcp.f32 %v4517_v53  ;;  %v4518_v57 = vadd.f32 1.0, %v6979_v56  ;;  %v5715_v0 = vmul.f32 -1.442695, %v2952_v45  ;;  %v2954_v22 = vadd.f32 %v2953_v63, %v2761_v29  ;;  %v2955_v33 = vpop.f32.mrf.mxu1 }
 0x2a0   :  { %v6983_v32 = vpop.eup %6982  ;;  %5169 = vst [vmem:[%s9807_s5 + $0x4e0] sm:$0xff] %v6981_v16  ;;  %7008 = vpow2.f32 %v5709_v54  ;;  %v2763_v52 = vadd.f32 %v2762_v28, %v8953_v30  ;;  %v2764_v40 = vpop.f32.mrf.mxu0 }
 0x2a1   :  { %v6985_v44 = vpop.eup %6984  ;;  %7010 = vrcp.f32 %v4518_v57  ;;  %v4524_v21 = vadd.f32 1.0, %v6983_v32  ;;  %v5716_v5 = vmul.f32 -1.442695, %v2954_v22  ;;  %v2765_v46 = vadd.f32 %v2764_v40, %v8966_v61  ;;  %v2957_v10 = vpop.f32.mrf.mxu1 }
 0x2a2   :  { %v6987_v6 = vpop.eup %6986  ;;  %5170 = vst [vmem:[%s9807_s5 + $0x4e8] sm:$0xff] %v6985_v44  ;;  %7012 = vpow2.f32 %v5715_v0  ;;  %v2956_v7 = vadd.f32 %v2955_v33, %v2763_v52  ;;  %v2994_v62 = vpop.f32.mrf.mxu0  ;;  %3443 = vmatmul.mubr.bf16.gmra.mxu0 %v9941_v41 }
 0x2a3   :  { %v6989_v30 = vpop.eup %6988  ;;  %7014 = vrcp.f32 %v4524_v21  ;;  %v4525_v26 = vadd.f32 1.0, %v6987_v6  ;;  %v2958_v60 = vadd.f32 %v2957_v10, %v2765_v46  ;;  %v2995_v12 = vadd.f32 %v2994_v62, %v9283_v39  ;;  %v3187_v61 = vpop.f32.mrf.mxu1  ;;  %3604 = vmatmul.mubr.bf16.gmra.mxu1 %v9942_v50  ;;  %3450 = vmatprep.mubr.bf16.mxu0 %v9943_v25  ;;  %v9945_v46 = vld [vmem:[#allocation15_spill] sm:$0xff]  ;;  %v9946_v10 = vld [vmem:[#allocation16_spill] sm:$0xff]  ;;  %v9947_v62 = vld [vmem:[#allocation17_spill] sm:$0xff] }
 0x2a4   :  { %v6991_v38 = vpop.eup %6990  ;;  %5176 = vst [vmem:[%s9807_s5 + $0x518] sm:$0xff] %v6989_v30  ;;  %7016 = vpow2.f32 %v5716_v5  ;;  %v5722_v15 = vmul.f32 -1.442695, %v2956_v7  ;;  %3611 = vmatprep.mubr.bf16.mxu1 %v9944_v48  ;;  %v2996_v51 = vpop.f32.mrf.mxu0 }
 0x2a5   :  { %v6993_v35 = vpop.eup %6992  ;;  %7018 = vrcp.f32 %v4525_v26  ;;  %v4531_v18 = vadd.f32 1.0, %v6991_v38  ;;  %v5723_v49 = vmul.f32 -1.442695, %v2958_v60  ;;  %v3188_v23 = vadd.f32 %v3187_v61, %v2995_v12  ;;  %v3189_v24 = vpop.f32.mrf.mxu1 }
 0x2a6   :  { %v6995_v58 = vpop.eup %6994  ;;  %5177 = vst [vmem:[%s9807_s5 + $0x520] sm:$0xff] %v6993_v35  ;;  %7020 = vpow2.f32 %v5722_v15  ;;  %v2997_v43 = vadd.f32 %v2996_v51, %v9295_v13  ;;  %v2998_v8 = vpop.f32.mrf.mxu0 }
 0x2a7   :  { %v6997_v9 = vpop.eup %6996  ;;  %7022 = vrcp.f32 %v4531_v18  ;;  %v4532_v34 = vadd.f32 1.0, %v6995_v58  ;;  %v5507_v53 = vmul.f32 -1.442695, %v3188_v23  ;;  %v2999_v45 = vadd.f32 %v2998_v8, %v9283_v39  ;;  %v3191_v29 = vpop.f32.mrf.mxu1 }
 0x2a8   :  { %v6999_v63 = vpop.eup %6998  ;;  %v4538_v56 = vadd.f32 1.0, %v6997_v9  ;;  %7024 = vpow2.f32 %v5723_v49  ;;  %v3190_v54 = vadd.f32 %v3189_v24, %v2997_v43  ;;  %v3000_v28 = vpop.f32.mrf.mxu0 }
 0x2a9   :  { %v7001_v14 = vpop.eup %7000  ;;  %5183 = vst [vmem:[%s9807_s5 + $0x550] sm:$0xff] %v6999_v63  ;;  %7026 = vrcp.f32 %v4532_v34  ;;  %v3192_v20 = vadd.f32 %v3191_v29, %v2999_v45  ;;  %v3001_v16 = vadd.f32 %v3000_v28, %v9295_v13  ;;  %v3193_v57 = vpop.f32.mrf.mxu1  ;;  %v9948_v29 = vld [vmem:[#allocation18_spill] sm:$0xff] }
 0x2aa   :  { %v7003_v0 = vpop.eup %7002  ;;  %7028 = vrcp.f32 %v4538_v56  ;;  %v4539_v22 = vadd.f32 1.0, %v7001_v14  ;;  %v5508_v33 = vmul.f32 -1.442695, %v3190_v54  ;;  %v3004_v32 = vpop.f32.mrf.mxu0  ;;  %3451 = vmatmul.mubr.bf16.gmra.mxu0 %v9921_v59 }
 0x2ab   :  { %v7005_v52 = vpop.eup %7004  ;;  %5184 = vst [vmem:[%s9807_s5 + $0x558] sm:$0xff] %v7003_v0  ;;  %7030 = vpow2.f32 %v5507_v53  ;;  %v5514_v40 = vmul.f32 -1.442695, %v3192_v20  ;;  %v3194_v44 = vadd.f32 %v3193_v57, %v3001_v16  ;;  %v3005_v21 = vadd.f32 %v3004_v32, %v9283_v39  ;;  %v3197_v5 = vpop.f32.mrf.mxu1  ;;  %3612 = vmatmul.mubr.bf16.gmra.mxu1 %v9945_v46  ;;  %3458 = vmatprep.mubr.bf16.mxu0 %v9946_v10  ;;  %v9949_v20 = vld [vmem:[#allocation19_spill] sm:$0xff]  ;;  %v9950_v16 = vld [vmem:[#allocation20_spill] sm:$0xff] }
 0x2ac   :  { %v7007_v6 = vpop.eup %7006  ;;  %7032 = vrcp.f32 %v4539_v22  ;;  %v4545_v7 = vadd.f32 1.0, %v7005_v52  ;;  %3619 = vmatprep.mubr.bf16.mxu1 %v9947_v62  ;;  %v3006_v59 = vpop.f32.mrf.mxu0  ;;  %v9951_v22 = vld [vmem:[#allocation21_spill] sm:$0xff] }
 0x2ad   :  { %v7009_v41 = vpop.eup %7008  ;;  %5190 = vst [vmem:[%s9807_s5 + $0x588] sm:$0xff] %v7007_v6  ;;  %7034 = vpow2.f32 %v5508_v33  ;;  %v5515_v30 = vmul.f32 -1.442695, %v3194_v44  ;;  %v3198_v26 = vadd.f32 %v3197_v5, %v3005_v21  ;;  %v3007_v60 = vadd.f32 %v3006_v59, %v9295_v13  ;;  %v3199_v12 = vpop.f32.mrf.mxu1 }
 0x2ae   :  { %v7011_v61 = vpop.eup %7010  ;;  %7036 = vrcp.f32 %v4545_v7  ;;  %v4546_v50 = vadd.f32 1.0, %v7009_v41  ;;  %v3008_v25 = vpop.f32.mrf.mxu0 }
 0x2af   :  { %v7013_v38 = vpop.eup %7012  ;;  %5191 = vst [vmem:[%s9807_s5 + $0x590] sm:$0xff] %v7011_v61  ;;  %7038 = vpow2.f32 %v5514_v40  ;;  %v5521_v15 = vmul.f32 -1.442695, %v3198_v26  ;;  %v3200_v48 = vadd.f32 %v3199_v12, %v3007_v60  ;;  %v3009_v51 = vadd.f32 %v3008_v25, %v9283_v39  ;;  %v3201_v35 = vpop.f32.mrf.mxu1 }
 0x2b0   :  { %v7015_v18 = vpop.eup %7014  ;;  %7040 = vrcp.f32 %v4546_v50  ;;  %v4552_v49 = vadd.f32 1.0, %v7013_v38  ;;  %v3010_v23 = vpop.f32.mrf.mxu0 }
 0x2b1   :  { %v7017_v24 = vpop.eup %7016  ;;  %5197 = vst [vmem:[%s9807_s5 + $0x5c0] sm:$0xff] %v7015_v18  ;;  %7042 = vpow2.f32 %v5515_v30  ;;  %v5522_v58 = vmul.f32 -1.442695, %v3200_v48  ;;  %v3202_v43 = vadd.f32 %v3201_v35, %v3009_v51  ;;  %v3011_v8 = vadd.f32 %v3010_v23, %v9295_v13  ;;  %v3203_v9 = vpop.f32.mrf.mxu1  ;;  %v9952_v51 = vld [vmem:[#allocation22_spill] sm:$0xff] }
 0x2b2   :  { %v7019_v34 = vpop.eup %7018  ;;  %7044 = vrcp.f32 %v4552_v49  ;;  %v4553_v53 = vadd.f32 1.0, %v7017_v24  ;;  %v3014_v45 = vpop.f32.mrf.mxu0  ;;  %3459 = vmatmul.mubr.bf16.gmra.mxu0 %v9948_v29 }
 0x2b3   :  { %v7021_v63 = vpop.eup %7020  ;;  %5198 = vst [vmem:[%s9807_s5 + $0x5c8] sm:$0xff] %v7019_v34  ;;  %7046 = vpow2.f32 %v5521_v15  ;;  %v5528_v56 = vmul.f32 -1.442695, %v3202_v43  ;;  %v3204_v54 = vadd.f32 %v3203_v9, %v3011_v8  ;;  %v3015_v28 = vadd.f32 %v3014_v45, %v9283_v39  ;;  %v3207_v14 = vpop.f32.mrf.mxu1  ;;  %3620 = vmatmul.mubr.bf16.gmra.mxu1 %v9949_v20  ;;  %3466 = vmatprep.mubr.bf16.mxu0 %v9950_v16  ;;  %v9954_v43 = vld [vmem:[#allocation24_spill] sm:$0xff]  ;;  %v9955_v34 = vld [vmem:[#allocation25_spill] sm:$0xff] }
 0x2b4   :  { %v7023_v57 = vpop.eup %7022  ;;  %7048 = vrcp.f32 %v4553_v53  ;;  %v4559_v0 = vadd.f32 1.0, %v7021_v63  ;;  %3627 = vmatprep.mubr.bf16.mxu1 %v9951_v22  ;;  %v3016_v33 = vpop.f32.mrf.mxu0 }
 0x2b5   :  { %v7025_v32 = vpop.eup %7024  ;;  %5204 = vst [vmem:[%s9807_s5 + $0x5f8] sm:$0xff] %v7023_v57  ;;  %7050 = vpow2.f32 %v5522_v58  ;;  %v5529_v52 = vmul.f32 -1.442695, %v3204_v54  ;;  %v3208_v40 = vadd.f32 %v3207_v14, %v3015_v28  ;;  %v3017_v44 = vadd.f32 %v3016_v33, %v9295_v13  ;;  %v3209_v21 = vpop.f32.mrf.mxu1  ;;  %v9953_v58 = vld [vmem:[#allocation23_spill] sm:$0xff] }
 0x2b6   :  { %v7027_v5 = vpop.eup %7026  ;;  %7052 = vrcp.f32 %v4559_v0  ;;  %v4560_v46 = vadd.f32 1.0, %v7025_v32  ;;  %v3018_v10 = vpop.f32.mrf.mxu0 }
 0x2b7   :  { %v7029_v6 = vpop.eup %7028  ;;  %5205 = vst [vmem:[%s9807_s5 + $0x600] sm:$0xff] %v7027_v5  ;;  %7054 = vpow2.f32 %v5528_v56  ;;  %v5535_v7 = vmul.f32 -1.442695, %v3208_v40  ;;  %v3210_v62 = vadd.f32 %v3209_v21, %v3017_v44  ;;  %v3019_v59 = vadd.f32 %v3018_v10, %v9283_v39  ;;  %v3211_v41 = vpop.f32.mrf.mxu1 }
 0x2b8   :  { %v7031_v30 = vpop.eup %7030  ;;  %5211 = vst [vmem:[%s9807_s5 + $0x630] sm:$0xff] %v7029_v6  ;;  %7056 = vrcp.f32 %v4560_v46  ;;  %v3020_v26 = vpop.f32.mrf.mxu0 }
 0x2b9   :  { %v7033_v60 = vpop.eup %7032  ;;  %v4344_v12 = vadd.f32 1.0, %v7031_v30  ;;  %7058 = vpow2.f32 %v5529_v52  ;;  %v5536_v61 = vmul.f32 -1.442695, %v3210_v62  ;;  %v3212_v50 = vadd.f32 %v3211_v41, %v3019_v59  ;;  %v3213_v25 = vpop.f32.mrf.mxu1 }
 0x2ba   :  { %v7035_v38 = vpop.eup %7034  ;;  %5212 = vst [vmem:[%s9807_s5 + $0x638] sm:$0xff] %v7033_v60  ;;  %7060 = vpow2.f32 %v5535_v7  ;;  %v3021_v15 = vadd.f32 %v3020_v26, %v9295_v13  ;;  %v3024_v48 = vpop.f32.mrf.mxu0  ;;  %3467 = vmatmul.mubr.bf16.gmra.mxu0 %v9952_v51 }
 0x2bb   :  { %v7037_v35 = vpop.eup %7036  ;;  %7062 = vrcp.f32 %v4344_v12  ;;  %v4345_v18 = vadd.f32 1.0, %v7035_v38  ;;  %v5542_v49 = vmul.f32 -1.442695, %v3212_v50  ;;  %v3025_v23 = vadd.f32 %v3024_v48, %v9283_v39  ;;  %v3217_v24 = vpop.f32.mrf.mxu1  ;;  %3628 = vmatmul.mubr.bf16.gmra.mxu1 %v9953_v58  ;;  %3474 = vmatprep.mubr.bf16.mxu0 %v9954_v43 }
 0x2bc   :  { %v7039_v8 = vpop.eup %7038  ;;  %5218 = vst [vmem:[%s9807_s5 + $0x668] sm:$0xff] %v7037_v35  ;;  %7064 = vpow2.f32 %v5536_v61  ;;  %v3214_v9 = vadd.f32 %v3213_v25, %v3021_v15  ;;  %3635 = vmatprep.mubr.bf16.mxu1 %v9955_v34  ;;  %v3026_v53 = vpop.f32.mrf.mxu0 }
 0x2bd   :  { %v7041_v45 = vpop.eup %7040  ;;  %7066 = vrcp.f32 %v4345_v18  ;;  %v4351_v29 = vadd.f32 1.0, %v7039_v8  ;;  %v3218_v63 = vadd.f32 %v3217_v24, %v3025_v23  ;;  %v3027_v56 = vadd.f32 %v3026_v53, %v9295_v13  ;;  %v3219_v54 = vpop.f32.mrf.mxu1 }
 0x2be   :  { %v7043_v28 = vpop.eup %7042  ;;  %5219 = vst [vmem:[%s9807_s5 + $0x670] sm:$0xff] %v7041_v45  ;;  %7068 = vpow2.f32 %v5542_v49  ;;  %v5543_v14 = vmul.f32 -1.442695, %v3214_v9  ;;  %v3028_v20 = vpop.f32.mrf.mxu0 }
 0x2bf   :  { %v7045_v16 = vpop.eup %7044  ;;  %7070 = vrcp.f32 %v4351_v29  ;;  %v4352_v57 = vadd.f32 1.0, %v7043_v28  ;;  %v5549_v0 = vmul.f32 -1.442695, %v3218_v63  ;;  %v3220_v22 = vadd.f32 %v3219_v54, %v3027_v56  ;;  %v3221_v33 = vpop.f32.mrf.mxu1 }
 0x2c0   :  { %v7047_v32 = vpop.eup %7046  ;;  %5225 = vst [vmem:[%s9807_s5 + $0x6a0] sm:$0xff] %v7045_v16  ;;  %7072 = vpow2.f32 %v5543_v14  ;;  %v3029_v52 = vadd.f32 %v3028_v20, %v9283_v39  ;;  %v3030_v40 = vpop.f32.mrf.mxu0 }
 0x2c1   :  { %v7049_v44 = vpop.eup %7048  ;;  %7074 = vrcp.f32 %v4352_v57  ;;  %v4358_v21 = vadd.f32 1.0, %v7047_v32  ;;  %v5550_v5 = vmul.f32 -1.442695, %v3220_v22  ;;  %v3031_v46 = vadd.f32 %v3030_v40, %v9295_v13  ;;  %v3223_v10 = vpop.f32.mrf.mxu1 }
 0x2c2   :  { %v7051_v6 = vpop.eup %7050  ;;  %5226 = vst [vmem:[%s9807_s5 + $0x6a8] sm:$0xff] %v7049_v44  ;;  %7076 = vpow2.f32 %v5549_v0  ;;  %v3222_v7 = vadd.f32 %v3221_v33, %v3029_v52  ;;  %v3034_v62 = vpop.f32.mrf.mxu0  ;;  %3475 = vmatmul.mubr.bf16.gmra.mxu0 %v9906_v3 }
 0x2c3   :  { %v7053_v59 = vpop.eup %7052  ;;  %7078 = vrcp.f32 %v4358_v21  ;;  %v4359_v41 = vadd.f32 1.0, %v7051_v6  ;;  %v3224_v30 = vadd.f32 %v3223_v10, %v3031_v46  ;;  %v3035_v26 = vadd.f32 %v3034_v62, %v9283_v39  ;;  %v3227_v60 = vpop.f32.mrf.mxu1  ;;  %3636 = vmatmul.mubr.bf16.gmra.mxu1 %v9907_v42  ;;  %3482 = vmatprep.mubr.bf16.mxu0 %v8327_v36 }
 0x2c4   :  { %v7055_v12 = vpop.eup %7054  ;;  %5232 = vst [vmem:[%s9807_s5 + $0x6d8] sm:$0xff] %v7053_v59  ;;  %7080 = vpow2.f32 %v5550_v5  ;;  %v5556_v61 = vmul.f32 -1.442695, %v3222_v7  ;;  %3643 = vmatprep.mubr.bf16.mxu1 %v8329_v37  ;;  %v3036_v3 = vpop.f32.mrf.mxu0 }
 0x2c5   :  { %v7057_v50 = vpop.eup %7056  ;;  %7082 = vrcp.f32 %v4359_v41  ;;  %v4365_v25 = vadd.f32 1.0, %v7055_v12  ;;  %v5557_v38 = vmul.f32 -1.442695, %v3224_v30  ;;  %v3228_v15 = vadd.f32 %v3227_v60, %v3035_v26  ;;  %v3229_v48 = vpop.f32.mrf.mxu1 }
 0x2c6   :  { %v7059_v51 = vpop.eup %7058  ;;  %5233 = vst [vmem:[%s9807_s5 + $0x6e0] sm:$0xff] %v7057_v50  ;;  %7084 = vpow2.f32 %v5556_v61  ;;  %v3037_v36 = vadd.f32 %v3036_v3, %v9295_v13  ;;  %v3038_v42 = vpop.f32.mrf.mxu0 }
 0x2c7   :  { %v7061_v35 = vpop.eup %7060  ;;  %7086 = vrcp.f32 %v4365_v25  ;;  %v4366_v18 = vadd.f32 1.0, %v7059_v51  ;;  %v5563_v37 = vmul.f32 -1.442695, %v3228_v15  ;;  %v3039_v49 = vadd.f32 %v3038_v42, %v9283_v39  ;;  %v3231_v23 = vpop.f32.mrf.mxu1 }
 0x2c8   :  { %v7063_v24 = vpop.eup %7062  ;;  %v4372_v58 = vadd.f32 1.0, %v7061_v35  ;;  %7088 = vpow2.f32 %v5557_v38  ;;  %v3230_v43 = vadd.f32 %v3229_v48, %v3037_v36  ;;  %v3040_v8 = vpop.f32.mrf.mxu0  ;;  %v9956_v35 = vld [vmem:[#allocation28_spill] sm:$0xff] }
 0x2c9   :  { %v7065_v9 = vpop.eup %7064  ;;  %5016 = vst [vmem:[%s9807_s5 + $0x20] sm:$0xff] %v7063_v24  ;;  %7090 = vrcp.f32 %v4366_v18  ;;  %v3232_v34 = vadd.f32 %v3231_v23, %v3039_v49  ;;  %v3041_v53 = vadd.f32 %v3040_v8, %v9295_v13  ;;  %v3233_v45 = vpop.f32.mrf.mxu1 }
 0x2ca   :  { %v7067_v29 = vpop.eup %7066  ;;  %7092 = vrcp.f32 %v4372_v58  ;;  %v4373_v63 = vadd.f32 1.0, %v7065_v9  ;;  %v5564_v56 = vmul.f32 -1.442695, %v3230_v43  ;;  %v3044_v54 = vpop.f32.mrf.mxu0  ;;  %3483 = vmatmul.mubr.bf16.gmra.mxu0 %v8331_v2 }
 0x2cb   :  { %v7069_v28 = vpop.eup %7068  ;;  %5017 = vst [vmem:[%s9807_s5 + $0x28] sm:$0xff] %v7067_v29  ;;  %7094 = vpow2.f32 %v5563_v37  ;;  %v5570_v14 = vmul.f32 -1.442695, %v3232_v34  ;;  %v3234_v20 = vadd.f32 %v3233_v45, %v3041_v53  ;;  %v3045_v16 = vadd.f32 %v3044_v54, %v9283_v39  ;;  %v3237_v57 = vpop.f32.mrf.mxu1  ;;  %3644 = vmatmul.mubr.bf16.gmra.mxu1 %v8334_v11  ;;  %3490 = vmatprep.mubr.bf16.mxu0 %v8339_v55 }
 0x2cc   :  { %v7071_v0 = vpop.eup %7070  ;;  %7096 = vrcp.f32 %v4373_v63  ;;  %v4379_v22 = vadd.f32 1.0, %v7069_v28  ;;  %3651 = vmatprep.mubr.bf16.mxu1 %v8341_v47  ;;  %v3046_v2 = vpop.f32.mrf.mxu0 }
 0x2cd   :  { %v7073_v33 = vpop.eup %7072  ;;  %5024 = vst [vmem:[%s9807_s5 + $0x58] sm:$0xff] %v7071_v0  ;;  %7098 = vpow2.f32 %v5564_v56  ;;  %v5571_v32 = vmul.f32 -1.442695, %v3234_v20  ;;  %v3238_v52 = vadd.f32 %v3237_v57, %v3045_v16  ;;  %v3047_v40 = vadd.f32 %v3046_v2, %v9295_v13  ;;  %v3239_v44 = vpop.f32.mrf.mxu1 }
 0x2ce   :  { %v7075_v11 = vpop.eup %7074  ;;  %7100 = vrcp.f32 %v4379_v22  ;;  %v4380_v55 = vadd.f32 1.0, %v7073_v33  ;;  %v3048_v21 = vpop.f32.mrf.mxu0 }
 0x2cf   :  { %v7077_v5 = vpop.eup %7076  ;;  %5025 = vst [vmem:[%s9807_s5 + $0x60] sm:$0xff] %v7075_v11  ;;  %7102 = vpow2.f32 %v5570_v14  ;;  %v5577_v47 = vmul.f32 -1.442695, %v3238_v52  ;;  %v3240_v46 = vadd.f32 %v3239_v44, %v3047_v40  ;;  %v3049_v10 = vadd.f32 %v3048_v21, %v9283_v39  ;;  %v3241_v6 = vpop.f32.mrf.mxu1 }
 0x2d0   :  { %v7079_v7 = vpop.eup %7078  ;;  %7104 = vrcp.f32 %v4380_v55  ;;  %v4386_v62 = vadd.f32 1.0, %v7077_v5  ;;  %v3050_v59 = vpop.f32.mrf.mxu0 }
 0x2d1   :  { %v7081_v41 = vpop.eup %7080  ;;  %5031 = vst [vmem:[%s9807_s5 + $0x90] sm:$0xff] %v7079_v7  ;;  %7106 = vpow2.f32 %v5571_v32  ;;  %v5578_v30 = vmul.f32 -1.442695, %v3240_v46  ;;  %v3242_v26 = vadd.f32 %v3241_v6, %v3049_v10  ;;  %v3051_v60 = vadd.f32 %v3050_v59, %v9295_v13  ;;  %v3243_v12 = vpop.f32.mrf.mxu1 }
 0x2d2   :  { %v7083_v61 = vpop.eup %7082  ;;  %7108 = vrcp.f32 %v4386_v62  ;;  %v4387_v3 = vadd.f32 1.0, %v7081_v41  ;;  %v3054_v50 = vpop.f32.mrf.mxu0  ;;  %3491 = vmatmul.mubr.bf16.gmra.mxu0 %v8343_v31 }
 0x2d3   :  { %v7085_v25 = vpop.eup %7084  ;;  %5032 = vst [vmem:[%s9807_s5 + $0x98] sm:$0xff] %v7083_v61  ;;  %7110 = vpow2.f32 %v5577_v47  ;;  %v5584_v38 = vmul.f32 -1.442695, %v3242_v26  ;;  %v3244_v15 = vadd.f32 %v3243_v12, %v3051_v60  ;;  %v3055_v48 = vadd.f32 %v3054_v50, %v9283_v39  ;;  %v3247_v51 = vpop.f32.mrf.mxu1  ;;  %3652 = vmatmul.mubr.bf16.gmra.mxu1 %v8346_v19  ;;  %3498 = vmatprep.mubr.bf16.mxu0 %v8351_v17 }
 0x2d4   :  { %v7087_v36 = vpop.eup %7086  ;;  %7112 = vrcp.f32 %v4387_v3  ;;  %v4393_v42 = vadd.f32 1.0, %v7085_v25  ;;  %3659 = vmatprep.mubr.bf16.mxu1 %v9956_v35  ;;  %v3056_v31 = vpop.f32.mrf.mxu0 }
 0x2d5   :  { %v7089_v18 = vpop.eup %7088  ;;  %5038 = vst [vmem:[%s9807_s5 + $0xc8] sm:$0xff] %v7087_v36  ;;  %7114 = vpow2.f32 %v5578_v30  ;;  %v5585_v37 = vmul.f32 -1.442695, %v3244_v15  ;;  %v3248_v49 = vadd.f32 %v3247_v51, %v3055_v48  ;;  %v3057_v23 = vadd.f32 %v3056_v31, %v9295_v13  ;;  %v3249_v24 = vpop.f32.mrf.mxu1 }
 0x2d6   :  { %v7091_v19 = vpop.eup %7090  ;;  %7116 = vrcp.f32 %v4393_v42  ;;  %v4394_v17 = vadd.f32 1.0, %v7089_v18  ;;  %v3058_v58 = vpop.f32.mrf.mxu0 }
 0x2d7   :  { %v7093_v43 = vpop.eup %7092  ;;  %5039 = vst [vmem:[%s9807_s5 + $0xd0] sm:$0xff] %v7091_v19  ;;  %7118 = vpow2.f32 %v5584_v38  ;;  %v5591_v8 = vmul.f32 -1.442695, %v3248_v49  ;;  %v3250_v9 = vadd.f32 %v3249_v24, %v3057_v23  ;;  %v3059_v34 = vadd.f32 %v3058_v58, %v9283_v39  ;;  %v3251_v53 = vpop.f32.mrf.mxu1 }
 0x2d8   :  { %v7095_v45 = vpop.eup %7094  ;;  %5045 = vst [vmem:[%s9807_s5 + $0x100] sm:$0xff] %v7093_v43  ;;  %7120 = vrcp.f32 %v4394_v17  ;;  %v3060_v29 = vpop.f32.mrf.mxu0 }
 0x2d9   :  { %v7097_v63 = vpop.eup %7096  ;;  %v4400_v56 = vadd.f32 1.0, %v7095_v45  ;;  %7122 = vpow2.f32 %v5585_v37  ;;  %v5592_v54 = vmul.f32 -1.442695, %v3250_v9  ;;  %v3252_v28 = vadd.f32 %v3251_v53, %v3059_v34  ;;  %v3253_v14 = vpop.f32.mrf.mxu1 }
 0x2da   :  { %v7099_v20 = vpop.eup %7098  ;;  %5046 = vst [vmem:[%s9807_s5 + $0x108] sm:$0xff] %v7097_v63  ;;  %7124 = vpow2.f32 %v5591_v8  ;;  %v3061_v16 = vadd.f32 %v3060_v29, %v9295_v13  ;;  %v3064_v57 = vpop.f32.mrf.mxu0  ;;  %3499 = vmatmul.mubr.bf16.gmra.mxu0 %v8355_v27 }
 0x2db   :  { %v7101_v0 = vpop.eup %7100  ;;  %7126 = vrcp.f32 %v4400_v56  ;;  %v4401_v22 = vadd.f32 1.0, %v7099_v20  ;;  %v5598_v2 = vmul.f32 -1.442695, %v3252_v28  ;;  %v3065_v33 = vadd.f32 %v3064_v57, %v9283_v39  ;;  %v3257_v32 = vpop.f32.mrf.mxu1  ;;  %3660 = vmatmul.mubr.bf16.gmra.mxu1 %v8358_v4 }
 0x2dc   :  { %v7103_v52 = vpop.eup %7102  ;;  %5052 = vst [vmem:[%s9807_s5 + $0x138] sm:$0xff] %v7101_v0  ;;  %7128 = vpow2.f32 %v5592_v54  ;;  %v3254_v40 = vadd.f32 %v3253_v14, %v3061_v16  ;;  %v3066_v44 = vpop.f32.mrf.mxu0 }
 0x2dd   :  { %v7105_v11 = vpop.eup %7104  ;;  %7130 = vrcp.f32 %v4401_v22  ;;  %v4407_v27 = vadd.f32 1.0, %v7103_v52  ;;  %v3258_v55 = vadd.f32 %v3257_v32, %v3065_v33  ;;  %v3067_v21 = vadd.f32 %v3066_v44, %v9295_v13  ;;  %v3259_v5 = vpop.f32.mrf.mxu1 }
 0x2de   :  { %v7107_v47 = vpop.eup %7106  ;;  %5053 = vst [vmem:[%s9807_s5 + $0x140] sm:$0xff] %v7105_v11  ;;  %7132 = vpow2.f32 %v5598_v2  ;;  %v5599_v4 = vmul.f32 -1.442695, %v3254_v40  ;;  %v3068_v46 = vpop.f32.mrf.mxu0 }
 0x2df   :  { %v7109_v10 = vpop.eup %7108  ;;  %7134 = vrcp.f32 %v4407_v27  ;;  %v4408_v6 = vadd.f32 1.0, %v7107_v47  ;;  %v5605_v7 = vmul.f32 -1.442695, %v3258_v55  ;;  %v3260_v62 = vadd.f32 %v3259_v5, %v3067_v21  ;;  %v3261_v59 = vpop.f32.mrf.mxu1 }
 0x2e0   :  { %v7111_v41 = vpop.eup %7110  ;;  %5059 = vst [vmem:[%s9807_s5 + $0x170] sm:$0xff] %v7109_v10  ;;  %7136 = vpow2.f32 %v5599_v4  ;;  %v3069_v30 = vadd.f32 %v3068_v46, %v9283_v39  ;;  %v3070_v26 = vpop.f32.mrf.mxu0 }
 0x2e1   :  { %v7113_v60 = vpop.eup %7112  ;;  %7138 = vrcp.f32 %v4408_v6  ;;  %v4414_v12 = vadd.f32 1.0, %v7111_v41  ;;  %v5606_v61 = vmul.f32 -1.442695, %v3260_v62  ;;  %v3071_v3 = vadd.f32 %v3070_v26, %v9295_v13  ;;  %v3263_v50 = vpop.f32.mrf.mxu1 }
 0x2e2   :  { %v7115_v25 = vpop.eup %7114  ;;  %5060 = vst [vmem:[%s9807_s5 + $0x178] sm:$0xff] %v7113_v60  ;;  %7140 = vpow2.f32 %v5605_v7  ;;  %v3262_v38 = vadd.f32 %v3261_v59, %v3069_v30  ;;  %v3074_v15 = vpop.f32.mrf.mxu0 }
 0x2e3   :  { %v7117_v48 = vpop.eup %7116  ;;  %7142 = vrcp.f32 %v4414_v12  ;;  %v4415_v51 = vadd.f32 1.0, %v7115_v25  ;;  %v3264_v36 = vadd.f32 %v3263_v50, %v3071_v3  ;;  %v3075_v42 = vadd.f32 %v3074_v15, %v9283_v39  ;;  %v3267_v35 = vpop.f32.mrf.mxu1 }
 0x2e4   :  { %v7119_v31 = vpop.eup %7118  ;;  %5066 = vst [vmem:[%s9807_s5 + $0x1a8] sm:$0xff] %v7117_v48  ;;  %7144 = vpow2.f32 %v5606_v61  ;;  %v5612_v18 = vmul.f32 -1.442695, %v3262_v38  ;;  %v3076_v37 = vpop.f32.mrf.mxu0 }
 0x2e5   :  { %v7121_v49 = vpop.eup %7120  ;;  %7146 = vrcp.f32 %v4415_v51  ;;  %v4421_v23 = vadd.f32 1.0, %v7119_v31  ;;  %v5613_v24 = vmul.f32 -1.442695, %v3264_v36  ;;  %v3268_v19 = vadd.f32 %v3267_v35, %v3075_v42  ;;  %v3269_v17 = vpop.f32.mrf.mxu1 }
 0x2e6   :  { %v7123_v58 = vpop.eup %7122  ;;  %5067 = vst [vmem:[%s9807_s5 + $0x1b0] sm:$0xff] %v7121_v49  ;;  %7148 = vpow2.f32 %v5612_v18  ;;  %v3077_v43 = vadd.f32 %v3076_v37, %v9295_v13  ;;  %v3078_v8 = vpop.f32.mrf.mxu0 }
 0x2e7   :  { %v7125_v9 = vpop.eup %7124  ;;  %7150 = vrcp.f32 %v4421_v23  ;;  %v4422_v34 = vadd.f32 1.0, %v7123_v58  ;;  %v5619_v53 = vmul.f32 -1.442695, %v3268_v19  ;;  %v3079_v45 = vadd.f32 %v3078_v8, %v9283_v39  ;;  %v3271_v29 = vpop.f32.mrf.mxu1 }
 0x2e8   :  { %v7127_v63 = vpop.eup %7126  ;;  %v4428_v56 = vadd.f32 1.0, %v7125_v9  ;;  %7152 = vpow2.f32 %v5613_v24  ;;  %v3270_v54 = vadd.f32 %v3269_v17, %v3077_v43  ;;  %v3080_v28 = vpop.f32.mrf.mxu0 }
 0x2e9   :  { %v7129_v14 = vpop.eup %7128  ;;  %5073 = vst [vmem:[%s9807_s5 + $0x1e0] sm:$0xff] %v7127_v63  ;;  %7154 = vrcp.f32 %v4422_v34  ;;  %v3272_v20 = vadd.f32 %v3271_v29, %v3079_v45  ;;  %v3081_v16 = vadd.f32 %v3080_v28, %v9295_v13  ;;  %v3273_v57 = vpop.f32.mrf.mxu1 }
 0x2ea   :  { %v7131_v0 = vpop.eup %7130  ;;  %7156 = vrcp.f32 %v4428_v56  ;;  %v4429_v22 = vadd.f32 1.0, %v7129_v14  ;;  %v5620_v2 = vmul.f32 -1.442695, %v3270_v54  ;;  %v3084_v33 = vpop.f32.mrf.mxu0 }
 0x2eb   :  { %v7133_v32 = vpop.eup %7132  ;;  %5074 = vst [vmem:[%s9807_s5 + $0x1e8] sm:$0xff] %v7131_v0  ;;  %7158 = vpow2.f32 %v5619_v53  ;;  %v5626_v52 = vmul.f32 -1.442695, %v3272_v20  ;;  %v3274_v40 = vadd.f32 %v3273_v57, %v3081_v16  ;;  %v3085_v44 = vadd.f32 %v3084_v33, %v9283_v39  ;;  %v3277_v11 = vpop.f32.mrf.mxu1 }
 0x2ec   :  { %v7135_v27 = vpop.eup %7134  ;;  %7160 = vrcp.f32 %v4429_v22  ;;  %v4435_v55 = vadd.f32 1.0, %v7133_v32  ;;  %v3086_v21 = vpop.f32.mrf.mxu0 }
 0x2ed   :  { %v7137_v5 = vpop.eup %7136  ;;  %5080 = vst [vmem:[%s9807_s5 + $0x218] sm:$0xff] %v7135_v27  ;;  %7162 = vpow2.f32 %v5620_v2  ;;  %v5627_v47 = vmul.f32 -1.442695, %v3274_v40  ;;  %v3278_v4 = vadd.f32 %v3277_v11, %v3085_v44  ;;  %v3087_v46 = vadd.f32 %v3086_v21, %v9295_v13  ;;  %v3279_v10 = vpop.f32.mrf.mxu1 }
 0x2ee   :  { %v7139_v6 = vpop.eup %7138  ;;  %7164 = vrcp.f32 %v4435_v55  ;;  %v4436_v7 = vadd.f32 1.0, %v7137_v5  ;;  %v3088_v62 = vpop.f32.mrf.mxu0 }
 0x2ef   :  { %v7141_v59 = vpop.eup %7140  ;;  %5081 = vst [vmem:[%s9807_s5 + $0x220] sm:$0xff] %v7139_v6  ;;  %7166 = vpow2.f32 %v5626_v52  ;;  %v5633_v41 = vmul.f32 -1.442695, %v3278_v4  ;;  %v3280_v30 = vadd.f32 %v3279_v10, %v3087_v46  ;;  %v3089_v26 = vadd.f32 %v3088_v62, %v9283_v39  ;;  %v3281_v60 = vpop.f32.mrf.mxu1 }
 0x2f0   :  { %v7143_v12 = vpop.eup %7142  ;;  %7168 = vrcp.f32 %v4436_v7  ;;  %v4442_v61 = vadd.f32 1.0, %v7141_v59  ;;  %v3090_v3 = vpop.f32.mrf.mxu0 }
 0x2f1   :  { %v7145_v50 = vpop.eup %7144  ;;  %5087 = vst [vmem:[%s9807_s5 + $0x250] sm:$0xff] %v7143_v12  ;;  %7170 = vpow2.f32 %v5627_v47  ;;  %v5634_v25 = vmul.f32 -1.442695, %v3280_v30  ;;  %v3282_v38 = vadd.f32 %v3281_v60, %v3089_v26  ;;  %v3091_v15 = vadd.f32 %v3090_v3, %v9295_v13  ;;  %v3283_v48 = vpop.f32.mrf.mxu1 }
 0x2f2   :  { %v7147_v51 = vpop.eup %7146  ;;  %7172 = vrcp.f32 %v4442_v61  ;;  %v4443_v36 = vadd.f32 1.0, %v7145_v50  ;;  %v3094_v42 = vpop.f32.mrf.mxu0 }
 0x2f3   :  { %v7149_v35 = vpop.eup %7148  ;;  %5088 = vst [vmem:[%s9807_s5 + $0x258] sm:$0xff] %v7147_v51  ;;  %7174 = vpow2.f32 %v5633_v41  ;;  %v5640_v31 = vmul.f32 -1.442695, %v3282_v38  ;;  %v3284_v18 = vadd.f32 %v3283_v48, %v3091_v15  ;;  %v3095_v37 = vadd.f32 %v3094_v42, %v9283_v39  ;;  %v3287_v49 = vpop.f32.mrf.mxu1 }
 0x2f4   :  { %v7151_v23 = vpop.eup %7150  ;;  %7176 = vrcp.f32 %v4443_v36  ;;  %v4449_v24 = vadd.f32 1.0, %v7149_v35  ;;  %v3096_v19 = vpop.f32.mrf.mxu0 }
 0x2f5   :  { %v7153_v17 = vpop.eup %7152  ;;  %5094 = vst [vmem:[%s9807_s5 + $0x288] sm:$0xff] %v7151_v23  ;;  %7178 = vpow2.f32 %v5634_v25  ;;  %v5641_v58 = vmul.f32 -1.442695, %v3284_v18  ;;  %v3288_v43 = vadd.f32 %v3287_v49, %v3095_v37  ;;  %v3097_v8 = vadd.f32 %v3096_v19, %v9295_v13  ;;  %v3289_v9 = vpop.f32.mrf.mxu1 }
 0x2f6   :  { %v7155_v34 = vpop.eup %7154  ;;  %7180 = vrcp.f32 %v4449_v24  ;;  %v4450_v53 = vadd.f32 1.0, %v7153_v17  ;;  %v3098_v45 = vpop.f32.mrf.mxu0 }
 0x2f7   :  { %v7157_v29 = vpop.eup %7156  ;;  %5095 = vst [vmem:[%s9807_s5 + $0x290] sm:$0xff] %v7155_v34  ;;  %7182 = vpow2.f32 %v5640_v31  ;;  %v5647_v63 = vmul.f32 -1.442695, %v3288_v43  ;;  %v3290_v56 = vadd.f32 %v3289_v9, %v3097_v8  ;;  %v3099_v54 = vadd.f32 %v3098_v45, %v9283_v39  ;;  %v3291_v28 = vpop.f32.mrf.mxu1 }
 0x2f8   :  { %v7159_v14 = vpop.eup %7158  ;;  %5101 = vst [vmem:[%s9807_s5 + $0x2c0] sm:$0xff] %v7157_v29  ;;  %7184 = vrcp.f32 %v4450_v53  ;;  %v3100_v20 = vpop.f32.mrf.mxu0 }
 0x2f9   :  { %v7161_v16 = vpop.eup %7160  ;;  %v4456_v57 = vadd.f32 1.0, %v7159_v14  ;;  %7186 = vpow2.f32 %v5641_v58  ;;  %v5648_v0 = vmul.f32 -1.442695, %v3290_v56  ;;  %v3292_v22 = vadd.f32 %v3291_v28, %v3099_v54  ;;  %v3293_v2 = vpop.f32.mrf.mxu1 }
 0x2fa   :  { %v7163_v33 = vpop.eup %7162  ;;  %5102 = vst [vmem:[%s9807_s5 + $0x2c8] sm:$0xff] %v7161_v16  ;;  %7188 = vpow2.f32 %v5647_v63  ;;  %v3101_v32 = vadd.f32 %v3100_v20, %v9295_v13  ;;  %v3104_v52 = vpop.f32.mrf.mxu0 }
 0x2fb   :  { %v7165_v40 = vpop.eup %7164  ;;  %7190 = vrcp.f32 %v4456_v57  ;;  %v4457_v44 = vadd.f32 1.0, %v7163_v33  ;;  %v5654_v11 = vmul.f32 -1.442695, %v3292_v22  ;;  %v3105_v27 = vadd.f32 %v3104_v52, %v9283_v39  ;;  %v3297_v55 = vpop.f32.mrf.mxu1 }
 0x2fc   :  { %v7167_v21 = vpop.eup %7166  ;;  %5108 = vst [vmem:[%s9807_s5 + $0x2f8] sm:$0xff] %v7165_v40  ;;  %7192 = vpow2.f32 %v5648_v0  ;;  %v3294_v5 = vadd.f32 %v3293_v2, %v3101_v32  ;;  %v3106_v47 = vpop.f32.mrf.mxu0 }
 0x2fd   :  { %v7169_v4 = vpop.eup %7168  ;;  %7194 = vrcp.f32 %v4457_v44  ;;  %v4463_v46 = vadd.f32 1.0, %v7167_v21  ;;  %v3298_v10 = vadd.f32 %v3297_v55, %v3105_v27  ;;  %v3107_v6 = vadd.f32 %v3106_v47, %v9295_v13  ;;  %v3299_v7 = vpop.f32.mrf.mxu1 }
 0x2fe   :  { %v7171_v62 = vpop.eup %7170  ;;  %5109 = vst [vmem:[%s9807_s5 + $0x300] sm:$0xff] %v7169_v4  ;;  %7196 = vpow2.f32 %v5654_v11  ;;  %v5655_v59 = vmul.f32 -1.442695, %v3294_v5  ;;  %v3108_v41 = vpop.f32.mrf.mxu0 }
 0x2ff   :  { %v7173_v30 = vpop.eup %7172  ;;  %7198 = vrcp.f32 %v4463_v46  ;;  %v4464_v26 = vadd.f32 1.0, %v7171_v62  ;;  %v5661_v60 = vmul.f32 -1.442695, %v3298_v10  ;;  %v3300_v12 = vadd.f32 %v3299_v7, %v3107_v6  ;;  %v3301_v61 = vpop.f32.mrf.mxu1 }
 0x300   :  { %v7175_v3 = vpop.eup %7174  ;;  %5115 = vst [vmem:[%s9807_s5 + $0x330] sm:$0xff] %v7173_v30  ;;  %7200 = vpow2.f32 %v5655_v59  ;;  %v3109_v50 = vadd.f32 %v3108_v41, %v9283_v39  ;;  %v3110_v25 = vpop.f32.mrf.mxu0 }
 0x301   :  { %v7177_v38 = vpop.eup %7176  ;;  %7202 = vrcp.f32 %v4464_v26  ;;  %v4470_v15 = vadd.f32 1.0, %v7175_v3  ;;  %v5662_v48 = vmul.f32 -1.442695, %v3300_v12  ;;  %v3111_v51 = vadd.f32 %v3110_v25, %v9295_v13  ;;  %v3303_v36 = vpop.f32.mrf.mxu1 }
 0x302   :  { %v7179_v42 = vpop.eup %7178  ;;  %5116 = vst [vmem:[%s9807_s5 + $0x338] sm:$0xff] %v7177_v38  ;;  %7204 = vpow2.f32 %v5661_v60  ;;  %v3302_v35 = vadd.f32 %v3301_v61, %v3109_v50  ;;  %v3114_v31 = vpop.f32.mrf.mxu0 }
 0x303   :  { %v7181_v18 = vpop.eup %7180  ;;  %7206 = vrcp.f32 %v4470_v15  ;;  %v4471_v37 = vadd.f32 1.0, %v7179_v42  ;;  %v3304_v49 = vadd.f32 %v3303_v36, %v3111_v51  ;;  %v3115_v23 = vadd.f32 %v3114_v31, %v9283_v39  ;;  %v3307_v24 = vpop.f32.mrf.mxu1 }
 0x304   :  { %v7183_v19 = vpop.eup %7182  ;;  %5122 = vst [vmem:[%s9807_s5 + $0x368] sm:$0xff] %v7181_v18  ;;  %7208 = vpow2.f32 %v5662_v48  ;;  %v5668_v17 = vmul.f32 -1.442695, %v3302_v35  ;;  %v3116_v58 = vpop.f32.mrf.mxu0 }
 0x305   :  { %v7185_v43 = vpop.eup %7184  ;;  %7210 = vrcp.f32 %v4471_v37  ;;  %v4477_v8 = vadd.f32 1.0, %v7183_v19  ;;  %v5669_v9 = vmul.f32 -1.442695, %v3304_v49  ;;  %v3308_v34 = vadd.f32 %v3307_v24, %v3115_v23  ;;  %v3309_v53 = vpop.f32.mrf.mxu1 }
 0x306   :  { %v7187_v45 = vpop.eup %7186  ;;  %5123 = vst [vmem:[%s9807_s5 + $0x370] sm:$0xff] %v7185_v43  ;;  %7212 = vpow2.f32 %v5668_v17  ;;  %v3117_v29 = vadd.f32 %v3116_v58, %v9295_v13  ;;  %v3118_v63 = vpop.f32.mrf.mxu0 }
 0x307   :  { %v7189_v56 = vpop.eup %7188  ;;  %7214 = vrcp.f32 %v4477_v8  ;;  %v4478_v54 = vadd.f32 1.0, %v7187_v45  ;;  %v5675_v28 = vmul.f32 -1.442695, %v3308_v34  ;;  %v3119_v14 = vadd.f32 %v3118_v63, %v9283_v39  ;;  %v3311_v20 = vpop.f32.mrf.mxu1 }
 0x308   :  { %v7191_v16 = vpop.eup %7190  ;;  %v4484_v57 = vadd.f32 1.0, %v7189_v56  ;;  %7216 = vpow2.f32 %v5669_v9  ;;  %v3310_v0 = vadd.f32 %v3309_v53, %v3117_v29  ;;  %v3120_v22 = vpop.f32.mrf.mxu0 }
 0x309   :  { %v7193_v2 = vpop.eup %7192  ;;  %5129 = vst [vmem:[%s9807_s5 + $0x3a0] sm:$0xff] %v7191_v16  ;;  %7218 = vrcp.f32 %v4478_v54  ;;  %v3312_v33 = vadd.f32 %v3311_v20, %v3119_v14  ;;  %v3121_v32 = vadd.f32 %v3120_v22, %v9295_v13  ;;  %v3313_v52 = vpop.f32.mrf.mxu1 }
 0x30a   :  { %v7195_v40 = vpop.eup %7194  ;;  %7220 = vrcp.f32 %v4484_v57  ;;  %v4485_v44 = vadd.f32 1.0, %v7193_v2  ;;  %v5676_v11 = vmul.f32 -1.442695, %v3310_v0  ;;  %v3124_v27 = vpop.f32.mrf.mxu0 }
 0x30b   :  { %v7197_v55 = vpop.eup %7196  ;;  %5130 = vst [vmem:[%s9807_s5 + $0x3a8] sm:$0xff] %v7195_v40  ;;  %7222 = vpow2.f32 %v5675_v28  ;;  %v5682_v21 = vmul.f32 -1.442695, %v3312_v33  ;;  %v3314_v5 = vadd.f32 %v3313_v52, %v3121_v32  ;;  %v3125_v47 = vadd.f32 %v3124_v27, %v9283_v39  ;;  %v3317_v4 = vpop.f32.mrf.mxu1 }
 0x30c   :  { %v7199_v46 = vpop.eup %7198  ;;  %7224 = vrcp.f32 %v4485_v44  ;;  %v4491_v10 = vadd.f32 1.0, %v7197_v55  ;;  %v3126_v6 = vpop.f32.mrf.mxu0 }
 0x30d   :  { %v7201_v7 = vpop.eup %7200  ;;  %5136 = vst [vmem:[%s9807_s5 + $0x3d8] sm:$0xff] %v7199_v46  ;;  %7226 = vpow2.f32 %v5676_v11  ;;  %v5683_v62 = vmul.f32 -1.442695, %v3314_v5  ;;  %v3318_v59 = vadd.f32 %v3317_v4, %v3125_v47  ;;  %v3127_v41 = vadd.f32 %v3126_v6, %v9295_v13  ;;  %v3319_v30 = vpop.f32.mrf.mxu1 }
 0x30e   :  { %v7203_v26 = vpop.eup %7202  ;;  %7228 = vrcp.f32 %v4491_v10  ;;  %v4492_v60 = vadd.f32 1.0, %v7201_v7  ;;  %v3128_v12 = vpop.f32.mrf.mxu0 }
 0x30f   :  { %v7205_v61 = vpop.eup %7204  ;;  %5137 = vst [vmem:[%s9807_s5 + $0x3e0] sm:$0xff] %v7203_v26  ;;  %7230 = vpow2.f32 %v5682_v21  ;;  %v5689_v3 = vmul.f32 -1.442695, %v3318_v59  ;;  %v3320_v50 = vadd.f32 %v3319_v30, %v3127_v41  ;;  %v3129_v25 = vadd.f32 %v3128_v12, %v9283_v39  ;;  %v3321_v38 = vpop.f32.mrf.mxu1 }
 0x310   :  { %v7207_v15 = vpop.eup %7206  ;;  %7232 = vrcp.f32 %v4492_v60  ;;  %v4498_v48 = vadd.f32 1.0, %v7205_v61  ;;  %v3130_v51 = vpop.f32.mrf.mxu0 }
 0x311   :  { %v7209_v36 = vpop.eup %7208  ;;  %5143 = vst [vmem:[%s9807_s5 + $0x410] sm:$0xff] %v7207_v15  ;;  %7234 = vpow2.f32 %v5683_v62  ;;  %v5690_v42 = vmul.f32 -1.442695, %v3320_v50  ;;  %v3322_v35 = vadd.f32 %v3321_v38, %v3129_v25  ;;  %v3131_v31 = vadd.f32 %v3130_v51, %v9295_v13  ;;  %v3323_v18 = vpop.f32.mrf.mxu1 }
 0x312   :  { %v7211_v37 = vpop.eup %7210  ;;  %7236 = vrcp.f32 %v4498_v48  ;;  %v4499_v49 = vadd.f32 1.0, %v7209_v36  ;;  %v3134_v23 = vpop.f32.mrf.mxu0  ;;  %v1027_v50 = vsub.s32 6, %v9914_v1 }
 0x313   :  { %v7213_v24 = vpop.eup %7212  ;;  %5144 = vst [vmem:[%s9807_s5 + $0x418] sm:$0xff] %v7211_v37  ;;  %7238 = vpow2.f32 %v5689_v3  ;;  %v5696_v19 = vmul.f32 -1.442695, %v3322_v35  ;;  %v3324_v17 = vadd.f32 %v3323_v18, %v3131_v31  ;;  %v3135_v58 = vadd.f32 %v3134_v23, %v9283_v39  ;;  %v3327_v43 = vpop.f32.mrf.mxu1 }
 0x314   :  { %v7215_v8 = vpop.eup %7214  ;;  %7240 = vrcp.f32 %v4499_v49  ;;  %v4505_v9 = vadd.f32 1.0, %v7213_v24  ;;  %v3136_v34 = vpop.f32.mrf.mxu0 }
 0x315   :  { %v7217_v53 = vpop.eup %7216  ;;  %5150 = vst [vmem:[%s9807_s5 + $0x448] sm:$0xff] %v7215_v8  ;;  %7242 = vpow2.f32 %v5690_v42  ;;  %v5697_v45 = vmul.f32 -1.442695, %v3324_v17  ;;  %v3328_v29 = vadd.f32 %v3327_v43, %v3135_v58  ;;  %v3137_v63 = vadd.f32 %v3136_v34, %v9295_v13  ;;  %v3329_v56 = vpop.f32.mrf.mxu1  ;;  %v7430_v8 = vld [vmem:[%s9806_s4] sm:$0x7f] }
 0x316   :  { %v7219_v54 = vpop.eup %7218  ;;  %7244 = vrcp.f32 %v4505_v9  ;;  %v4506_v28 = vadd.f32 1.0, %v7217_v53  ;;  %v3138_v14 = vpop.f32.mrf.mxu0  ;;  %v9586_v9 = vrot.slane %v7430_v8, %v1027_v50 }
 0x317   :  { %v7221_v20 = vpop.eup %7220  ;;  %5151 = vst [vmem:[%s9807_s5 + $0x450] sm:$0xff] %v7219_v54  ;;  %7246 = vpow2.f32 %v5696_v19  ;;  %v5703_v16 = vmul.f32 -1.442695, %v3328_v29  ;;  %v3330_v57 = vadd.f32 %v3329_v56, %v3137_v63  ;;  %v3139_v0 = vadd.f32 %v3138_v14, %v9283_v39  ;;  %v3331_v22 = vpop.f32.mrf.mxu1 }
 0x318   :  { %v7223_v2 = vpop.eup %7222  ;;  %5157 = vst [vmem:[%s9807_s5 + $0x480] sm:$0xff] %v7221_v20  ;;  %7248 = vrcp.f32 %v4506_v28  ;;  %v3140_v33 = vpop.f32.mrf.mxu0 }
 0x319   :  { %v7225_v32 = vpop.eup %7224  ;;  %v4512_v52 = vadd.f32 1.0, %v7223_v2  ;;  %7250 = vpow2.f32 %v5697_v45  ;;  %v5704_v40 = vmul.f32 -1.442695, %v3330_v57  ;;  %v3332_v44 = vadd.f32 %v3331_v22, %v3139_v0  ;;  %v3333_v11 = vpop.f32.mrf.mxu1 }
 0x31a   :  { %v7227_v27 = vpop.eup %7226  ;;  %5158 = vst [vmem:[%s9807_s5 + $0x488] sm:$0xff] %v7225_v32  ;;  %7252 = vpow2.f32 %v5703_v16  ;;  %v3141_v55 = vadd.f32 %v3140_v33, %v9295_v13  ;;  %v3144_v21 = vpop.f32.mrf.mxu0 }
 0x31b   :  { %v7229_v5 = vpop.eup %7228  ;;  %7254 = vrcp.f32 %v4512_v52  ;;  %v4513_v47 = vadd.f32 1.0, %v7227_v27  ;;  %v5710_v4 = vmul.f32 -1.442695, %v3332_v44  ;;  %v3145_v46 = vadd.f32 %v3144_v21, %v9283_v39  ;;  %v3337_v10 = vpop.f32.mrf.mxu1 }
 0x31c   :  { %v7231_v6 = vpop.eup %7230  ;;  %5164 = vst [vmem:[%s9807_s5 + $0x4b8] sm:$0xff] %v7229_v5  ;;  %7256 = vpow2.f32 %v5704_v40  ;;  %v3334_v7 = vadd.f32 %v3333_v11, %v3141_v55  ;;  %v3146_v62 = vpop.f32.mrf.mxu0 }
 0x31d   :  { %v7233_v59 = vpop.eup %7232  ;;  %7258 = vrcp.f32 %v4513_v47  ;;  %v4519_v41 = vadd.f32 1.0, %v7231_v6  ;;  %v3338_v30 = vadd.f32 %v3337_v10, %v3145_v46  ;;  %v3147_v26 = vadd.f32 %v3146_v62, %v9295_v13  ;;  %v3339_v60 = vpop.f32.mrf.mxu1 }
 0x31e   :  { %v7235_v12 = vpop.eup %7234  ;;  %5165 = vst [vmem:[%s9807_s5 + $0x4c0] sm:$0xff] %v7233_v59  ;;  %7260 = vpow2.f32 %v5710_v4  ;;  %v5711_v61 = vmul.f32 -1.442695, %v3334_v7  ;;  %v3148_v3 = vpop.f32.mrf.mxu0 }
 0x31f   :  { %v7237_v25 = vpop.eup %7236  ;;  %7262 = vrcp.f32 %v4519_v41  ;;  %v4520_v38 = vadd.f32 1.0, %v7235_v12  ;;  %v5717_v15 = vmul.f32 -1.442695, %v3338_v30  ;;  %v3340_v48 = vadd.f32 %v3339_v60, %v3147_v26  ;;  %v3341_v51 = vpop.f32.mrf.mxu1 }
 0x320   :  { %v7239_v36 = vpop.eup %7238  ;;  %5171 = vst [vmem:[%s9807_s5 + $0x4f0] sm:$0xff] %v7237_v25  ;;  %7264 = vpow2.f32 %v5711_v61  ;;  %v3149_v42 = vadd.f32 %v3148_v3, %v9283_v39  ;;  %v3150_v35 = vpop.f32.mrf.mxu0 }
 0x321   :  { %v7241_v31 = vpop.eup %7240  ;;  %7266 = vrcp.f32 %v4520_v38  ;;  %v4526_v18 = vadd.f32 1.0, %v7239_v36  ;;  %v5718_v37 = vmul.f32 -1.442695, %v3340_v48  ;;  %v3151_v1 = vadd.f32 %v3150_v35, %v9295_v13  ;;  %v3343_v49 = vpop.f32.mrf.mxu1 }
 0x322   :  { %v7243_v23 = vpop.eup %7242  ;;  %5172 = vst [vmem:[%s9807_s5 + $0x4f8] sm:$0xff] %v7241_v31  ;;  %7268 = vpow2.f32 %v5717_v15  ;;  %v3342_v24 = vadd.f32 %v3341_v51, %v3149_v42  ;;  %v5743_v19 = vpop.f32.mrf.mxu0 }
 0x323   :  { %v7245_v17 = vpop.eup %7244  ;;  %7270 = vrcp.f32 %v4526_v18  ;;  %v4527_v58 = vadd.f32 1.0, %v7243_v23  ;;  %v3344_v39 = vadd.f32 %v3343_v49, %v3151_v1  ;;  %v5855_v43 = vpop.f32.mrf.mxu1 }
 0x324   :  { %v7247_v13 = vpop.eup %7246  ;;  %5178 = vst [vmem:[%s9807_s5 + $0x528] sm:$0xff] %v7245_v17  ;;  %7272 = vpow2.f32 %v5718_v37  ;;  %v5724_v34 = vmul.f32 -1.442695, %v3342_v24  ;;  %v5744_v53 = vpop.f32.mrf.mxu0 }
 0x325   :  { %v7249_v45 = vpop.eup %7248  ;;  %7274 = vrcp.f32 %v4527_v58  ;;  %v4533_v29 = vadd.f32 1.0, %v7247_v13  ;;  %v5725_v63 = vmul.f32 -1.442695, %v3344_v39  ;;  %v5745_v56 = vadd.f32 %v5744_v53, %v5743_v19  ;;  %v5856_v54 = vpop.f32.mrf.mxu1 }
 0x326   :  { %v7251_v28 = vpop.eup %7250  ;;  %5179 = vst [vmem:[%s9807_s5 + $0x530] sm:$0xff] %v7249_v45  ;;  %7276 = vpow2.f32 %v5724_v34  ;;  %v5746_v14 = vpop.f32.mrf.mxu0  ;;  %v5857_v0 = vadd.f32 %v5856_v54, %v5855_v43 }
 0x327   :  { %v7253_v20 = vpop.eup %7252  ;;  %7278 = vrcp.f32 %v4533_v29  ;;  %v4534_v16 = vadd.f32 1.0, %v7251_v28  ;;  %v3381_v57 = vadd.f32 %v5745_v56, %v9586_v9  ;;  %v5858_v22 = vpop.f32.mrf.mxu1 }
 0x328   :  { %v7255_v2 = vpop.eup %7254  ;;  %v4540_v33 = vadd.f32 1.0, %v7253_v20  ;;  %7280 = vpow2.f32 %v5725_v63  ;;  %v5747_v32 = vpop.f32.mrf.mxu0 }
 0x329   :  { %v7257_v52 = vpop.eup %7256  ;;  %5185 = vst [vmem:[%s9807_s5 + $0x560] sm:$0xff] %v7255_v2  ;;  %7282 = vrcp.f32 %v4534_v16  ;;  %v3542_v40 = vadd.f32 %v5857_v0, %v3381_v57  ;;  %v5748_v44 = vadd.f32 %v5747_v32, %v5746_v14  ;;  %v5859_v11 = vpop.f32.mrf.mxu1 }
 0x32a   :  { %v7259_v27 = vpop.eup %7258  ;;  %7284 = vrcp.f32 %v4540_v33  ;;  %v4541_v55 = vadd.f32 1.0, %v7257_v52  ;;  %v5749_v21 = vpop.f32.mrf.mxu0  ;;  %v5860_v46 = vadd.f32 %v5859_v11, %v5858_v22 }
 0x32b   :  { %v7261_v5 = vpop.eup %7260  ;;  %5186 = vst [vmem:[%s9807_s5 + $0x568] sm:$0xff] %v7259_v27  ;;  %v5509_v47 = vmul.f32 -1.442695, %v3542_v40  ;;  %v3384_v4 = vadd.f32 %v5748_v44, %v9586_v9  ;;  %v5861_v10 = vpop.f32.mrf.mxu1 }
 0x32c   :  { %v7263_v6 = vpop.eup %7262  ;;  %7286 = vrcp.f32 %v4541_v55  ;;  %v4547_v7 = vadd.f32 1.0, %v7261_v5  ;;  %v5750_v62 = vpop.f32.mrf.mxu0 }
 0x32d   :  { %v7265_v59 = vpop.eup %7264  ;;  %5192 = vst [vmem:[%s9807_s5 + $0x598] sm:$0xff] %v7263_v6  ;;  %7288 = vpow2.f32 %v5509_v47  ;;  %v3545_v41 = vadd.f32 %v5860_v46, %v3384_v4  ;;  %v5751_v30 = vadd.f32 %v5750_v62, %v5749_v21  ;;  %v5862_v26 = vpop.f32.mrf.mxu1 }
 0x32e   :  { %v7267_v60 = vpop.eup %7266  ;;  %7290 = vrcp.f32 %v4547_v7  ;;  %v4548_v12 = vadd.f32 1.0, %v7265_v59  ;;  %v5752_v61 = vpop.f32.mrf.mxu0  ;;  %v5863_v38 = vadd.f32 %v5862_v26, %v5861_v10 }
 0x32f   :  { %v7269_v3 = vpop.eup %7268  ;;  %5193 = vst [vmem:[%s9807_s5 + $0x5a0] sm:$0xff] %v7267_v60  ;;  %v5516_v50 = vmul.f32 -1.442695, %v3545_v41  ;;  %v3389_v25 = vadd.f32 %v5751_v30, %v9586_v9  ;;  %v5864_v15 = vpop.f32.mrf.mxu1 }
 0x330   :  { %v7271_v48 = vpop.eup %7270  ;;  %7292 = vrcp.f32 %v4548_v12  ;;  %v4554_v51 = vadd.f32 1.0, %v7269_v3  ;;  %v5753_v36 = vpop.f32.mrf.mxu0 }
 0x331   :  { %v7273_v42 = vpop.eup %7272  ;;  %5199 = vst [vmem:[%s9807_s5 + $0x5d0] sm:$0xff] %v7271_v48  ;;  %7294 = vpow2.f32 %v5516_v50  ;;  %v3550_v35 = vadd.f32 %v5863_v38, %v3389_v25  ;;  %v5754_v31 = vadd.f32 %v5753_v36, %v5752_v61  ;;  %v5865_v18 = vpop.f32.mrf.mxu1 }
 0x332   :  { %v7275_v37 = vpop.eup %7274  ;;  %7296 = vrcp.f32 %v4554_v51  ;;  %v4555_v1 = vadd.f32 1.0, %v7273_v42  ;;  %v5755_v49 = vpop.f32.mrf.mxu0  ;;  %v5866_v17 = vadd.f32 %v5865_v18, %v5864_v15 }
 0x333   :  { %v7277_v23 = vpop.eup %7276  ;;  %5200 = vst [vmem:[%s9807_s5 + $0x5d8] sm:$0xff] %v7275_v37  ;;  %v5523_v24 = vmul.f32 -1.442695, %v3550_v35  ;;  %v3392_v19 = vadd.f32 %v5754_v31, %v9586_v9  ;;  %v5867_v58 = vpop.f32.mrf.mxu1 }
 0x334   :  { %v7279_v39 = vpop.eup %7278  ;;  %7298 = vrcp.f32 %v4555_v1  ;;  %v4561_v43 = vadd.f32 1.0, %v7277_v23  ;;  %v5756_v8 = vpop.f32.mrf.mxu0 }
 0x335   :  { %v7281_v13 = vpop.eup %7280  ;;  %5206 = vst [vmem:[%s9807_s5 + $0x608] sm:$0xff] %v7279_v39  ;;  %7300 = vpow2.f32 %v5523_v24  ;;  %v3553_v34 = vadd.f32 %v5866_v17, %v3392_v19  ;;  %v5757_v53 = vadd.f32 %v5756_v8, %v5755_v49  ;;  %v5868_v45 = vpop.f32.mrf.mxu1 }
 0x336   :  { %v7283_v29 = vpop.eup %7282  ;;  %7302 = vrcp.f32 %v4561_v43  ;;  %v4562_v63 = vadd.f32 1.0, %v7281_v13  ;;  %v5758_v56 = vpop.f32.mrf.mxu0  ;;  %v5869_v20 = vadd.f32 %v5868_v45, %v5867_v58 }
 0x337   :  { %v7285_v54 = vpop.eup %7284  ;;  %5207 = vst [vmem:[%s9807_s5 + $0x610] sm:$0xff] %v7283_v29  ;;  %v5530_v28 = vmul.f32 -1.442695, %v3553_v34  ;;  %v3397_v14 = vadd.f32 %v5757_v53, %v9586_v9  ;;  %v5870_v16 = vpop.f32.mrf.mxu1 }
 0x338   :  { %5213 = vst [vmem:[%s9807_s5 + $0x640] sm:$0xff] %v7285_v54  ;;  %7304 = vrcp.f32 %v4562_v63  ;;  %v5759_v57 = vpop.f32.mrf.mxu0 }
 0x339   :  { %v7287_v0 = vpop.eup %7286  ;;  %7306 = vpow2.f32 %v5530_v28  ;;  %v3558_v22 = vadd.f32 %v5869_v20, %v3397_v14  ;;  %v5760_v2 = vadd.f32 %v5759_v57, %v5758_v56  ;;  %v5871_v33 = vpop.f32.mrf.mxu1 }
 0x33a   :  { %v7289_v32 = vpop.eup %7288  ;;  %5214 = vst [vmem:[%s9807_s5 + $0x648] sm:$0xff] %v7287_v0  ;;  %v5761_v52 = vpop.f32.mrf.mxu0  ;;  %v5872_v55 = vadd.f32 %v5871_v33, %v5870_v16 }
 0x33b   :  { %v7291_v40 = vpop.eup %7290  ;;  %v4346_v44 = vadd.f32 1.0, %v7289_v32  ;;  %v5537_v11 = vmul.f32 -1.442695, %v3558_v22  ;;  %v3400_v27 = vadd.f32 %v5760_v2, %v9586_v9  ;;  %v5873_v21 = vpop.f32.mrf.mxu1 }
 0x33c   :  { %5220 = vst [vmem:[%s9807_s5 + $0x678] sm:$0xff] %v7291_v40  ;;  %v5762_v5 = vpop.f32.mrf.mxu0 }
 0x33d   :  { %v7293_v47 = vpop.eup %7292  ;;  %7308 = vrcp.f32 %v4346_v44  ;;  %v3561_v4 = vadd.f32 %v5872_v55, %v3400_v27  ;;  %v5763_v46 = vadd.f32 %v5762_v5, %v5761_v52  ;;  %v5874_v10 = vpop.f32.mrf.mxu1 }
 0x33e   :  { %v7295_v6 = vpop.eup %7294  ;;  %5221 = vst [vmem:[%s9807_s5 + $0x680] sm:$0xff] %v7293_v47  ;;  %7310 = vpow2.f32 %v5537_v11  ;;  %v5764_v7 = vpop.f32.mrf.mxu0  ;;  %v5875_v26 = vadd.f32 %v5874_v10, %v5873_v21 }
 0x33f   :  { %v7297_v62 = vpop.eup %7296  ;;  %v4353_v59 = vadd.f32 1.0, %v7295_v6  ;;  %v5544_v41 = vmul.f32 -1.442695, %v3561_v4  ;;  %v3405_v30 = vadd.f32 %v5763_v46, %v9586_v9  ;;  %v5876_v60 = vpop.f32.mrf.mxu1 }
 0x340   :  { %5227 = vst [vmem:[%s9807_s5 + $0x6b0] sm:$0xff] %v7297_v62  ;;  %v5765_v12 = vpop.f32.mrf.mxu0 }
 0x341   :  { %v7299_v61 = vpop.eup %7298  ;;  %7312 = vrcp.f32 %v4353_v59  ;;  %v3566_v3 = vadd.f32 %v5875_v26, %v3405_v30  ;;  %v5766_v50 = vadd.f32 %v5765_v12, %v5764_v7  ;;  %v5877_v25 = vpop.f32.mrf.mxu1 }
 0x342   :  { %v7301_v38 = vpop.eup %7300  ;;  %5228 = vst [vmem:[%s9807_s5 + $0x6b8] sm:$0xff] %v7299_v61  ;;  %7314 = vpow2.f32 %v5544_v41  ;;  %v5767_v15 = vpop.f32.mrf.mxu0  ;;  %v5878_v35 = vadd.f32 %v5877_v25, %v5876_v60 }
 0x343   :  { %v7303_v48 = vpop.eup %7302  ;;  %v4360_v51 = vadd.f32 1.0, %v7301_v38  ;;  %v5551_v36 = vmul.f32 -1.442695, %v3566_v3  ;;  %v3408_v42 = vadd.f32 %v5766_v50, %v9586_v9  ;;  %v5879_v31 = vpop.f32.mrf.mxu1 }
 0x344   :  { %5234 = vst [vmem:[%s9807_s5 + $0x6e8] sm:$0xff] %v7303_v48  ;;  %v5768_v18 = vpop.f32.mrf.mxu0 }
 0x345   :  { %v7305_v37 = vpop.eup %7304  ;;  %7316 = vrcp.f32 %v4360_v51  ;;  %v3569_v1 = vadd.f32 %v5878_v35, %v3408_v42  ;;  %v5769_v49 = vadd.f32 %v5768_v18, %v5767_v15  ;;  %v5880_v23 = vpop.f32.mrf.mxu1 }
 0x346   :  { %v7307_v24 = vpop.eup %7306  ;;  %5235 = vst [vmem:[%s9807_s5 + $0x6f0] sm:$0xff] %v7305_v37  ;;  %7318 = vpow2.f32 %v5551_v36  ;;  %v5770_v19 = vpop.f32.mrf.mxu0  ;;  %v5881_v43 = vadd.f32 %v5880_v23, %v5879_v31 }
 0x347   :  { %v4367_v17 = vadd.f32 1.0, %v7307_v24  ;;  %v5558_v58 = vmul.f32 -1.442695, %v3569_v1  ;;  %v3413_v39 = vadd.f32 %v5769_v49, %v9586_v9  ;;  %v5882_v8 = vpop.f32.mrf.mxu1 }
 0x348   :  { %v5771_v13 = vpop.f32.mrf.mxu0 }
 0x349   :  { %7320 = vrcp.f32 %v4367_v17  ;;  %v3574_v34 = vadd.f32 %v5881_v43, %v3413_v39  ;;  %v5772_v53 = vadd.f32 %v5771_v13, %v5770_v19  ;;  %v5883_v45 = vpop.f32.mrf.mxu1 }
 0x34a   :  { %v7309_v29 = vpop.eup %7308  ;;  %7322 = vpow2.f32 %v5558_v58  ;;  %v5773_v63 = vpop.f32.mrf.mxu0  ;;  %v5884_v14 = vadd.f32 %v5883_v45, %v5882_v8 }
 0x34b   :  { %v7311_v56 = vpop.eup %7310  ;;  %5019 = vst.msk [vmem:[%s9807_s5 + $0x30] sm:$0xff] %vm5018_vm2, %v7309_v29  ;;  %v5565_v54 = vmul.f32 -1.442695, %v3574_v34  ;;  %v3416_v28 = vadd.f32 %v5772_v53, %v9586_v9  ;;  %v5885_v20 = vpop.f32.mrf.mxu1 }
 0x34c   :  { %v4374_v16 = vadd.f32 1.0, %v7311_v56  ;;  %v5774_v57 = vpop.f32.mrf.mxu0 }
 0x34d   :  { %7324 = vpow2.f32 %v5565_v54  ;;  %v3577_v0 = vadd.f32 %v5884_v14, %v3416_v28  ;;  %v5775_v22 = vadd.f32 %v5774_v57, %v5773_v63  ;;  %v5886_v2 = vpop.f32.mrf.mxu1 }
 0x34e   :  { %v7313_v33 = vpop.eup %7312  ;;  %7326 = vrcp.f32 %v4374_v16  ;;  %v5776_v32 = vpop.f32.mrf.mxu0  ;;  %v5887_v11 = vadd.f32 %v5886_v2, %v5885_v20 }
 0x34f   :  { %v7315_v52 = vpop.eup %7314  ;;  %5026 = vst.msk [vmem:[%s9807_s5 + $0x68] sm:$0xff] %vm5018_vm2, %v7313_v33  ;;  %v5572_v40 = vmul.f32 -1.442695, %v3577_v0  ;;  %v3421_v44 = vadd.f32 %v5775_v22, %v9586_v9  ;;  %v5888_v27 = vpop.f32.mrf.mxu1 }
 0x350   :  { %v4381_v55 = vadd.f32 1.0, %v7315_v52  ;;  %v5777_v21 = vpop.f32.mrf.mxu0 }
 0x351   :  { %7328 = vpow2.f32 %v5572_v40  ;;  %v3582_v5 = vadd.f32 %v5887_v11, %v3421_v44  ;;  %v5778_v47 = vadd.f32 %v5777_v21, %v5776_v32  ;;  %v5889_v4 = vpop.f32.mrf.mxu1 }
 0x352   :  { %v7317_v46 = vpop.eup %7316  ;;  %7330 = vrcp.f32 %v4381_v55  ;;  %v5779_v10 = vpop.f32.mrf.mxu0  ;;  %v5890_v59 = vadd.f32 %v5889_v4, %v5888_v27 }
 0x353   :  { %v7319_v6 = vpop.eup %7318  ;;  %5033 = vst.msk [vmem:[%s9807_s5 + $0xa0] sm:$0xff] %vm5018_vm2, %v7317_v46  ;;  %v5579_v7 = vmul.f32 -1.442695, %v3582_v5  ;;  %v3424_v62 = vadd.f32 %v5778_v47, %v9586_v9  ;;  %v5891_v41 = vpop.f32.mrf.mxu1 }
 0x354   :  { %v4388_v30 = vadd.f32 1.0, %v7319_v6  ;;  %v5780_v26 = vpop.f32.mrf.mxu0 }
 0x355   :  { %7332 = vpow2.f32 %v5579_v7  ;;  %v3585_v60 = vadd.f32 %v5890_v59, %v3424_v62  ;;  %v5781_v12 = vadd.f32 %v5780_v26, %v5779_v10  ;;  %v5892_v61 = vpop.f32.mrf.mxu1 }
 0x356   :  { %v7321_v3 = vpop.eup %7320  ;;  %7334 = vrcp.f32 %v4388_v30  ;;  %v5782_v50 = vpop.f32.mrf.mxu0  ;;  %v5893_v48 = vadd.f32 %v5892_v61, %v5891_v41 }
 0x357   :  { %v7323_v25 = vpop.eup %7322  ;;  %5040 = vst.msk [vmem:[%s9807_s5 + $0xd8] sm:$0xff] %vm5018_vm2, %v7321_v3  ;;  %v5586_v38 = vmul.f32 -1.442695, %v3585_v60  ;;  %v3429_v15 = vadd.f32 %v5781_v12, %v9586_v9  ;;  %v5894_v51 = vpop.f32.mrf.mxu1 }
 0x358   :  { %v4395_v36 = vadd.f32 1.0, %v7323_v25  ;;  %v5783_v42 = vpop.f32.mrf.mxu0 }
 0x359   :  { %7336 = vpow2.f32 %v5586_v38  ;;  %v3590_v35 = vadd.f32 %v5893_v48, %v3429_v15  ;;  %v5784_v31 = vadd.f32 %v5783_v42, %v5782_v50  ;;  %v5895_v18 = vpop.f32.mrf.mxu1 }
 0x35a   :  { %v7325_v37 = vpop.eup %7324  ;;  %7338 = vrcp.f32 %v4395_v36  ;;  %v5785_v1 = vpop.f32.mrf.mxu0  ;;  %v5896_v17 = vadd.f32 %v5895_v18, %v5894_v51 }
 0x35b   :  { %v7327_v49 = vpop.eup %7326  ;;  %v4402_v23 = vadd.f32 1.0, %v7325_v37  ;;  %v5593_v24 = vmul.f32 -1.442695, %v3590_v35  ;;  %v3432_v19 = vadd.f32 %v5784_v31, %v9586_v9  ;;  %v5897_v58 = vpop.f32.mrf.mxu1 }
 0x35c   :  { %5047 = vst.msk [vmem:[%s9807_s5 + $0x110] sm:$0xff] %vm5018_vm2, %v7327_v49  ;;  %v5786_v39 = vpop.f32.mrf.mxu0 }
 0x35d   :  { %7340 = vrcp.f32 %v4402_v23  ;;  %v3593_v43 = vadd.f32 %v5896_v17, %v3432_v19  ;;  %v5787_v8 = vadd.f32 %v5786_v39, %v5785_v1  ;;  %v5898_v13 = vpop.f32.mrf.mxu1 }
 0x35e   :  { %v7329_v34 = vpop.eup %7328  ;;  %7342 = vpow2.f32 %v5593_v24  ;;  %v5788_v53 = vpop.f32.mrf.mxu0  ;;  %v5899_v54 = vadd.f32 %v5898_v13, %v5897_v58 }
 0x35f   :  { %v7331_v45 = vpop.eup %7330  ;;  %v4409_v29 = vadd.f32 1.0, %v7329_v34  ;;  %v5600_v63 = vmul.f32 -1.442695, %v3593_v43  ;;  %v3437_v56 = vadd.f32 %v5787_v8, %v9586_v9  ;;  %v5900_v28 = vpop.f32.mrf.mxu1 }
 0x360   :  { %5054 = vst.msk [vmem:[%s9807_s5 + $0x148] sm:$0xff] %vm5018_vm2, %v7331_v45  ;;  %v5789_v14 = vpop.f32.mrf.mxu0 }
 0x361   :  { %7344 = vrcp.f32 %v4409_v29  ;;  %v3598_v20 = vadd.f32 %v5899_v54, %v3437_v56  ;;  %v5790_v16 = vadd.f32 %v5789_v14, %v5788_v53  ;;  %v5901_v57 = vpop.f32.mrf.mxu1 }
 0x362   :  { %v7333_v0 = vpop.eup %7332  ;;  %7346 = vpow2.f32 %v5600_v63  ;;  %v5791_v22 = vpop.f32.mrf.mxu0  ;;  %v5902_v40 = vadd.f32 %v5901_v57, %v5900_v28 }
 0x363   :  { %v7335_v2 = vpop.eup %7334  ;;  %v4416_v33 = vadd.f32 1.0, %v7333_v0  ;;  %v5607_v32 = vmul.f32 -1.442695, %v3598_v20  ;;  %v3440_v52 = vadd.f32 %v5790_v16, %v9586_v9  ;;  %v5903_v44 = vpop.f32.mrf.mxu1 }
 0x364   :  { %5061 = vst.msk [vmem:[%s9807_s5 + $0x180] sm:$0xff] %vm5018_vm2, %v7335_v2  ;;  %v5792_v11 = vpop.f32.mrf.mxu0 }
 0x365   :  { %7348 = vrcp.f32 %v4416_v33  ;;  %v3601_v27 = vadd.f32 %v5902_v40, %v3440_v52  ;;  %v5793_v55 = vadd.f32 %v5792_v11, %v5791_v22  ;;  %v5904_v21 = vpop.f32.mrf.mxu1 }
 0x366   :  { %v7337_v5 = vpop.eup %7336  ;;  %7350 = vpow2.f32 %v5607_v32  ;;  %v5794_v47 = vpop.f32.mrf.mxu0  ;;  %v5905_v7 = vadd.f32 %v5904_v21, %v5903_v44 }
 0x367   :  { %v7339_v4 = vpop.eup %7338  ;;  %v4423_v46 = vadd.f32 1.0, %v7337_v5  ;;  %v5614_v10 = vmul.f32 -1.442695, %v3601_v27  ;;  %v3445_v6 = vadd.f32 %v5793_v55, %v9586_v9  ;;  %v5906_v62 = vpop.f32.mrf.mxu1 }
 0x368   :  { %5068 = vst.msk [vmem:[%s9807_s5 + $0x1b8] sm:$0xff] %vm5018_vm2, %v7339_v4  ;;  %v5795_v59 = vpop.f32.mrf.mxu0 }
 0x369   :  { %7352 = vrcp.f32 %v4423_v46  ;;  %v3606_v41 = vadd.f32 %v5905_v7, %v3445_v6  ;;  %v5796_v30 = vadd.f32 %v5795_v59, %v5794_v47  ;;  %v5907_v26 = vpop.f32.mrf.mxu1 }
 0x36a   :  { %v7341_v60 = vpop.eup %7340  ;;  %7354 = vpow2.f32 %v5614_v10  ;;  %v5797_v12 = vpop.f32.mrf.mxu0  ;;  %v5908_v25 = vadd.f32 %v5907_v26, %v5906_v62 }
 0x36b   :  { %v7343_v61 = vpop.eup %7342  ;;  %5075 = vst.msk [vmem:[%s9807_s5 + $0x1f0] sm:$0xff] %vm5018_vm2, %v7341_v60  ;;  %v5621_v3 = vmul.f32 -1.442695, %v3606_v41  ;;  %v3448_v50 = vadd.f32 %v5796_v30, %v9586_v9  ;;  %v5909_v38 = vpop.f32.mrf.mxu1 }
 0x36c   :  { %v4430_v15 = vadd.f32 1.0, %v7343_v61  ;;  %v5798_v48 = vpop.f32.mrf.mxu0 }
 0x36d   :  { %7356 = vpow2.f32 %v5621_v3  ;;  %v3609_v51 = vadd.f32 %v5908_v25, %v3448_v50  ;;  %v5799_v36 = vadd.f32 %v5798_v48, %v5797_v12  ;;  %v5910_v42 = vpop.f32.mrf.mxu1 }
 0x36e   :  { %v7345_v35 = vpop.eup %7344  ;;  %7358 = vrcp.f32 %v4430_v15  ;;  %v5800_v31 = vpop.f32.mrf.mxu0  ;;  %v5911_v49 = vadd.f32 %v5910_v42, %v5909_v38 }
 0x36f   :  { %v7347_v18 = vpop.eup %7346  ;;  %5082 = vst.msk [vmem:[%s9807_s5 + $0x228] sm:$0xff] %vm5018_vm2, %v7345_v35  ;;  %v5628_v37 = vmul.f32 -1.442695, %v3609_v51  ;;  %v3453_v1 = vadd.f32 %v5799_v36, %v9586_v9  ;;  %v5912_v23 = vpop.f32.mrf.mxu1 }
 0x370   :  { %v4437_v24 = vadd.f32 1.0, %v7347_v18  ;;  %v5801_v19 = vpop.f32.mrf.mxu0 }
 0x371   :  { %7360 = vpow2.f32 %v5628_v37  ;;  %v3614_v17 = vadd.f32 %v5911_v49, %v3453_v1  ;;  %v5802_v58 = vadd.f32 %v5801_v19, %v5800_v31  ;;  %v5913_v39 = vpop.f32.mrf.mxu1 }
 0x372   :  { %v7349_v43 = vpop.eup %7348  ;;  %7362 = vrcp.f32 %v4437_v24  ;;  %v5803_v8 = vpop.f32.mrf.mxu0  ;;  %v5914_v45 = vadd.f32 %v5913_v39, %v5912_v23 }
 0x373   :  { %v7351_v13 = vpop.eup %7350  ;;  %5089 = vst.msk [vmem:[%s9807_s5 + $0x260] sm:$0xff] %vm5018_vm2, %v7349_v43  ;;  %v5635_v34 = vmul.f32 -1.442695, %v3614_v17  ;;  %v3456_v53 = vadd.f32 %v5802_v58, %v9586_v9  ;;  %v5915_v29 = vpop.f32.mrf.mxu1 }
 0x374   :  { %v4444_v63 = vadd.f32 1.0, %v7351_v13  ;;  %v5804_v56 = vpop.f32.mrf.mxu0 }
 0x375   :  { %7364 = vpow2.f32 %v5635_v34  ;;  %v3617_v54 = vadd.f32 %v5914_v45, %v3456_v53  ;;  %v5805_v28 = vadd.f32 %v5804_v56, %v5803_v8  ;;  %v5916_v14 = vpop.f32.mrf.mxu1 }
 0x376   :  { %v7353_v20 = vpop.eup %7352  ;;  %7366 = vrcp.f32 %v4444_v63  ;;  %v5806_v16 = vpop.f32.mrf.mxu0  ;;  %v5917_v2 = vadd.f32 %v5916_v14, %v5915_v29 }
 0x377   :  { %v7355_v57 = vpop.eup %7354  ;;  %5096 = vst.msk [vmem:[%s9807_s5 + $0x298] sm:$0xff] %vm5018_vm2, %v7353_v20  ;;  %v5642_v0 = vmul.f32 -1.442695, %v3617_v54  ;;  %v3461_v22 = vadd.f32 %v5805_v28, %v9586_v9  ;;  %v5918_v33 = vpop.f32.mrf.mxu1 }
 0x378   :  { %v4451_v32 = vadd.f32 1.0, %v7355_v57  ;;  %v5807_v52 = vpop.f32.mrf.mxu0 }
 0x379   :  { %7368 = vpow2.f32 %v5642_v0  ;;  %v3622_v40 = vadd.f32 %v5917_v2, %v3461_v22  ;;  %v5808_v44 = vadd.f32 %v5807_v52, %v5806_v16  ;;  %v5919_v11 = vpop.f32.mrf.mxu1 }
 0x37a   :  { %v7357_v27 = vpop.eup %7356  ;;  %7370 = vrcp.f32 %v4451_v32  ;;  %v5809_v55 = vpop.f32.mrf.mxu0  ;;  %v5920_v46 = vadd.f32 %v5919_v11, %v5918_v33 }
 0x37b   :  { %v7359_v21 = vpop.eup %7358  ;;  %v4458_v5 = vadd.f32 1.0, %v7357_v27  ;;  %v5649_v47 = vmul.f32 -1.442695, %v3622_v40  ;;  %v3464_v4 = vadd.f32 %v5808_v44, %v9586_v9  ;;  %v5921_v10 = vpop.f32.mrf.mxu1 }
 0x37c   :  { %5103 = vst.msk [vmem:[%s9807_s5 + $0x2d0] sm:$0xff] %vm5018_vm2, %v7359_v21  ;;  %v5810_v6 = vpop.f32.mrf.mxu0 }
 0x37d   :  { %7372 = vrcp.f32 %v4458_v5  ;;  %v3625_v7 = vadd.f32 %v5920_v46, %v3464_v4  ;;  %v5811_v62 = vadd.f32 %v5810_v6, %v5809_v55  ;;  %v5922_v59 = vpop.f32.mrf.mxu1 }
 0x37e   :  { %v7361_v41 = vpop.eup %7360  ;;  %7374 = vpow2.f32 %v5649_v47  ;;  %v5812_v30 = vpop.f32.mrf.mxu0  ;;  %v5923_v3 = vadd.f32 %v5922_v59, %v5921_v10 }
 0x37f   :  { %v7363_v26 = vpop.eup %7362  ;;  %v4465_v60 = vadd.f32 1.0, %v7361_v41  ;;  %v5656_v12 = vmul.f32 -1.442695, %v3625_v7  ;;  %v3469_v61 = vadd.f32 %v5811_v62, %v9586_v9  ;;  %v5924_v50 = vpop.f32.mrf.mxu1 }
 0x380   :  { %5110 = vst.msk [vmem:[%s9807_s5 + $0x308] sm:$0xff] %vm5018_vm2, %v7363_v26  ;;  %v5813_v25 = vpop.f32.mrf.mxu0 }
 0x381   :  { %7376 = vrcp.f32 %v4465_v60  ;;  %v3630_v38 = vadd.f32 %v5923_v3, %v3469_v61  ;;  %v5814_v15 = vadd.f32 %v5813_v25, %v5812_v30  ;;  %v5925_v48 = vpop.f32.mrf.mxu1 }
 0x382   :  { %v7365_v51 = vpop.eup %7364  ;;  %7378 = vpow2.f32 %v5656_v12  ;;  %v5815_v36 = vpop.f32.mrf.mxu0  ;;  %v5926_v37 = vadd.f32 %v5925_v48, %v5924_v50 }
 0x383   :  { %v7367_v42 = vpop.eup %7366  ;;  %v4472_v35 = vadd.f32 1.0, %v7365_v51  ;;  %v5663_v31 = vmul.f32 -1.442695, %v3630_v38  ;;  %v3472_v18 = vadd.f32 %v5814_v15, %v9586_v9  ;;  %v5927_v1 = vpop.f32.mrf.mxu1 }
 0x384   :  { %5117 = vst.msk [vmem:[%s9807_s5 + $0x340] sm:$0xff] %vm5018_vm2, %v7367_v42  ;;  %v5816_v49 = vpop.f32.mrf.mxu0 }
 0x385   :  { %7380 = vrcp.f32 %v4472_v35  ;;  %v3633_v23 = vadd.f32 %v5926_v37, %v3472_v18  ;;  %v5817_v24 = vadd.f32 %v5816_v49, %v5815_v36  ;;  %v5928_v19 = vpop.f32.mrf.mxu1 }
 0x386   :  { %v7369_v17 = vpop.eup %7368  ;;  %7382 = vpow2.f32 %v5663_v31  ;;  %v5818_v58 = vpop.f32.mrf.mxu0  ;;  %v5929_v34 = vadd.f32 %v5928_v19, %v5927_v1 }
 0x387   :  { %v7371_v39 = vpop.eup %7370  ;;  %v4479_v43 = vadd.f32 1.0, %v7369_v17  ;;  %v5670_v8 = vmul.f32 -1.442695, %v3633_v23  ;;  %v3477_v13 = vadd.f32 %v5817_v24, %v9586_v9  ;;  %v5930_v53 = vpop.f32.mrf.mxu1 }
 0x388   :  { %5124 = vst.msk [vmem:[%s9807_s5 + $0x378] sm:$0xff] %vm5018_vm2, %v7371_v39  ;;  %v5819_v45 = vpop.f32.mrf.mxu0 }
 0x389   :  { %7384 = vrcp.f32 %v4479_v43  ;;  %v3638_v29 = vadd.f32 %v5929_v34, %v3477_v13  ;;  %v5820_v63 = vadd.f32 %v5819_v45, %v5818_v58  ;;  %v5931_v56 = vpop.f32.mrf.mxu1 }
 0x38a   :  { %v7373_v54 = vpop.eup %7372  ;;  %7386 = vpow2.f32 %v5670_v8  ;;  %v5821_v28 = vpop.f32.mrf.mxu0  ;;  %v5932_v57 = vadd.f32 %v5931_v56, %v5930_v53 }
 0x38b   :  { %v7375_v14 = vpop.eup %7374  ;;  %5131 = vst.msk [vmem:[%s9807_s5 + $0x3b0] sm:$0xff] %vm5018_vm2, %v7373_v54  ;;  %v5677_v20 = vmul.f32 -1.442695, %v3638_v29  ;;  %v3480_v16 = vadd.f32 %v5820_v63, %v9586_v9  ;;  %v5933_v0 = vpop.f32.mrf.mxu1 }
 0x38c   :  { %v4486_v22 = vadd.f32 1.0, %v7375_v14  ;;  %v5822_v2 = vpop.f32.mrf.mxu0 }
 0x38d   :  { %7388 = vpow2.f32 %v5677_v20  ;;  %v3641_v33 = vadd.f32 %v5932_v57, %v3480_v16  ;;  %v5823_v32 = vadd.f32 %v5822_v2, %v5821_v28  ;;  %v5934_v52 = vpop.f32.mrf.mxu1 }
 0x38e   :  { %v7377_v40 = vpop.eup %7376  ;;  %7390 = vrcp.f32 %v4486_v22  ;;  %v5824_v44 = vpop.f32.mrf.mxu0  ;;  %v5935_v21 = vadd.f32 %v5934_v52, %v5933_v0 }
 0x38f   :  { %v7379_v11 = vpop.eup %7378  ;;  %5138 = vst.msk [vmem:[%s9807_s5 + $0x3e8] sm:$0xff] %vm5018_vm2, %v7377_v40  ;;  %v5684_v27 = vmul.f32 -1.442695, %v3641_v33  ;;  %v3485_v55 = vadd.f32 %v5823_v32, %v9586_v9  ;;  %v5936_v5 = vpop.f32.mrf.mxu1 }
 0x390   :  { %v4493_v47 = vadd.f32 1.0, %v7379_v11  ;;  %v5825_v4 = vpop.f32.mrf.mxu0 }
 0x391   :  { %7392 = vpow2.f32 %v5684_v27  ;;  %v3646_v46 = vadd.f32 %v5935_v21, %v3485_v55  ;;  %v5826_v10 = vadd.f32 %v5825_v4, %v5824_v44  ;;  %v5937_v6 = vpop.f32.mrf.mxu1 }
 0x392   :  { %v7381_v7 = vpop.eup %7380  ;;  %7394 = vrcp.f32 %v4493_v47  ;;  %v5827_v62 = vpop.f32.mrf.mxu0  ;;  %v5938_v26 = vadd.f32 %v5937_v6, %v5936_v5 }
 0x393   :  { %v7383_v59 = vpop.eup %7382  ;;  %5145 = vst.msk [vmem:[%s9807_s5 + $0x420] sm:$0xff] %vm5018_vm2, %v7381_v7  ;;  %v5691_v41 = vmul.f32 -1.442695, %v3646_v46  ;;  %v3488_v30 = vadd.f32 %v5826_v10, %v9586_v9  ;;  %v5939_v60 = vpop.f32.mrf.mxu1 }
 0x394   :  { %v4500_v12 = vadd.f32 1.0, %v7383_v59  ;;  %v5828_v61 = vpop.f32.mrf.mxu0 }
 0x395   :  { %7396 = vpow2.f32 %v5691_v41  ;;  %v3649_v3 = vadd.f32 %v5938_v26, %v3488_v30  ;;  %v5829_v50 = vadd.f32 %v5828_v61, %v5827_v62  ;;  %v5940_v25 = vpop.f32.mrf.mxu1 }
 0x396   :  { %v7385_v38 = vpop.eup %7384  ;;  %7398 = vrcp.f32 %v4500_v12  ;;  %v5830_v15 = vpop.f32.mrf.mxu0  ;;  %v5941_v42 = vadd.f32 %v5940_v25, %v5939_v60 }
 0x397   :  { %v7387_v48 = vpop.eup %7386  ;;  %5152 = vst.msk [vmem:[%s9807_s5 + $0x458] sm:$0xff] %vm5018_vm2, %v7385_v38  ;;  %v5698_v51 = vmul.f32 -1.442695, %v3649_v3  ;;  %v3493_v36 = vadd.f32 %v5829_v50, %v9586_v9  ;;  %v5942_v35 = vpop.f32.mrf.mxu1 }
 0x398   :  { %v4507_v31 = vadd.f32 1.0, %v7387_v48  ;;  %v5831_v18 = vpop.f32.mrf.mxu0 }
 0x399   :  { %7400 = vpow2.f32 %v5698_v51  ;;  %v3654_v37 = vadd.f32 %v5941_v42, %v3493_v36  ;;  %v5832_v1 = vadd.f32 %v5831_v18, %v5830_v15  ;;  %v5943_v49 = vpop.f32.mrf.mxu1 }
 0x39a   :  { %v7389_v23 = vpop.eup %7388  ;;  %7402 = vrcp.f32 %v4507_v31  ;;  %v5833_v24 = vpop.f32.mrf.mxu0  ;;  %v5944_v43 = vadd.f32 %v5943_v49, %v5942_v35 }
 0x39b   :  { %v7391_v19 = vpop.eup %7390  ;;  %v4514_v17 = vadd.f32 1.0, %v7389_v23  ;;  %v5705_v58 = vmul.f32 -1.442695, %v3654_v37  ;;  %v3496_v39 = vadd.f32 %v5832_v1, %v9586_v9  ;;  %v5945_v8 = vpop.f32.mrf.mxu1 }
 0x39c   :  { %5159 = vst.msk [vmem:[%s9807_s5 + $0x490] sm:$0xff] %vm5018_vm2, %v7391_v19  ;;  %v5834_v13 = vpop.f32.mrf.mxu0 }
 0x39d   :  { %7404 = vrcp.f32 %v4514_v17  ;;  %v3657_v34 = vadd.f32 %v5944_v43, %v3496_v39  ;;  %v5835_v53 = vadd.f32 %v5834_v13, %v5833_v24  ;;  %v5946_v45 = vpop.f32.mrf.mxu1 }
 0x39e   :  { %v7393_v29 = vpop.eup %7392  ;;  %7406 = vpow2.f32 %v5705_v58  ;;  %v5836_v63 = vpop.f32.mrf.mxu0  ;;  %v5947_v20 = vadd.f32 %v5946_v45, %v5945_v8 }
 0x39f   :  { %v7395_v56 = vpop.eup %7394  ;;  %v4521_v54 = vadd.f32 1.0, %v7393_v29  ;;  %v5712_v28 = vmul.f32 -1.442695, %v3657_v34  ;;  %v3501_v14 = vadd.f32 %v5835_v53, %v9586_v9  ;;  %v5948_v16 = vpop.f32.mrf.mxu1 }
 0x3a0   :  { %5166 = vst.msk [vmem:[%s9807_s5 + $0x4c8] sm:$0xff] %vm5018_vm2, %v7395_v56  ;;  %v5837_v57 = vpop.f32.mrf.mxu0 }
 0x3a1   :  { %7408 = vrcp.f32 %v4521_v54  ;;  %v3662_v0 = vadd.f32 %v5947_v20, %v3501_v14  ;;  %v5838_v22 = vadd.f32 %v5837_v57, %v5836_v63  ;;  %v5949_v2 = vpop.f32.mrf.mxu1 }
 0x3a2   :  { %v7397_v33 = vpop.eup %7396  ;;  %7410 = vpow2.f32 %v5712_v28  ;;  %v5950_v11 = vadd.f32 %v5949_v2, %v5948_v16 }
 0x3a3   :  { %v7399_v32 = vpop.eup %7398  ;;  %v4528_v52 = vadd.f32 1.0, %v7397_v33  ;;  %v5719_v40 = vmul.f32 -1.442695, %v3662_v0  ;;  %v3504_v44 = vadd.f32 %v5838_v22, %v9586_v9 }
 0x3a4   :  { %5173 = vst.msk [vmem:[%s9807_s5 + $0x500] sm:$0xff] %vm5018_vm2, %v7399_v32 }
 0x3a5   :  { %7412 = vrcp.f32 %v4528_v52  ;;  %v3665_v27 = vadd.f32 %v5950_v11, %v3504_v44 }
 0x3a6   :  { %v7401_v55 = vpop.eup %7400  ;;  %7414 = vpow2.f32 %v5719_v40 }
 0x3a7   :  { %v7403_v21 = vpop.eup %7402  ;;  %v4535_v5 = vadd.f32 1.0, %v7401_v55  ;;  %v5726_v47 = vmul.f32 -1.442695, %v3665_v27 }
 0x3a8   :  { %5180 = vst.msk [vmem:[%s9807_s5 + $0x538] sm:$0xff] %vm5018_vm2, %v7403_v21 }
 0x3a9   :  { %7416 = vrcp.f32 %v4535_v5 }
 0x3aa   :  { %v7405_v9 = vpop.eup %7404  ;;  %7418 = vpow2.f32 %v5726_v47 }
 0x3ab   :  { %v7407_v4 = vpop.eup %7406  ;;  %5187 = vst.msk [vmem:[%s9807_s5 + $0x570] sm:$0xff] %vm5018_vm2, %v7405_v9 }
 0x3ac   :  { %v4542_v46 = vadd.f32 1.0, %v7407_v4 }
 0x3ae   :  { %v7409_v10 = vpop.eup %7408  ;;  %7420 = vrcp.f32 %v4542_v46 }
 0x3af   :  { %v7411_v6 = vpop.eup %7410  ;;  %5194 = vst.msk [vmem:[%s9807_s5 + $0x5a8] sm:$0xff] %vm5018_vm2, %v7409_v10 }
 0x3b0   :  { %v4549_v7 = vadd.f32 1.0, %v7411_v6 }
 0x3b2   :  { %v7413_v62 = vpop.eup %7412  ;;  %7422 = vrcp.f32 %v4549_v7 }
 0x3b3   :  { %v7415_v59 = vpop.eup %7414  ;;  %5201 = vst.msk [vmem:[%s9807_s5 + $0x5e0] sm:$0xff] %vm5018_vm2, %v7413_v62 }
 0x3b4   :  { %v4556_v41 = vadd.f32 1.0, %v7415_v59 }
 0x3b6   :  { %v7417_v30 = vpop.eup %7416  ;;  %7424 = vrcp.f32 %v4556_v41 }
 0x3b7   :  { %v7419_v26 = vpop.eup %7418  ;;  %5208 = vst.msk [vmem:[%s9807_s5 + $0x618] sm:$0xff] %vm5018_vm2, %v7417_v30 }
 0x3b8   :  { %v4563_v60 = vadd.f32 1.0, %v7419_v26 }
 0x3ba   :  { %7426 = vrcp.f32 %v4563_v60 }
 0x3bb   :  { %v7421_v12 = vpop.eup %7420 }
 0x3bc   :  { %5215 = vst.msk [vmem:[%s9807_s5 + $0x650] sm:$0xff] %vm5018_vm2, %v7421_v12 }
 0x3bf   :  { %v7423_v61 = vpop.eup %7422 }
 0x3c0   :  { %5222 = vst.msk [vmem:[%s9807_s5 + $0x688] sm:$0xff] %vm5018_vm2, %v7423_v61 }
 0x3c3   :  { %v7425_v3 = vpop.eup %7424 }
 0x3c4   :  { %5229 = vst.msk [vmem:[%s9807_s5 + $0x6c0] sm:$0xff] %vm5018_vm2, %v7425_v3 }
 0x3c7   :  { %v7427_v50 = vpop.eup %7426 }
 0x3c8   :  { %5236 = vst.msk [vmem:[%s9807_s5 + $0x6f8] sm:$0xff] %vm5018_vm2, %v7427_v50 }

</bundles_post_ra>
